<compile_context>
chip_gen: v7x
topology: tpu7x:2x2x1
jax: 0.10.0
libtpu: 0.0.40
codegen_flags: <defaults>
</compile_context>

<pallas_src>
import functools

import jax
import jax.numpy as jnp
import numpy as np
from jax.experimental import pallas as pl
from jax.experimental.pallas import tpu as pltpu

LANE = 128      # lane width (last dim)
SUBLANE = 8     # f32 sublane width (second-to-last dim)


def _round_up(x, m):
    return ((x + m - 1) // m) * m


# -----------------------------------------------------------------------------
# Fused kernel: all GRU layers + fc1 -> ReLU -> fc_final in a single invocation.
# PyTorch GRU gate math:
#   r = sigmoid(x W_ir^T + b_ir + h W_hr^T + b_hr)
#   z = sigmoid(x W_iz^T + b_iz + h W_hz^T + b_hz)
#   n = tanh  (x W_in^T + b_in + r * (h W_hn^T + b_hn))
#   h' = (1 - z) * n + z * h
# -----------------------------------------------------------------------------
def make_fused_gru_kernel(layer_dim, T, Bp, Hp):
    def kernel(*refs):
        x_ref = refs[0]                                    # (T*Bp, D_pad)
        layer_refs = refs[1:1 + 4 * layer_dim]             # w_ih, w_hh, b_fold, b_hn per layer
        fc1w_ref, fc1b_ref, fc2w_ref, fc2b_ref = refs[1 + 4 * layer_dim:5 + 4 * layer_dim]
        out_ref = refs[5 + 4 * layer_dim]                  # (Bp, O_pad)
        gi_scr, seq_scr = refs[6 + 4 * layer_dim:]         # (T*Bp, 3*Hp), (T*Bp, Hp)

        cur_in_ref = x_ref
        h_last = jnp.zeros((Bp, Hp), jnp.float32)
        for l in range(layer_dim):
            w_ih_ref, w_hh_ref, b_fold_ref, b_hn_ref = layer_refs[4 * l:4 * l + 4]

            # Hoisted input projection for the whole sequence: one big MXU matmul
            # (includes b_ih plus the r/z parts of b_hh, pre-folded).
            gi_scr[...] = (
                jnp.dot(cur_in_ref[...], w_ih_ref[...],
                        preferred_element_type=jnp.float32)
                + b_fold_ref[...]
            )

            is_last = l == layer_dim - 1

            def step(t, h, _whh=w_hh_ref, _bhn=b_hn_ref, _is_last=is_last):
                off = pl.multiple_of(t * Bp, Bp)
                g = gi_scr[pl.ds(off, Bp), :]              # (Bp, 3*Hp) lane-aligned gates
                gh = jnp.dot(h, _whh[...], preferred_element_type=jnp.float32)
                r = jax.nn.sigmoid(g[:, :Hp] + gh[:, :Hp])
                z = jax.nn.sigmoid(g[:, Hp:2 * Hp] + gh[:, Hp:2 * Hp])
                n = jnp.tanh(g[:, 2 * Hp:] + r * (gh[:, 2 * Hp:] + _bhn[...]))
                h_new = (1.0 - z) * n + z * h
                if not _is_last:
                    # Only intermediate layers need the full sequence (next layer input);
                    # the last layer keeps just the final hidden state.
                    seq_scr[pl.ds(off, Bp), :] = h_new
                return h_new

            h_last = jax.lax.fori_loop(0, T, step,
                                       jnp.zeros((Bp, Hp), jnp.float32),
                                       unroll=True)
            cur_in_ref = seq_scr

        # Head: fc1 -> ReLU -> fc_final on the final hidden state only.
        h1 = jnp.maximum(
            jnp.dot(h_last, fc1w_ref[...], preferred_element_type=jnp.float32)
            + fc1b_ref[...], 0.0)
        out = jnp.dot(h1, fc2w_ref[...], preferred_element_type=jnp.float32) + fc2b_ref[...]
        out_ref[...] = out.astype(out_ref.dtype)

    return kernel


# -----------------------------------------------------------------------------
# Wrapper: pad batch/feature dims, flatten to 2-D lane-dense slabs, one call.
# -----------------------------------------------------------------------------
@functools.partial(jax.jit, static_argnames=("layer_dim", "output_dim"))
def gru_model_forward(x_btd, packed, layer_dim, output_dim):
    """x_btd: (B, T, D) batch-first. packed: flat tuple from pack_params."""
    # TODO(synk): nn.GRU inter-layer dropout is training-mode only; this is the
    # deterministic inference forward pass (no dropout applied).
    B, T, D = x_btd.shape
    Bp = _round_up(B, SUBLANE)
    Dp = _round_up(D, SUBLANE)
    Hp = packed[3].shape[1]      # layer-0 b_hn: (1, H_pad)
    Op = packed[-1].shape[1]     # fc2 bias:    (1, O_pad)

    # (B, T, D) -> time-major, pad batch to sublane width, flatten to (T*Bp, Dp).
    x_tbd = jnp.transpose(x_btd, (1, 0, 2)).astype(jnp.float32)
    x_pad = jnp.zeros((T, Bp, Dp), jnp.float32).at[:, :B, :D].set(x_tbd)
    x_2d = x_pad.reshape(T * Bp, Dp)

    kernel = make_fused_gru_kernel(layer_dim, T, Bp, Hp)
    out_pad = pl.pallas_call(
        kernel,
        out_shape=jax.ShapeDtypeStruct((Bp, Op), jnp.float32),
        scratch_shapes=[
            pltpu.VMEM((T * Bp, 3 * Hp), jnp.float32),   # hoisted gate projections
            pltpu.VMEM((T * Bp, Hp), jnp.float32),       # inter-layer sequence
        ],
    )(x_2d, *packed)
    return out_pad[:B, :output_dim]


# -----------------------------------------------------------------------------
# Parameter init (PyTorch-style) and packing into the padded kernel layout.
# -----------------------------------------------------------------------------
def init_params(key, input_dim, hidden_dim, layer_dim, output_dim):
    """Deterministic init, PyTorch-style uniform(-1/sqrt(H), 1/sqrt(H)).
    Logical (unpadded) layout, weights pre-transposed to (in_features, out_features)."""
    bound = 1.0 / np.sqrt(hidden_dim)

    def u(key, shape):
        return jax.random.uniform(key, shape, jnp.float32, -bound, bound)

    params = {"gru": []}
    for l in range(layer_dim):
        d_in = input_dim if l == 0 else hidden_dim
        key, k1, k2, k3, k4 = jax.random.split(key, 5)
        params["gru"].append({
            "w_ih": u(k1, (d_in, 3 * hidden_dim)),
            "w_hh": u(k2, (hidden_dim, 3 * hidden_dim)),
            "b_ih": u(k3, (1, 3 * hidden_dim)),
            "b_hh": u(k4, (1, 3 * hidden_dim)),
        })
    key, k1, k2, k3, k4 = jax.random.split(key, 5)
    params["fc1_w"] = u(k1, (hidden_dim, hidden_dim))
    params["fc1_b"] = u(k2, (1, hidden_dim))
    params["fc2_w"] = u(k3, (hidden_dim, output_dim))
    params["fc2_b"] = u(k4, (1, output_dim))
    return params


def pack_params(params, hidden_dim, output_dim):
    """Pad/fold logical params into the lane-aligned kernel layout (flat tuple)."""
    H = hidden_dim
    Hp = _round_up(H, LANE)
    O = output_dim
    Op = _round_up(O, LANE)

    def pad_gru_w(w, in_pad):
        # (d_in, 3H) -> (in_pad, 3*Hp); each gate gets its own 128-lane block.
        d_in = w.shape[0]
        out = jnp.zeros((in_pad, 3 * Hp), jnp.float32)
        for g in range(3):
            out = out.at[:d_in, g * Hp:g * Hp + H].set(w[:, g * H:(g + 1) * H])
        return out

    flat = []
    for l, p in enumerate(params["gru"]):
        d_in = p["w_ih"].shape[0]
        in_pad = Hp if l > 0 else _round_up(d_in, SUBLANE)
        w_ih_p = pad_gru_w(p["w_ih"], in_pad)
        w_hh_p = pad_gru_w(p["w_hh"], Hp)
        b_ih, b_hh = p["b_ih"], p["b_hh"]
        b_fold = jnp.zeros((1, 3 * Hp), jnp.float32)
        b_fold = b_fold.at[:, 0:H].set(b_ih[:, 0:H] + b_hh[:, 0:H])                  # r
        b_fold = b_fold.at[:, Hp:Hp + H].set(b_ih[:, H:2 * H] + b_hh[:, H:2 * H])    # z
        b_fold = b_fold.at[:, 2 * Hp:2 * Hp + H].set(b_ih[:, 2 * H:3 * H])           # n (input side)
        b_hn = jnp.zeros((1, Hp), jnp.float32).at[:, :H].set(b_hh[:, 2 * H:3 * H])
        flat += [w_ih_p, w_hh_p, b_fold, b_hn]

    flat.append(jnp.zeros((Hp, Hp), jnp.float32).at[:H, :H].set(params["fc1_w"]))
    flat.append(jnp.zeros((1, Hp), jnp.float32).at[:, :H].set(params["fc1_b"]))
    flat.append(jnp.zeros((Hp, Op), jnp.float32).at[:H, :O].set(params["fc2_w"]))
    flat.append(jnp.zeros((1, Op), jnp.float32).at[:, :O].set(params["fc2_b"]))
    return tuple(flat)


# -----------------------------------------------------------------------------
# Pure-JAX reference (unpadded logical params) for correctness checking.
# -----------------------------------------------------------------------------
def gru_reference(x_btd, params, layer_dim, hidden_dim):
    B = x_btd.shape[0]
    h_seq = jnp.transpose(x_btd, (1, 0, 2))  # (T, B, D)
    for l in range(layer_dim):
        p = params["gru"][l]
        h0 = jnp.zeros((B, hidden_dim), jnp.float32)

        def step(h, x_t, p=p):
            gi = x_t @ p["w_ih"] + p["b_ih"]
            gh = h @ p["w_hh"] + p["b_hh"]
            H = hidden_dim
            r = jax.nn.sigmoid(gi[:, :H] + gh[:, :H])
            z = jax.nn.sigmoid(gi[:, H:2 * H] + gh[:, H:2 * H])
            n = jnp.tanh(gi[:, 2 * H:] + r * gh[:, 2 * H:])
            h_new = (1.0 - z) * n + z * h
            return h_new, h_new

        _, h_seq = jax.lax.scan(step, h0, h_seq)
    last = h_seq[-1]
    h = jnp.maximum(last @ params["fc1_w"] + params["fc1_b"], 0.0)
    return h @ params["fc2_w"] + params["fc2_b"]


if __name__ == "__main__":
    input_dim, hidden_dim, layer_dim, output_dim = 16, 32, 2, 8
    batch, seq = 2, 8

    key = jax.random.PRNGKey(0)
    key, kx = jax.random.split(key)
    x = jax.random.normal(kx, (batch, seq, input_dim), jnp.float32)
    params = init_params(key, input_dim, hidden_dim, layer_dim, output_dim)
    packed = pack_params(params, hidden_dim, output_dim)

    out = gru_model_forward(x, packed, layer_dim=layer_dim, output_dim=output_dim)
    out = jax.block_until_ready(out)

    ref = gru_reference(x, params, layer_dim, hidden_dim)
    assert out.shape == (batch, output_dim), out.shape
    np.testing.assert_allclose(np.asarray(out), np.asarray(ref), rtol=1e-4, atol=1e-4)

    print("KERNEL_OK")
</pallas_src>

<mosaic_0001>
module attributes {stable_mosaic.version = 11 : i64} {
  func.func @kernel(%arg0: memref<64x16xf32, #tpu.memory_space<vmem>>, %arg1: memref<16x384xf32, #tpu.memory_space<vmem>>, %arg2: memref<128x384xf32, #tpu.memory_space<vmem>>, %arg3: memref<1x384xf32, #tpu.memory_space<vmem>>, %arg4: memref<1x128xf32, #tpu.memory_space<vmem>>, %arg5: memref<128x384xf32, #tpu.memory_space<vmem>>, %arg6: memref<128x384xf32, #tpu.memory_space<vmem>>, %arg7: memref<1x384xf32, #tpu.memory_space<vmem>>, %arg8: memref<1x128xf32, #tpu.memory_space<vmem>>, %arg9: memref<128x128xf32, #tpu.memory_space<vmem>>, %arg10: memref<1x128xf32, #tpu.memory_space<vmem>>, %arg11: memref<128x128xf32, #tpu.memory_space<vmem>>, %arg12: memref<1x128xf32, #tpu.memory_space<vmem>>, %arg13: memref<8x128xf32, #tpu.memory_space<vmem>>, %arg14: memref<64x384xf32, #tpu.memory_space<vmem>>, %arg15: memref<64x128xf32, #tpu.memory_space<vmem>>) attributes {dimension_semantics = [], scalar_prefetch = 0 : i64, scratch_operands = 2 : i64, tpu.core_type = #tpu.core_type<tc>} {
    %c0 = arith.constant 0 : index
    %c0_0 = arith.constant 0 : index
    %0 = vector.load %arg0[%c0, %c0_0] : memref<64x16xf32, #tpu.memory_space<vmem>>, vector<64x16xf32>
    %c0_1 = arith.constant 0 : index
    %c0_2 = arith.constant 0 : index
    %1 = vector.load %arg1[%c0_1, %c0_2] : memref<16x384xf32, #tpu.memory_space<vmem>>, vector<16x384xf32>
    %cst = arith.constant dense<0.000000e+00> : vector<64x384xf32>
    %2 = tpu.matmul %0, %1, %cst {dimension_numbers = #tpu.dot_dimension_numbers<[1], [0], [0], [1], [0, 0, 1, 1], [], []>} : vector<64x16xf32>, vector<16x384xf32>, vector<64x384xf32> -> vector<64x384xf32>
    %c0_3 = arith.constant 0 : index
    %c0_4 = arith.constant 0 : index
    %3 = vector.load %arg3[%c0_3, %c0_4] : memref<1x384xf32, #tpu.memory_space<vmem>>, vector<1x384xf32>
    %4 = vector.broadcast %3 : vector<1x384xf32> to vector<64x384xf32>
    %5 = arith.addf %2, %4 : vector<64x384xf32>
    %c0_5 = arith.constant 0 : index
    %c0_6 = arith.constant 0 : index
    %6 = vector.load %arg14[%c0_5, %c0_6] : memref<64x384xf32, #tpu.memory_space<vmem>>, vector<64x384xf32>
    tpu.vector_store %arg14[%c0_5, %c0_6], %5 {strides = array<i32>} : memref<64x384xf32, #tpu.memory_space<vmem>>, vector<64x384xf32>,
    %cst_7 = arith.constant 0.000000e+00 : f32
    %7 = vector.broadcast %cst_7 : f32 to vector<8x128xf32>
    %c0_i32 = arith.constant 0 : i32
    %c8_i32 = arith.constant 8 : i32
    %8 = arith.muli %c0_i32, %c8_i32 : i32
    %9 = tpu.assume_multiple %8, 8 : i32
    %10 = arith.index_cast %9 : i32 to index
    %c0_8 = arith.constant 0 : index
    %11 = vector.load %arg14[%10, %c0_8] : memref<64x384xf32, #tpu.memory_space<vmem>>, vector<8x384xf32>
    %c0_9 = arith.constant 0 : index
    %c0_10 = arith.constant 0 : index
    %12 = vector.load %arg2[%c0_9, %c0_10] : memref<128x384xf32, #tpu.memory_space<vmem>>, vector<128x384xf32>
    %cst_11 = arith.constant dense<0.000000e+00> : vector<8x384xf32>
    %13 = tpu.matmul %7, %12, %cst_11 {dimension_numbers = #tpu.dot_dimension_numbers<[1], [0], [0], [1], [0, 0, 1, 1], [], []>} : vector<8x128xf32>, vector<128x384xf32>, vector<8x384xf32> -> vector<8x384xf32>
    %14 = vector.extract_strided_slice %11 {offsets = [0, 0], sizes = [8, 128], strides = [1, 1]} : vector<8x384xf32> to vector<8x128xf32>
    %15 = vector.extract_strided_slice %13 {offsets = [0, 0], sizes = [8, 128], strides = [1, 1]} : vector<8x384xf32> to vector<8x128xf32>
    %16 = arith.addf %14, %15 : vector<8x128xf32>
    %17 = arith.negf %16 : vector<8x128xf32>
    %18 = math.exp %17 : vector<8x128xf32>
    %cst_12 = arith.constant 1.000000e+00 : f32
    %19 = vector.broadcast %cst_12 : f32 to vector<8x128xf32>
    %20 = arith.addf %19, %18 : vector<8x128xf32>
    %21 = arith.divf %19, %20 : vector<8x128xf32>
    %22 = vector.extract_strided_slice %11 {offsets = [0, 128], sizes = [8, 128], strides = [1, 1]} : vector<8x384xf32> to vector<8x128xf32>
    %23 = vector.extract_strided_slice %13 {offsets = [0, 128], sizes = [8, 128], strides = [1, 1]} : vector<8x384xf32> to vector<8x128xf32>
    %24 = arith.addf %22, %23 : vector<8x128xf32>
    %25 = arith.negf %24 : vector<8x128xf32>
    %26 = math.exp %25 : vector<8x128xf32>
    %cst_13 = arith.constant 1.000000e+00 : f32
    %27 = vector.broadcast %cst_13 : f32 to vector<8x128xf32>
    %28 = arith.addf %27, %26 : vector<8x128xf32>
    %29 = arith.divf %27, %28 : vector<8x128xf32>
    %30 = vector.extract_strided_slice %11 {offsets = [0, 256], sizes = [8, 128], strides = [1, 1]} : vector<8x384xf32> to vector<8x128xf32>
    %31 = vector.extract_strided_slice %13 {offsets = [0, 256], sizes = [8, 128], strides = [1, 1]} : vector<8x384xf32> to vector<8x128xf32>
    %c0_14 = arith.constant 0 : index
    %c0_15 = arith.constant 0 : index
    %32 = vector.load %arg4[%c0_14, %c0_15] : memref<1x128xf32, #tpu.memory_space<vmem>>, vector<1x128xf32>
    %33 = vector.broadcast %32 : vector<1x128xf32> to vector<8x128xf32>
    %34 = arith.addf %31, %33 : vector<8x128xf32>
    %35 = arith.mulf %21, %34 : vector<8x128xf32>
    %36 = arith.addf %30, %35 : vector<8x128xf32>
    %37 = math.tanh %36 : vector<8x128xf32>
    %cst_16 = arith.constant 1.000000e+00 : f32
    %38 = vector.broadcast %cst_16 : f32 to vector<8x128xf32>
    %39 = arith.subf %38, %29 : vector<8x128xf32>
    %40 = arith.mulf %39, %37 : vector<8x128xf32>
    %41 = arith.mulf %29, %7 : vector<8x128xf32>
    %42 = arith.addf %40, %41 : vector<8x128xf32>
    %43 = arith.index_cast %9 : i32 to index
    %c0_17 = arith.constant 0 : index
    %44 = vector.load %arg15[%43, %c0_17] : memref<64x128xf32, #tpu.memory_space<vmem>>, vector<8x128xf32>
    tpu.vector_store %arg15[%43, %c0_17], %42 {strides = array<i32>} : memref<64x128xf32, #tpu.memory_space<vmem>>, vector<8x128xf32>,
    %c1_i32 = arith.constant 1 : i32
    %c8_i32_18 = arith.constant 8 : i32
    %45 = arith.muli %c1_i32, %c8_i32_18 : i32
    %46 = tpu.assume_multiple %45, 8 : i32
    %47 = arith.index_cast %46 : i32 to index
    %c0_19 = arith.constant 0 : index
    %48 = vector.load %arg14[%47, %c0_19] : memref<64x384xf32, #tpu.memory_space<vmem>>, vector<8x384xf32>
    %c0_20 = arith.constant 0 : index
    %c0_21 = arith.constant 0 : index
    %49 = vector.load %arg2[%c0_20, %c0_21] : memref<128x384xf32, #tpu.memory_space<vmem>>, vector<128x384xf32>
    %cst_22 = arith.constant dense<0.000000e+00> : vector<8x384xf32>
    %50 = tpu.matmul %42, %49, %cst_22 {dimension_numbers = #tpu.dot_dimension_numbers<[1], [0], [0], [1], [0, 0, 1, 1], [], []>} : vector<8x128xf32>, vector<128x384xf32>, vector<8x384xf32> -> vector<8x384xf32>
    %51 = vector.extract_strided_slice %48 {offsets = [0, 0], sizes = [8, 128], strides = [1, 1]} : vector<8x384xf32> to vector<8x128xf32>
    %52 = vector.extract_strided_slice %50 {offsets = [0, 0], sizes = [8, 128], strides = [1, 1]} : vector<8x384xf32> to vector<8x128xf32>
    %53 = arith.addf %51, %52 : vector<8x128xf32>
    %54 = arith.negf %53 : vector<8x128xf32>
    %55 = math.exp %54 : vector<8x128xf32>
    %cst_23 = arith.constant 1.000000e+00 : f32
    %56 = vector.broadcast %cst_23 : f32 to vector<8x128xf32>
    %57 = arith.addf %56, %55 : vector<8x128xf32>
    %58 = arith.divf %56, %57 : vector<8x128xf32>
    %59 = vector.extract_strided_slice %48 {offsets = [0, 128], sizes = [8, 128], strides = [1, 1]} : vector<8x384xf32> to vector<8x128xf32>
    %60 = vector.extract_strided_slice %50 {offsets = [0, 128], sizes = [8, 128], strides = [1, 1]} : vector<8x384xf32> to vector<8x128xf32>
    %61 = arith.addf %59, %60 : vector<8x128xf32>
    %62 = arith.negf %61 : vector<8x128xf32>
    %63 = math.exp %62 : vector<8x128xf32>
    %cst_24 = arith.constant 1.000000e+00 : f32
    %64 = vector.broadcast %cst_24 : f32 to vector<8x128xf32>
    %65 = arith.addf %64, %63 : vector<8x128xf32>
    %66 = arith.divf %64, %65 : vector<8x128xf32>
    %67 = vector.extract_strided_slice %48 {offsets = [0, 256], sizes = [8, 128], strides = [1, 1]} : vector<8x384xf32> to vector<8x128xf32>
    %68 = vector.extract_strided_slice %50 {offsets = [0, 256], sizes = [8, 128], strides = [1, 1]} : vector<8x384xf32> to vector<8x128xf32>
    %c0_25 = arith.constant 0 : index
    %c0_26 = arith.constant 0 : index
    %69 = vector.load %arg4[%c0_25, %c0_26] : memref<1x128xf32, #tpu.memory_space<vmem>>, vector<1x128xf32>
    %70 = vector.broadcast %69 : vector<1x128xf32> to vector<8x128xf32>
    %71 = arith.addf %68, %70 : vector<8x128xf32>
    %72 = arith.mulf %58, %71 : vector<8x128xf32>
    %73 = arith.addf %67, %72 : vector<8x128xf32>
    %74 = math.tanh %73 : vector<8x128xf32>
    %cst_27 = arith.constant 1.000000e+00 : f32
    %75 = vector.broadcast %cst_27 : f32 to vector<8x128xf32>
    %76 = arith.subf %75, %66 : vector<8x128xf32>
    %77 = arith.mulf %76, %74 : vector<8x128xf32>
    %78 = arith.mulf %66, %42 : vector<8x128xf32>
    %79 = arith.addf %77, %78 : vector<8x128xf32>
    %80 = arith.index_cast %46 : i32 to index
    %c0_28 = arith.constant 0 : index
    %81 = vector.load %arg15[%80, %c0_28] : memref<64x128xf32, #tpu.memory_space<vmem>>, vector<8x128xf32>
    tpu.vector_store %arg15[%80, %c0_28], %79 {strides = array<i32>} : memref<64x128xf32, #tpu.memory_space<vmem>>, vector<8x128xf32>,
    %c2_i32 = arith.constant 2 : i32
    %c8_i32_29 = arith.constant 8 : i32
    %82 = arith.muli %c2_i32, %c8_i32_29 : i32
    %83 = tpu.assume_multiple %82, 8 : i32
    %84 = arith.index_cast %83 : i32 to index
    %c0_30 = arith.constant 0 : index
    %85 = vector.load %arg14[%84, %c0_30] : memref<64x384xf32, #tpu.memory_space<vmem>>, vector<8x384xf32>
    %c0_31 = arith.constant 0 : index
    %c0_32 = arith.constant 0 : index
    %86 = vector.load %arg2[%c0_31, %c0_32] : memref<128x384xf32, #tpu.memory_space<vmem>>, vector<128x384xf32>
    %cst_33 = arith.constant dense<0.000000e+00> : vector<8x384xf32>
    %87 = tpu.matmul %79, %86, %cst_33 {dimension_numbers = #tpu.dot_dimension_numbers<[1], [0], [0], [1], [0, 0, 1, 1], [], []>} : vector<8x128xf32>, vector<128x384xf32>, vector<8x384xf32> -> vector<8x384xf32>
    %88 = vector.extract_strided_slice %85 {offsets = [0, 0], sizes = [8, 128], strides = [1, 1]} : vector<8x384xf32> to vector<8x128xf32>
    %89 = vector.extract_strided_slice %87 {offsets = [0, 0], sizes = [8, 128], strides = [1, 1]} : vector<8x384xf32> to vector<8x128xf32>
    %90 = arith.addf %88, %89 : vector<8x128xf32>
    %91 = arith.negf %90 : vector<8x128xf32>
    %92 = math.exp %91 : vector<8x128xf32>
    %cst_34 = arith.constant 1.000000e+00 : f32
    %93 = vector.broadcast %cst_34 : f32 to vector<8x128xf32>
    %94 = arith.addf %93, %92 : vector<8x128xf32>
    %95 = arith.divf %93, %94 : vector<8x128xf32>
    %96 = vector.extract_strided_slice %85 {offsets = [0, 128], sizes = [8, 128], strides = [1, 1]} : vector<8x384xf32> to vector<8x128xf32>
    %97 = vector.extract_strided_slice %87 {offsets = [0, 128], sizes = [8, 128], strides = [1, 1]} : vector<8x384xf32> to vector<8x128xf32>
    %98 = arith.addf %96, %97 : vector<8x128xf32>
    %99 = arith.negf %98 : vector<8x128xf32>
    %100 = math.exp %99 : vector<8x128xf32>
    %cst_35 = arith.constant 1.000000e+00 : f32
    %101 = vector.broadcast %cst_35 : f32 to vector<8x128xf32>
    %102 = arith.addf %101, %100 : vector<8x128xf32>
    %103 = arith.divf %101, %102 : vector<8x128xf32>
    %104 = vector.extract_strided_slice %85 {offsets = [0, 256], sizes = [8, 128], strides = [1, 1]} : vector<8x384xf32> to vector<8x128xf32>
    %105 = vector.extract_strided_slice %87 {offsets = [0, 256], sizes = [8, 128], strides = [1, 1]} : vector<8x384xf32> to vector<8x128xf32>
    %c0_36 = arith.constant 0 : index
    %c0_37 = arith.constant 0 : index
    %106 = vector.load %arg4[%c0_36, %c0_37] : memref<1x128xf32, #tpu.memory_space<vmem>>, vector<1x128xf32>
    %107 = vector.broadcast %106 : vector<1x128xf32> to vector<8x128xf32>
    %108 = arith.addf %105, %107 : vector<8x128xf32>
    %109 = arith.mulf %95, %108 : vector<8x128xf32>
    %110 = arith.addf %104, %109 : vector<8x128xf32>
    %111 = math.tanh %110 : vector<8x128xf32>
    %cst_38 = arith.constant 1.000000e+00 : f32
    %112 = vector.broadcast %cst_38 : f32 to vector<8x128xf32>
    %113 = arith.subf %112, %103 : vector<8x128xf32>
    %114 = arith.mulf %113, %111 : vector<8x128xf32>
    %115 = arith.mulf %103, %79 : vector<8x128xf32>
    %116 = arith.addf %114, %115 : vector<8x128xf32>
    %117 = arith.index_cast %83 : i32 to index
    %c0_39 = arith.constant 0 : index
    %118 = vector.load %arg15[%117, %c0_39] : memref<64x128xf32, #tpu.memory_space<vmem>>, vector<8x128xf32>
    tpu.vector_store %arg15[%117, %c0_39], %116 {strides = array<i32>} : memref<64x128xf32, #tpu.memory_space<vmem>>, vector<8x128xf32>,
    %c3_i32 = arith.constant 3 : i32
    %c8_i32_40 = arith.constant 8 : i32
    %119 = arith.muli %c3_i32, %c8_i32_40 : i32
    %120 = tpu.assume_multiple %119, 8 : i32
    %121 = arith.index_cast %120 : i32 to index
    %c0_41 = arith.constant 0 : index
    %122 = vector.load %arg14[%121, %c0_41] : memref<64x384xf32, #tpu.memory_space<vmem>>, vector<8x384xf32>
    %c0_42 = arith.constant 0 : index
    %c0_43 = arith.constant 0 : index
    %123 = vector.load %arg2[%c0_42, %c0_43] : memref<128x384xf32, #tpu.memory_space<vmem>>, vector<128x384xf32>
    %cst_44 = arith.constant dense<0.000000e+00> : vector<8x384xf32>
    %124 = tpu.matmul %116, %123, %cst_44 {dimension_numbers = #tpu.dot_dimension_numbers<[1], [0], [0], [1], [0, 0, 1, 1], [], []>} : vector<8x128xf32>, vector<128x384xf32>, vector<8x384xf32> -> vector<8x384xf32>
    %125 = vector.extract_strided_slice %122 {offsets = [0, 0], sizes = [8, 128], strides = [1, 1]} : vector<8x384xf32> to vector<8x128xf32>
    %126 = vector.extract_strided_slice %124 {offsets = [0, 0], sizes = [8, 128], strides = [1, 1]} : vector<8x384xf32> to vector<8x128xf32>
    %127 = arith.addf %125, %126 : vector<8x128xf32>
    %128 = arith.negf %127 : vector<8x128xf32>
    %129 = math.exp %128 : vector<8x128xf32>
    %cst_45 = arith.constant 1.000000e+00 : f32
    %130 = vector.broadcast %cst_45 : f32 to vector<8x128xf32>
    %131 = arith.addf %130, %129 : vector<8x128xf32>
    %132 = arith.divf %130, %131 : vector<8x128xf32>
    %133 = vector.extract_strided_slice %122 {offsets = [0, 128], sizes = [8, 128], strides = [1, 1]} : vector<8x384xf32> to vector<8x128xf32>
    %134 = vector.extract_strided_slice %124 {offsets = [0, 128], sizes = [8, 128], strides = [1, 1]} : vector<8x384xf32> to vector<8x128xf32>
    %135 = arith.addf %133, %134 : vector<8x128xf32>
    %136 = arith.negf %135 : vector<8x128xf32>
    %137 = math.exp %136 : vector<8x128xf32>
    %cst_46 = arith.constant 1.000000e+00 : f32
    %138 = vector.broadcast %cst_46 : f32 to vector<8x128xf32>
    %139 = arith.addf %138, %137 : vector<8x128xf32>
    %140 = arith.divf %138, %139 : vector<8x128xf32>
    %141 = vector.extract_strided_slice %122 {offsets = [0, 256], sizes = [8, 128], strides = [1, 1]} : vector<8x384xf32> to vector<8x128xf32>
    %142 = vector.extract_strided_slice %124 {offsets = [0, 256], sizes = [8, 128], strides = [1, 1]} : vector<8x384xf32> to vector<8x128xf32>
    %c0_47 = arith.constant 0 : index
    %c0_48 = arith.constant 0 : index
    %143 = vector.load %arg4[%c0_47, %c0_48] : memref<1x128xf32, #tpu.memory_space<vmem>>, vector<1x128xf32>
    %144 = vector.broadcast %143 : vector<1x128xf32> to vector<8x128xf32>
    %145 = arith.addf %142, %144 : vector<8x128xf32>
    %146 = arith.mulf %132, %145 : vector<8x128xf32>
    %147 = arith.addf %141, %146 : vector<8x128xf32>
    %148 = math.tanh %147 : vector<8x128xf32>
    %cst_49 = arith.constant 1.000000e+00 : f32
    %149 = vector.broadcast %cst_49 : f32 to vector<8x128xf32>
    %150 = arith.subf %149, %140 : vector<8x128xf32>
    %151 = arith.mulf %150, %148 : vector<8x128xf32>
    %152 = arith.mulf %140, %116 : vector<8x128xf32>
    %153 = arith.addf %151, %152 : vector<8x128xf32>
    %154 = arith.index_cast %120 : i32 to index
    %c0_50 = arith.constant 0 : index
    %155 = vector.load %arg15[%154, %c0_50] : memref<64x128xf32, #tpu.memory_space<vmem>>, vector<8x128xf32>
    tpu.vector_store %arg15[%154, %c0_50], %153 {strides = array<i32>} : memref<64x128xf32, #tpu.memory_space<vmem>>, vector<8x128xf32>,
    %c4_i32 = arith.constant 4 : i32
    %c8_i32_51 = arith.constant 8 : i32
    %156 = arith.muli %c4_i32, %c8_i32_51 : i32
    %157 = tpu.assume_multiple %156, 8 : i32
    %158 = arith.index_cast %157 : i32 to index
    %c0_52 = arith.constant 0 : index
    %159 = vector.load %arg14[%158, %c0_52] : memref<64x384xf32, #tpu.memory_space<vmem>>, vector<8x384xf32>
    %c0_53 = arith.constant 0 : index
    %c0_54 = arith.constant 0 : index
    %160 = vector.load %arg2[%c0_53, %c0_54] : memref<128x384xf32, #tpu.memory_space<vmem>>, vector<128x384xf32>
    %cst_55 = arith.constant dense<0.000000e+00> : vector<8x384xf32>
    %161 = tpu.matmul %153, %160, %cst_55 {dimension_numbers = #tpu.dot_dimension_numbers<[1], [0], [0], [1], [0, 0, 1, 1], [], []>} : vector<8x128xf32>, vector<128x384xf32>, vector<8x384xf32> -> vector<8x384xf32>
    %162 = vector.extract_strided_slice %159 {offsets = [0, 0], sizes = [8, 128], strides = [1, 1]} : vector<8x384xf32> to vector<8x128xf32>
    %163 = vector.extract_strided_slice %161 {offsets = [0, 0], sizes = [8, 128], strides = [1, 1]} : vector<8x384xf32> to vector<8x128xf32>
    %164 = arith.addf %162, %163 : vector<8x128xf32>
    %165 = arith.negf %164 : vector<8x128xf32>
    %166 = math.exp %165 : vector<8x128xf32>
    %cst_56 = arith.constant 1.000000e+00 : f32
    %167 = vector.broadcast %cst_56 : f32 to vector<8x128xf32>
    %168 = arith.addf %167, %166 : vector<8x128xf32>
    %169 = arith.divf %167, %168 : vector<8x128xf32>
    %170 = vector.extract_strided_slice %159 {offsets = [0, 128], sizes = [8, 128], strides = [1, 1]} : vector<8x384xf32> to vector<8x128xf32>
    %171 = vector.extract_strided_slice %161 {offsets = [0, 128], sizes = [8, 128], strides = [1, 1]} : vector<8x384xf32> to vector<8x128xf32>
    %172 = arith.addf %170, %171 : vector<8x128xf32>
    %173 = arith.negf %172 : vector<8x128xf32>
    %174 = math.exp %173 : vector<8x128xf32>
    %cst_57 = arith.constant 1.000000e+00 : f32
    %175 = vector.broadcast %cst_57 : f32 to vector<8x128xf32>
    %176 = arith.addf %175, %174 : vector<8x128xf32>
    %177 = arith.divf %175, %176 : vector<8x128xf32>
    %178 = vector.extract_strided_slice %159 {offsets = [0, 256], sizes = [8, 128], strides = [1, 1]} : vector<8x384xf32> to vector<8x128xf32>
    %179 = vector.extract_strided_slice %161 {offsets = [0, 256], sizes = [8, 128], strides = [1, 1]} : vector<8x384xf32> to vector<8x128xf32>
    %c0_58 = arith.constant 0 : index
    %c0_59 = arith.constant 0 : index
    %180 = vector.load %arg4[%c0_58, %c0_59] : memref<1x128xf32, #tpu.memory_space<vmem>>, vector<1x128xf32>
    %181 = vector.broadcast %180 : vector<1x128xf32> to vector<8x128xf32>
    %182 = arith.addf %179, %181 : vector<8x128xf32>
    %183 = arith.mulf %169, %182 : vector<8x128xf32>
    %184 = arith.addf %178, %183 : vector<8x128xf32>
    %185 = math.tanh %184 : vector<8x128xf32>
    %cst_60 = arith.constant 1.000000e+00 : f32
    %186 = vector.broadcast %cst_60 : f32 to vector<8x128xf32>
    %187 = arith.subf %186, %177 : vector<8x128xf32>
    %188 = arith.mulf %187, %185 : vector<8x128xf32>
    %189 = arith.mulf %177, %153 : vector<8x128xf32>
    %190 = arith.addf %188, %189 : vector<8x128xf32>
    %191 = arith.index_cast %157 : i32 to index
    %c0_61 = arith.constant 0 : index
    %192 = vector.load %arg15[%191, %c0_61] : memref<64x128xf32, #tpu.memory_space<vmem>>, vector<8x128xf32>
    tpu.vector_store %arg15[%191, %c0_61], %190 {strides = array<i32>} : memref<64x128xf32, #tpu.memory_space<vmem>>, vector<8x128xf32>,
    %c5_i32 = arith.constant 5 : i32
    %c8_i32_62 = arith.constant 8 : i32
    %193 = arith.muli %c5_i32, %c8_i32_62 : i32
    %194 = tpu.assume_multiple %193, 8 : i32
    %195 = arith.index_cast %194 : i32 to index
    %c0_63 = arith.constant 0 : index
    %196 = vector.load %arg14[%195, %c0_63] : memref<64x384xf32, #tpu.memory_space<vmem>>, vector<8x384xf32>
    %c0_64 = arith.constant 0 : index
    %c0_65 = arith.constant 0 : index
    %197 = vector.load %arg2[%c0_64, %c0_65] : memref<128x384xf32, #tpu.memory_space<vmem>>, vector<128x384xf32>
    %cst_66 = arith.constant dense<0.000000e+00> : vector<8x384xf32>
    %198 = tpu.matmul %190, %197, %cst_66 {dimension_numbers = #tpu.dot_dimension_numbers<[1], [0], [0], [1], [0, 0, 1, 1], [], []>} : vector<8x128xf32>, vector<128x384xf32>, vector<8x384xf32> -> vector<8x384xf32>
    %199 = vector.extract_strided_slice %196 {offsets = [0, 0], sizes = [8, 128], strides = [1, 1]} : vector<8x384xf32> to vector<8x128xf32>
    %200 = vector.extract_strided_slice %198 {offsets = [0, 0], sizes = [8, 128], strides = [1, 1]} : vector<8x384xf32> to vector<8x128xf32>
    %201 = arith.addf %199, %200 : vector<8x128xf32>
    %202 = arith.negf %201 : vector<8x128xf32>
    %203 = math.exp %202 : vector<8x128xf32>
    %cst_67 = arith.constant 1.000000e+00 : f32
    %204 = vector.broadcast %cst_67 : f32 to vector<8x128xf32>
    %205 = arith.addf %204, %203 : vector<8x128xf32>
    %206 = arith.divf %204, %205 : vector<8x128xf32>
    %207 = vector.extract_strided_slice %196 {offsets = [0, 128], sizes = [8, 128], strides = [1, 1]} : vector<8x384xf32> to vector<8x128xf32>
    %208 = vector.extract_strided_slice %198 {offsets = [0, 128], sizes = [8, 128], strides = [1, 1]} : vector<8x384xf32> to vector<8x128xf32>
    %209 = arith.addf %207, %208 : vector<8x128xf32>
    %210 = arith.negf %209 : vector<8x128xf32>
    %211 = math.exp %210 : vector<8x128xf32>
    %cst_68 = arith.constant 1.000000e+00 : f32
    %212 = vector.broadcast %cst_68 : f32 to vector<8x128xf32>
    %213 = arith.addf %212, %211 : vector<8x128xf32>
    %214 = arith.divf %212, %213 : vector<8x128xf32>
    %215 = vector.extract_strided_slice %196 {offsets = [0, 256], sizes = [8, 128], strides = [1, 1]} : vector<8x384xf32> to vector<8x128xf32>
    %216 = vector.extract_strided_slice %198 {offsets = [0, 256], sizes = [8, 128], strides = [1, 1]} : vector<8x384xf32> to vector<8x128xf32>
    %c0_69 = arith.constant 0 : index
    %c0_70 = arith.constant 0 : index
    %217 = vector.load %arg4[%c0_69, %c0_70] : memref<1x128xf32, #tpu.memory_space<vmem>>, vector<1x128xf32>
    %218 = vector.broadcast %217 : vector<1x128xf32> to vector<8x128xf32>
    %219 = arith.addf %216, %218 : vector<8x128xf32>
    %220 = arith.mulf %206, %219 : vector<8x128xf32>
    %221 = arith.addf %215, %220 : vector<8x128xf32>
    %222 = math.tanh %221 : vector<8x128xf32>
    %cst_71 = arith.constant 1.000000e+00 : f32
    %223 = vector.broadcast %cst_71 : f32 to vector<8x128xf32>
    %224 = arith.subf %223, %214 : vector<8x128xf32>
    %225 = arith.mulf %224, %222 : vector<8x128xf32>
    %226 = arith.mulf %214, %190 : vector<8x128xf32>
    %227 = arith.addf %225, %226 : vector<8x128xf32>
    %228 = arith.index_cast %194 : i32 to index
    %c0_72 = arith.constant 0 : index
    %229 = vector.load %arg15[%228, %c0_72] : memref<64x128xf32, #tpu.memory_space<vmem>>, vector<8x128xf32>
    tpu.vector_store %arg15[%228, %c0_72], %227 {strides = array<i32>} : memref<64x128xf32, #tpu.memory_space<vmem>>, vector<8x128xf32>,
    %c6_i32 = arith.constant 6 : i32
    %c8_i32_73 = arith.constant 8 : i32
    %230 = arith.muli %c6_i32, %c8_i32_73 : i32
    %231 = tpu.assume_multiple %230, 8 : i32
    %232 = arith.index_cast %231 : i32 to index
    %c0_74 = arith.constant 0 : index
    %233 = vector.load %arg14[%232, %c0_74] : memref<64x384xf32, #tpu.memory_space<vmem>>, vector<8x384xf32>
    %c0_75 = arith.constant 0 : index
    %c0_76 = arith.constant 0 : index
    %234 = vector.load %arg2[%c0_75, %c0_76] : memref<128x384xf32, #tpu.memory_space<vmem>>, vector<128x384xf32>
    %cst_77 = arith.constant dense<0.000000e+00> : vector<8x384xf32>
    %235 = tpu.matmul %227, %234, %cst_77 {dimension_numbers = #tpu.dot_dimension_numbers<[1], [0], [0], [1], [0, 0, 1, 1], [], []>} : vector<8x128xf32>, vector<128x384xf32>, vector<8x384xf32> -> vector<8x384xf32>
    %236 = vector.extract_strided_slice %233 {offsets = [0, 0], sizes = [8, 128], strides = [1, 1]} : vector<8x384xf32> to vector<8x128xf32>
    %237 = vector.extract_strided_slice %235 {offsets = [0, 0], sizes = [8, 128], strides = [1, 1]} : vector<8x384xf32> to vector<8x128xf32>
    %238 = arith.addf %236, %237 : vector<8x128xf32>
    %239 = arith.negf %238 : vector<8x128xf32>
    %240 = math.exp %239 : vector<8x128xf32>
    %cst_78 = arith.constant 1.000000e+00 : f32
    %241 = vector.broadcast %cst_78 : f32 to vector<8x128xf32>
    %242 = arith.addf %241, %240 : vector<8x128xf32>
    %243 = arith.divf %241, %242 : vector<8x128xf32>
    %244 = vector.extract_strided_slice %233 {offsets = [0, 128], sizes = [8, 128], strides = [1, 1]} : vector<8x384xf32> to vector<8x128xf32>
    %245 = vector.extract_strided_slice %235 {offsets = [0, 128], sizes = [8, 128], strides = [1, 1]} : vector<8x384xf32> to vector<8x128xf32>
    %246 = arith.addf %244, %245 : vector<8x128xf32>
    %247 = arith.negf %246 : vector<8x128xf32>
    %248 = math.exp %247 : vector<8x128xf32>
    %cst_79 = arith.constant 1.000000e+00 : f32
    %249 = vector.broadcast %cst_79 : f32 to vector<8x128xf32>
    %250 = arith.addf %249, %248 : vector<8x128xf32>
    %251 = arith.divf %249, %250 : vector<8x128xf32>
    %252 = vector.extract_strided_slice %233 {offsets = [0, 256], sizes = [8, 128], strides = [1, 1]} : vector<8x384xf32> to vector<8x128xf32>
    %253 = vector.extract_strided_slice %235 {offsets = [0, 256], sizes = [8, 128], strides = [1, 1]} : vector<8x384xf32> to vector<8x128xf32>
    %c0_80 = arith.constant 0 : index
    %c0_81 = arith.constant 0 : index
    %254 = vector.load %arg4[%c0_80, %c0_81] : memref<1x128xf32, #tpu.memory_space<vmem>>, vector<1x128xf32>
    %255 = vector.broadcast %254 : vector<1x128xf32> to vector<8x128xf32>
    %256 = arith.addf %253, %255 : vector<8x128xf32>
    %257 = arith.mulf %243, %256 : vector<8x128xf32>
    %258 = arith.addf %252, %257 : vector<8x128xf32>
    %259 = math.tanh %258 : vector<8x128xf32>
    %cst_82 = arith.constant 1.000000e+00 : f32
    %260 = vector.broadcast %cst_82 : f32 to vector<8x128xf32>
    %261 = arith.subf %260, %251 : vector<8x128xf32>
    %262 = arith.mulf %261, %259 : vector<8x128xf32>
    %263 = arith.mulf %251, %227 : vector<8x128xf32>
    %264 = arith.addf %262, %263 : vector<8x128xf32>
    %265 = arith.index_cast %231 : i32 to index
    %c0_83 = arith.constant 0 : index
    %266 = vector.load %arg15[%265, %c0_83] : memref<64x128xf32, #tpu.memory_space<vmem>>, vector<8x128xf32>
    tpu.vector_store %arg15[%265, %c0_83], %264 {strides = array<i32>} : memref<64x128xf32, #tpu.memory_space<vmem>>, vector<8x128xf32>,
    %c7_i32 = arith.constant 7 : i32
    %c8_i32_84 = arith.constant 8 : i32
    %267 = arith.muli %c7_i32, %c8_i32_84 : i32
    %268 = tpu.assume_multiple %267, 8 : i32
    %269 = arith.index_cast %268 : i32 to index
    %c0_85 = arith.constant 0 : index
    %270 = vector.load %arg14[%269, %c0_85] : memref<64x384xf32, #tpu.memory_space<vmem>>, vector<8x384xf32>
    %c0_86 = arith.constant 0 : index
    %c0_87 = arith.constant 0 : index
    %271 = vector.load %arg2[%c0_86, %c0_87] : memref<128x384xf32, #tpu.memory_space<vmem>>, vector<128x384xf32>
    %cst_88 = arith.constant dense<0.000000e+00> : vector<8x384xf32>
    %272 = tpu.matmul %264, %271, %cst_88 {dimension_numbers = #tpu.dot_dimension_numbers<[1], [0], [0], [1], [0, 0, 1, 1], [], []>} : vector<8x128xf32>, vector<128x384xf32>, vector<8x384xf32> -> vector<8x384xf32>
    %273 = vector.extract_strided_slice %270 {offsets = [0, 0], sizes = [8, 128], strides = [1, 1]} : vector<8x384xf32> to vector<8x128xf32>
    %274 = vector.extract_strided_slice %272 {offsets = [0, 0], sizes = [8, 128], strides = [1, 1]} : vector<8x384xf32> to vector<8x128xf32>
    %275 = arith.addf %273, %274 : vector<8x128xf32>
    %276 = arith.negf %275 : vector<8x128xf32>
    %277 = math.exp %276 : vector<8x128xf32>
    %cst_89 = arith.constant 1.000000e+00 : f32
    %278 = vector.broadcast %cst_89 : f32 to vector<8x128xf32>
    %279 = arith.addf %278, %277 : vector<8x128xf32>
    %280 = arith.divf %278, %279 : vector<8x128xf32>
    %281 = vector.extract_strided_slice %270 {offsets = [0, 128], sizes = [8, 128], strides = [1, 1]} : vector<8x384xf32> to vector<8x128xf32>
    %282 = vector.extract_strided_slice %272 {offsets = [0, 128], sizes = [8, 128], strides = [1, 1]} : vector<8x384xf32> to vector<8x128xf32>
    %283 = arith.addf %281, %282 : vector<8x128xf32>
    %284 = arith.negf %283 : vector<8x128xf32>
    %285 = math.exp %284 : vector<8x128xf32>
    %cst_90 = arith.constant 1.000000e+00 : f32
    %286 = vector.broadcast %cst_90 : f32 to vector<8x128xf32>
    %287 = arith.addf %286, %285 : vector<8x128xf32>
    %288 = arith.divf %286, %287 : vector<8x128xf32>
    %289 = vector.extract_strided_slice %270 {offsets = [0, 256], sizes = [8, 128], strides = [1, 1]} : vector<8x384xf32> to vector<8x128xf32>
    %290 = vector.extract_strided_slice %272 {offsets = [0, 256], sizes = [8, 128], strides = [1, 1]} : vector<8x384xf32> to vector<8x128xf32>
    %c0_91 = arith.constant 0 : index
    %c0_92 = arith.constant 0 : index
    %291 = vector.load %arg4[%c0_91, %c0_92] : memref<1x128xf32, #tpu.memory_space<vmem>>, vector<1x128xf32>
    %292 = vector.broadcast %291 : vector<1x128xf32> to vector<8x128xf32>
    %293 = arith.addf %290, %292 : vector<8x128xf32>
    %294 = arith.mulf %280, %293 : vector<8x128xf32>
    %295 = arith.addf %289, %294 : vector<8x128xf32>
    %296 = math.tanh %295 : vector<8x128xf32>
    %cst_93 = arith.constant 1.000000e+00 : f32
    %297 = vector.broadcast %cst_93 : f32 to vector<8x128xf32>
    %298 = arith.subf %297, %288 : vector<8x128xf32>
    %299 = arith.mulf %298, %296 : vector<8x128xf32>
    %300 = arith.mulf %288, %264 : vector<8x128xf32>
    %301 = arith.addf %299, %300 : vector<8x128xf32>
    %302 = arith.index_cast %268 : i32 to index
    %c0_94 = arith.constant 0 : index
    %303 = vector.load %arg15[%302, %c0_94] : memref<64x128xf32, #tpu.memory_space<vmem>>, vector<8x128xf32>
    tpu.vector_store %arg15[%302, %c0_94], %301 {strides = array<i32>} : memref<64x128xf32, #tpu.memory_space<vmem>>, vector<8x128xf32>,
    %c8_i32_95 = arith.constant 8 : i32
    %c0_96 = arith.constant 0 : index
    %c0_97 = arith.constant 0 : index
    %304 = vector.load %arg15[%c0_96, %c0_97] : memref<64x128xf32, #tpu.memory_space<vmem>>, vector<64x128xf32>
    %c0_98 = arith.constant 0 : index
    %c0_99 = arith.constant 0 : index
    %305 = vector.load %arg5[%c0_98, %c0_99] : memref<128x384xf32, #tpu.memory_space<vmem>>, vector<128x384xf32>
    %cst_100 = arith.constant dense<0.000000e+00> : vector<64x384xf32>
    %306 = tpu.matmul %304, %305, %cst_100 {dimension_numbers = #tpu.dot_dimension_numbers<[1], [0], [0], [1], [0, 0, 1, 1], [], []>} : vector<64x128xf32>, vector<128x384xf32>, vector<64x384xf32> -> vector<64x384xf32>
    %c0_101 = arith.constant 0 : index
    %c0_102 = arith.constant 0 : index
    %307 = vector.load %arg7[%c0_101, %c0_102] : memref<1x384xf32, #tpu.memory_space<vmem>>, vector<1x384xf32>
    %308 = vector.broadcast %307 : vector<1x384xf32> to vector<64x384xf32>
    %309 = arith.addf %306, %308 : vector<64x384xf32>
    %c0_103 = arith.constant 0 : index
    %c0_104 = arith.constant 0 : index
    %310 = vector.load %arg14[%c0_103, %c0_104] : memref<64x384xf32, #tpu.memory_space<vmem>>, vector<64x384xf32>
    tpu.vector_store %arg14[%c0_103, %c0_104], %309 {strides = array<i32>} : memref<64x384xf32, #tpu.memory_space<vmem>>, vector<64x384xf32>,
    %cst_105 = arith.constant 0.000000e+00 : f32
    %311 = vector.broadcast %cst_105 : f32 to vector<8x128xf32>
    %c0_i32_106 = arith.constant 0 : i32
    %c8_i32_107 = arith.constant 8 : i32
    %312 = arith.muli %c0_i32_106, %c8_i32_107 : i32
    %313 = tpu.assume_multiple %312, 8 : i32
    %314 = arith.index_cast %313 : i32 to index
    %c0_108 = arith.constant 0 : index
    %315 = vector.load %arg14[%314, %c0_108] : memref<64x384xf32, #tpu.memory_space<vmem>>, vector<8x384xf32>
    %c0_109 = arith.constant 0 : index
    %c0_110 = arith.constant 0 : index
    %316 = vector.load %arg6[%c0_109, %c0_110] : memref<128x384xf32, #tpu.memory_space<vmem>>, vector<128x384xf32>
    %cst_111 = arith.constant dense<0.000000e+00> : vector<8x384xf32>
    %317 = tpu.matmul %311, %316, %cst_111 {dimension_numbers = #tpu.dot_dimension_numbers<[1], [0], [0], [1], [0, 0, 1, 1], [], []>} : vector<8x128xf32>, vector<128x384xf32>, vector<8x384xf32> -> vector<8x384xf32>
    %318 = vector.extract_strided_slice %315 {offsets = [0, 0], sizes = [8, 128], strides = [1, 1]} : vector<8x384xf32> to vector<8x128xf32>
    %319 = vector.extract_strided_slice %317 {offsets = [0, 0], sizes = [8, 128], strides = [1, 1]} : vector<8x384xf32> to vector<8x128xf32>
    %320 = arith.addf %318, %319 : vector<8x128xf32>
    %321 = arith.negf %320 : vector<8x128xf32>
    %322 = math.exp %321 : vector<8x128xf32>
    %cst_112 = arith.constant 1.000000e+00 : f32
    %323 = vector.broadcast %cst_112 : f32 to vector<8x128xf32>
    %324 = arith.addf %323, %322 : vector<8x128xf32>
    %325 = arith.divf %323, %324 : vector<8x128xf32>
    %326 = vector.extract_strided_slice %315 {offsets = [0, 128], sizes = [8, 128], strides = [1, 1]} : vector<8x384xf32> to vector<8x128xf32>
    %327 = vector.extract_strided_slice %317 {offsets = [0, 128], sizes = [8, 128], strides = [1, 1]} : vector<8x384xf32> to vector<8x128xf32>
    %328 = arith.addf %326, %327 : vector<8x128xf32>
    %329 = arith.negf %328 : vector<8x128xf32>
    %330 = math.exp %329 : vector<8x128xf32>
    %cst_113 = arith.constant 1.000000e+00 : f32
    %331 = vector.broadcast %cst_113 : f32 to vector<8x128xf32>
    %332 = arith.addf %331, %330 : vector<8x128xf32>
    %333 = arith.divf %331, %332 : vector<8x128xf32>
    %334 = vector.extract_strided_slice %315 {offsets = [0, 256], sizes = [8, 128], strides = [1, 1]} : vector<8x384xf32> to vector<8x128xf32>
    %335 = vector.extract_strided_slice %317 {offsets = [0, 256], sizes = [8, 128], strides = [1, 1]} : vector<8x384xf32> to vector<8x128xf32>
    %c0_114 = arith.constant 0 : index
    %c0_115 = arith.constant 0 : index
    %336 = vector.load %arg8[%c0_114, %c0_115] : memref<1x128xf32, #tpu.memory_space<vmem>>, vector<1x128xf32>
    %337 = vector.broadcast %336 : vector<1x128xf32> to vector<8x128xf32>
    %338 = arith.addf %335, %337 : vector<8x128xf32>
    %339 = arith.mulf %325, %338 : vector<8x128xf32>
    %340 = arith.addf %334, %339 : vector<8x128xf32>
    %341 = math.tanh %340 : vector<8x128xf32>
    %cst_116 = arith.constant 1.000000e+00 : f32
    %342 = vector.broadcast %cst_116 : f32 to vector<8x128xf32>
    %343 = arith.subf %342, %333 : vector<8x128xf32>
    %344 = arith.mulf %343, %341 : vector<8x128xf32>
    %345 = arith.mulf %333, %311 : vector<8x128xf32>
    %346 = arith.addf %344, %345 : vector<8x128xf32>
    %c1_i32_117 = arith.constant 1 : i32
    %c8_i32_118 = arith.constant 8 : i32
    %347 = arith.muli %c1_i32_117, %c8_i32_118 : i32
    %348 = tpu.assume_multiple %347, 8 : i32
    %349 = arith.index_cast %348 : i32 to index
    %c0_119 = arith.constant 0 : index
    %350 = vector.load %arg14[%349, %c0_119] : memref<64x384xf32, #tpu.memory_space<vmem>>, vector<8x384xf32>
    %c0_120 = arith.constant 0 : index
    %c0_121 = arith.constant 0 : index
    %351 = vector.load %arg6[%c0_120, %c0_121] : memref<128x384xf32, #tpu.memory_space<vmem>>, vector<128x384xf32>
    %cst_122 = arith.constant dense<0.000000e+00> : vector<8x384xf32>
    %352 = tpu.matmul %346, %351, %cst_122 {dimension_numbers = #tpu.dot_dimension_numbers<[1], [0], [0], [1], [0, 0, 1, 1], [], []>} : vector<8x128xf32>, vector<128x384xf32>, vector<8x384xf32> -> vector<8x384xf32>
    %353 = vector.extract_strided_slice %350 {offsets = [0, 0], sizes = [8, 128], strides = [1, 1]} : vector<8x384xf32> to vector<8x128xf32>
    %354 = vector.extract_strided_slice %352 {offsets = [0, 0], sizes = [8, 128], strides = [1, 1]} : vector<8x384xf32> to vector<8x128xf32>
    %355 = arith.addf %353, %354 : vector<8x128xf32>
    %356 = arith.negf %355 : vector<8x128xf32>
    %357 = math.exp %356 : vector<8x128xf32>
    %cst_123 = arith.constant 1.000000e+00 : f32
    %358 = vector.broadcast %cst_123 : f32 to vector<8x128xf32>
    %359 = arith.addf %358, %357 : vector<8x128xf32>
    %360 = arith.divf %358, %359 : vector<8x128xf32>
    %361 = vector.extract_strided_slice %350 {offsets = [0, 128], sizes = [8, 128], strides = [1, 1]} : vector<8x384xf32> to vector<8x128xf32>
    %362 = vector.extract_strided_slice %352 {offsets = [0, 128], sizes = [8, 128], strides = [1, 1]} : vector<8x384xf32> to vector<8x128xf32>
    %363 = arith.addf %361, %362 : vector<8x128xf32>
    %364 = arith.negf %363 : vector<8x128xf32>
    %365 = math.exp %364 : vector<8x128xf32>
    %cst_124 = arith.constant 1.000000e+00 : f32
    %366 = vector.broadcast %cst_124 : f32 to vector<8x128xf32>
    %367 = arith.addf %366, %365 : vector<8x128xf32>
    %368 = arith.divf %366, %367 : vector<8x128xf32>
    %369 = vector.extract_strided_slice %350 {offsets = [0, 256], sizes = [8, 128], strides = [1, 1]} : vector<8x384xf32> to vector<8x128xf32>
    %370 = vector.extract_strided_slice %352 {offsets = [0, 256], sizes = [8, 128], strides = [1, 1]} : vector<8x384xf32> to vector<8x128xf32>
    %c0_125 = arith.constant 0 : index
    %c0_126 = arith.constant 0 : index
    %371 = vector.load %arg8[%c0_125, %c0_126] : memref<1x128xf32, #tpu.memory_space<vmem>>, vector<1x128xf32>
    %372 = vector.broadcast %371 : vector<1x128xf32> to vector<8x128xf32>
    %373 = arith.addf %370, %372 : vector<8x128xf32>
    %374 = arith.mulf %360, %373 : vector<8x128xf32>
    %375 = arith.addf %369, %374 : vector<8x128xf32>
    %376 = math.tanh %375 : vector<8x128xf32>
    %cst_127 = arith.constant 1.000000e+00 : f32
    %377 = vector.broadcast %cst_127 : f32 to vector<8x128xf32>
    %378 = arith.subf %377, %368 : vector<8x128xf32>
    %379 = arith.mulf %378, %376 : vector<8x128xf32>
    %380 = arith.mulf %368, %346 : vector<8x128xf32>
    %381 = arith.addf %379, %380 : vector<8x128xf32>
    %c2_i32_128 = arith.constant 2 : i32
    %c8_i32_129 = arith.constant 8 : i32
    %382 = arith.muli %c2_i32_128, %c8_i32_129 : i32
    %383 = tpu.assume_multiple %382, 8 : i32
    %384 = arith.index_cast %383 : i32 to index
    %c0_130 = arith.constant 0 : index
    %385 = vector.load %arg14[%384, %c0_130] : memref<64x384xf32, #tpu.memory_space<vmem>>, vector<8x384xf32>
    %c0_131 = arith.constant 0 : index
    %c0_132 = arith.constant 0 : index
    %386 = vector.load %arg6[%c0_131, %c0_132] : memref<128x384xf32, #tpu.memory_space<vmem>>, vector<128x384xf32>
    %cst_133 = arith.constant dense<0.000000e+00> : vector<8x384xf32>
    %387 = tpu.matmul %381, %386, %cst_133 {dimension_numbers = #tpu.dot_dimension_numbers<[1], [0], [0], [1], [0, 0, 1, 1], [], []>} : vector<8x128xf32>, vector<128x384xf32>, vector<8x384xf32> -> vector<8x384xf32>
    %388 = vector.extract_strided_slice %385 {offsets = [0, 0], sizes = [8, 128], strides = [1, 1]} : vector<8x384xf32> to vector<8x128xf32>
    %389 = vector.extract_strided_slice %387 {offsets = [0, 0], sizes = [8, 128], strides = [1, 1]} : vector<8x384xf32> to vector<8x128xf32>
    %390 = arith.addf %388, %389 : vector<8x128xf32>
    %391 = arith.negf %390 : vector<8x128xf32>
    %392 = math.exp %391 : vector<8x128xf32>
    %cst_134 = arith.constant 1.000000e+00 : f32
    %393 = vector.broadcast %cst_134 : f32 to vector<8x128xf32>
    %394 = arith.addf %393, %392 : vector<8x128xf32>
    %395 = arith.divf %393, %394 : vector<8x128xf32>
    %396 = vector.extract_strided_slice %385 {offsets = [0, 128], sizes = [8, 128], strides = [1, 1]} : vector<8x384xf32> to vector<8x128xf32>
    %397 = vector.extract_strided_slice %387 {offsets = [0, 128], sizes = [8, 128], strides = [1, 1]} : vector<8x384xf32> to vector<8x128xf32>
    %398 = arith.addf %396, %397 : vector<8x128xf32>
    %399 = arith.negf %398 : vector<8x128xf32>
    %400 = math.exp %399 : vector<8x128xf32>
    %cst_135 = arith.constant 1.000000e+00 : f32
    %401 = vector.broadcast %cst_135 : f32 to vector<8x128xf32>
    %402 = arith.addf %401, %400 : vector<8x128xf32>
    %403 = arith.divf %401, %402 : vector<8x128xf32>
    %404 = vector.extract_strided_slice %385 {offsets = [0, 256], sizes = [8, 128], strides = [1, 1]} : vector<8x384xf32> to vector<8x128xf32>
    %405 = vector.extract_strided_slice %387 {offsets = [0, 256], sizes = [8, 128], strides = [1, 1]} : vector<8x384xf32> to vector<8x128xf32>
    %c0_136 = arith.constant 0 : index
    %c0_137 = arith.constant 0 : index
    %406 = vector.load %arg8[%c0_136, %c0_137] : memref<1x128xf32, #tpu.memory_space<vmem>>, vector<1x128xf32>
    %407 = vector.broadcast %406 : vector<1x128xf32> to vector<8x128xf32>
    %408 = arith.addf %405, %407 : vector<8x128xf32>
    %409 = arith.mulf %395, %408 : vector<8x128xf32>
    %410 = arith.addf %404, %409 : vector<8x128xf32>
    %411 = math.tanh %410 : vector<8x128xf32>
    %cst_138 = arith.constant 1.000000e+00 : f32
    %412 = vector.broadcast %cst_138 : f32 to vector<8x128xf32>
    %413 = arith.subf %412, %403 : vector<8x128xf32>
    %414 = arith.mulf %413, %411 : vector<8x128xf32>
    %415 = arith.mulf %403, %381 : vector<8x128xf32>
    %416 = arith.addf %414, %415 : vector<8x128xf32>
    %c3_i32_139 = arith.constant 3 : i32
    %c8_i32_140 = arith.constant 8 : i32
    %417 = arith.muli %c3_i32_139, %c8_i32_140 : i32
    %418 = tpu.assume_multiple %417, 8 : i32
    %419 = arith.index_cast %418 : i32 to index
    %c0_141 = arith.constant 0 : index
    %420 = vector.load %arg14[%419, %c0_141] : memref<64x384xf32, #tpu.memory_space<vmem>>, vector<8x384xf32>
    %c0_142 = arith.constant 0 : index
    %c0_143 = arith.constant 0 : index
    %421 = vector.load %arg6[%c0_142, %c0_143] : memref<128x384xf32, #tpu.memory_space<vmem>>, vector<128x384xf32>
    %cst_144 = arith.constant dense<0.000000e+00> : vector<8x384xf32>
    %422 = tpu.matmul %416, %421, %cst_144 {dimension_numbers = #tpu.dot_dimension_numbers<[1], [0], [0], [1], [0, 0, 1, 1], [], []>} : vector<8x128xf32>, vector<128x384xf32>, vector<8x384xf32> -> vector<8x384xf32>
    %423 = vector.extract_strided_slice %420 {offsets = [0, 0], sizes = [8, 128], strides = [1, 1]} : vector<8x384xf32> to vector<8x128xf32>
    %424 = vector.extract_strided_slice %422 {offsets = [0, 0], sizes = [8, 128], strides = [1, 1]} : vector<8x384xf32> to vector<8x128xf32>
    %425 = arith.addf %423, %424 : vector<8x128xf32>
    %426 = arith.negf %425 : vector<8x128xf32>
    %427 = math.exp %426 : vector<8x128xf32>
    %cst_145 = arith.constant 1.000000e+00 : f32
    %428 = vector.broadcast %cst_145 : f32 to vector<8x128xf32>
    %429 = arith.addf %428, %427 : vector<8x128xf32>
    %430 = arith.divf %428, %429 : vector<8x128xf32>
    %431 = vector.extract_strided_slice %420 {offsets = [0, 128], sizes = [8, 128], strides = [1, 1]} : vector<8x384xf32> to vector<8x128xf32>
    %432 = vector.extract_strided_slice %422 {offsets = [0, 128], sizes = [8, 128], strides = [1, 1]} : vector<8x384xf32> to vector<8x128xf32>
    %433 = arith.addf %431, %432 : vector<8x128xf32>
    %434 = arith.negf %433 : vector<8x128xf32>
    %435 = math.exp %434 : vector<8x128xf32>
    %cst_146 = arith.constant 1.000000e+00 : f32
    %436 = vector.broadcast %cst_146 : f32 to vector<8x128xf32>
    %437 = arith.addf %436, %435 : vector<8x128xf32>
    %438 = arith.divf %436, %437 : vector<8x128xf32>
    %439 = vector.extract_strided_slice %420 {offsets = [0, 256], sizes = [8, 128], strides = [1, 1]} : vector<8x384xf32> to vector<8x128xf32>
    %440 = vector.extract_strided_slice %422 {offsets = [0, 256], sizes = [8, 128], strides = [1, 1]} : vector<8x384xf32> to vector<8x128xf32>
    %c0_147 = arith.constant 0 : index
    %c0_148 = arith.constant 0 : index
    %441 = vector.load %arg8[%c0_147, %c0_148] : memref<1x128xf32, #tpu.memory_space<vmem>>, vector<1x128xf32>
    %442 = vector.broadcast %441 : vector<1x128xf32> to vector<8x128xf32>
    %443 = arith.addf %440, %442 : vector<8x128xf32>
    %444 = arith.mulf %430, %443 : vector<8x128xf32>
    %445 = arith.addf %439, %444 : vector<8x128xf32>
    %446 = math.tanh %445 : vector<8x128xf32>
    %cst_149 = arith.constant 1.000000e+00 : f32
    %447 = vector.broadcast %cst_149 : f32 to vector<8x128xf32>
    %448 = arith.subf %447, %438 : vector<8x128xf32>
    %449 = arith.mulf %448, %446 : vector<8x128xf32>
    %450 = arith.mulf %438, %416 : vector<8x128xf32>
    %451 = arith.addf %449, %450 : vector<8x128xf32>
    %c4_i32_150 = arith.constant 4 : i32
    %c8_i32_151 = arith.constant 8 : i32
    %452 = arith.muli %c4_i32_150, %c8_i32_151 : i32
    %453 = tpu.assume_multiple %452, 8 : i32
    %454 = arith.index_cast %453 : i32 to index
    %c0_152 = arith.constant 0 : index
    %455 = vector.load %arg14[%454, %c0_152] : memref<64x384xf32, #tpu.memory_space<vmem>>, vector<8x384xf32>
    %c0_153 = arith.constant 0 : index
    %c0_154 = arith.constant 0 : index
    %456 = vector.load %arg6[%c0_153, %c0_154] : memref<128x384xf32, #tpu.memory_space<vmem>>, vector<128x384xf32>
    %cst_155 = arith.constant dense<0.000000e+00> : vector<8x384xf32>
    %457 = tpu.matmul %451, %456, %cst_155 {dimension_numbers = #tpu.dot_dimension_numbers<[1], [0], [0], [1], [0, 0, 1, 1], [], []>} : vector<8x128xf32>, vector<128x384xf32>, vector<8x384xf32> -> vector<8x384xf32>
    %458 = vector.extract_strided_slice %455 {offsets = [0, 0], sizes = [8, 128], strides = [1, 1]} : vector<8x384xf32> to vector<8x128xf32>
    %459 = vector.extract_strided_slice %457 {offsets = [0, 0], sizes = [8, 128], strides = [1, 1]} : vector<8x384xf32> to vector<8x128xf32>
    %460 = arith.addf %458, %459 : vector<8x128xf32>
    %461 = arith.negf %460 : vector<8x128xf32>
    %462 = math.exp %461 : vector<8x128xf32>
    %cst_156 = arith.constant 1.000000e+00 : f32
    %463 = vector.broadcast %cst_156 : f32 to vector<8x128xf32>
    %464 = arith.addf %463, %462 : vector<8x128xf32>
    %465 = arith.divf %463, %464 : vector<8x128xf32>
    %466 = vector.extract_strided_slice %455 {offsets = [0, 128], sizes = [8, 128], strides = [1, 1]} : vector<8x384xf32> to vector<8x128xf32>
    %467 = vector.extract_strided_slice %457 {offsets = [0, 128], sizes = [8, 128], strides = [1, 1]} : vector<8x384xf32> to vector<8x128xf32>
    %468 = arith.addf %466, %467 : vector<8x128xf32>
    %469 = arith.negf %468 : vector<8x128xf32>
    %470 = math.exp %469 : vector<8x128xf32>
    %cst_157 = arith.constant 1.000000e+00 : f32
    %471 = vector.broadcast %cst_157 : f32 to vector<8x128xf32>
    %472 = arith.addf %471, %470 : vector<8x128xf32>
    %473 = arith.divf %471, %472 : vector<8x128xf32>
    %474 = vector.extract_strided_slice %455 {offsets = [0, 256], sizes = [8, 128], strides = [1, 1]} : vector<8x384xf32> to vector<8x128xf32>
    %475 = vector.extract_strided_slice %457 {offsets = [0, 256], sizes = [8, 128], strides = [1, 1]} : vector<8x384xf32> to vector<8x128xf32>
    %c0_158 = arith.constant 0 : index
    %c0_159 = arith.constant 0 : index
    %476 = vector.load %arg8[%c0_158, %c0_159] : memref<1x128xf32, #tpu.memory_space<vmem>>, vector<1x128xf32>
    %477 = vector.broadcast %476 : vector<1x128xf32> to vector<8x128xf32>
    %478 = arith.addf %475, %477 : vector<8x128xf32>
    %479 = arith.mulf %465, %478 : vector<8x128xf32>
    %480 = arith.addf %474, %479 : vector<8x128xf32>
    %481 = math.tanh %480 : vector<8x128xf32>
    %cst_160 = arith.constant 1.000000e+00 : f32
    %482 = vector.broadcast %cst_160 : f32 to vector<8x128xf32>
    %483 = arith.subf %482, %473 : vector<8x128xf32>
    %484 = arith.mulf %483, %481 : vector<8x128xf32>
    %485 = arith.mulf %473, %451 : vector<8x128xf32>
    %486 = arith.addf %484, %485 : vector<8x128xf32>
    %c5_i32_161 = arith.constant 5 : i32
    %c8_i32_162 = arith.constant 8 : i32
    %487 = arith.muli %c5_i32_161, %c8_i32_162 : i32
    %488 = tpu.assume_multiple %487, 8 : i32
    %489 = arith.index_cast %488 : i32 to index
    %c0_163 = arith.constant 0 : index
    %490 = vector.load %arg14[%489, %c0_163] : memref<64x384xf32, #tpu.memory_space<vmem>>, vector<8x384xf32>
    %c0_164 = arith.constant 0 : index
    %c0_165 = arith.constant 0 : index
    %491 = vector.load %arg6[%c0_164, %c0_165] : memref<128x384xf32, #tpu.memory_space<vmem>>, vector<128x384xf32>
    %cst_166 = arith.constant dense<0.000000e+00> : vector<8x384xf32>
    %492 = tpu.matmul %486, %491, %cst_166 {dimension_numbers = #tpu.dot_dimension_numbers<[1], [0], [0], [1], [0, 0, 1, 1], [], []>} : vector<8x128xf32>, vector<128x384xf32>, vector<8x384xf32> -> vector<8x384xf32>
    %493 = vector.extract_strided_slice %490 {offsets = [0, 0], sizes = [8, 128], strides = [1, 1]} : vector<8x384xf32> to vector<8x128xf32>
    %494 = vector.extract_strided_slice %492 {offsets = [0, 0], sizes = [8, 128], strides = [1, 1]} : vector<8x384xf32> to vector<8x128xf32>
    %495 = arith.addf %493, %494 : vector<8x128xf32>
    %496 = arith.negf %495 : vector<8x128xf32>
    %497 = math.exp %496 : vector<8x128xf32>
    %cst_167 = arith.constant 1.000000e+00 : f32
    %498 = vector.broadcast %cst_167 : f32 to vector<8x128xf32>
    %499 = arith.addf %498, %497 : vector<8x128xf32>
    %500 = arith.divf %498, %499 : vector<8x128xf32>
    %501 = vector.extract_strided_slice %490 {offsets = [0, 128], sizes = [8, 128], strides = [1, 1]} : vector<8x384xf32> to vector<8x128xf32>
    %502 = vector.extract_strided_slice %492 {offsets = [0, 128], sizes = [8, 128], strides = [1, 1]} : vector<8x384xf32> to vector<8x128xf32>
    %503 = arith.addf %501, %502 : vector<8x128xf32>
    %504 = arith.negf %503 : vector<8x128xf32>
    %505 = math.exp %504 : vector<8x128xf32>
    %cst_168 = arith.constant 1.000000e+00 : f32
    %506 = vector.broadcast %cst_168 : f32 to vector<8x128xf32>
    %507 = arith.addf %506, %505 : vector<8x128xf32>
    %508 = arith.divf %506, %507 : vector<8x128xf32>
    %509 = vector.extract_strided_slice %490 {offsets = [0, 256], sizes = [8, 128], strides = [1, 1]} : vector<8x384xf32> to vector<8x128xf32>
    %510 = vector.extract_strided_slice %492 {offsets = [0, 256], sizes = [8, 128], strides = [1, 1]} : vector<8x384xf32> to vector<8x128xf32>
    %c0_169 = arith.constant 0 : index
    %c0_170 = arith.constant 0 : index
    %511 = vector.load %arg8[%c0_169, %c0_170] : memref<1x128xf32, #tpu.memory_space<vmem>>, vector<1x128xf32>
    %512 = vector.broadcast %511 : vector<1x128xf32> to vector<8x128xf32>
    %513 = arith.addf %510, %512 : vector<8x128xf32>
    %514 = arith.mulf %500, %513 : vector<8x128xf32>
    %515 = arith.addf %509, %514 : vector<8x128xf32>
    %516 = math.tanh %515 : vector<8x128xf32>
    %cst_171 = arith.constant 1.000000e+00 : f32
    %517 = vector.broadcast %cst_171 : f32 to vector<8x128xf32>
    %518 = arith.subf %517, %508 : vector<8x128xf32>
    %519 = arith.mulf %518, %516 : vector<8x128xf32>
    %520 = arith.mulf %508, %486 : vector<8x128xf32>
    %521 = arith.addf %519, %520 : vector<8x128xf32>
    %c6_i32_172 = arith.constant 6 : i32
    %c8_i32_173 = arith.constant 8 : i32
    %522 = arith.muli %c6_i32_172, %c8_i32_173 : i32
    %523 = tpu.assume_multiple %522, 8 : i32
    %524 = arith.index_cast %523 : i32 to index
    %c0_174 = arith.constant 0 : index
    %525 = vector.load %arg14[%524, %c0_174] : memref<64x384xf32, #tpu.memory_space<vmem>>, vector<8x384xf32>
    %c0_175 = arith.constant 0 : index
    %c0_176 = arith.constant 0 : index
    %526 = vector.load %arg6[%c0_175, %c0_176] : memref<128x384xf32, #tpu.memory_space<vmem>>, vector<128x384xf32>
    %cst_177 = arith.constant dense<0.000000e+00> : vector<8x384xf32>
    %527 = tpu.matmul %521, %526, %cst_177 {dimension_numbers = #tpu.dot_dimension_numbers<[1], [0], [0], [1], [0, 0, 1, 1], [], []>} : vector<8x128xf32>, vector<128x384xf32>, vector<8x384xf32> -> vector<8x384xf32>
    %528 = vector.extract_strided_slice %525 {offsets = [0, 0], sizes = [8, 128], strides = [1, 1]} : vector<8x384xf32> to vector<8x128xf32>
    %529 = vector.extract_strided_slice %527 {offsets = [0, 0], sizes = [8, 128], strides = [1, 1]} : vector<8x384xf32> to vector<8x128xf32>
    %530 = arith.addf %528, %529 : vector<8x128xf32>
    %531 = arith.negf %530 : vector<8x128xf32>
    %532 = math.exp %531 : vector<8x128xf32>
    %cst_178 = arith.constant 1.000000e+00 : f32
    %533 = vector.broadcast %cst_178 : f32 to vector<8x128xf32>
    %534 = arith.addf %533, %532 : vector<8x128xf32>
    %535 = arith.divf %533, %534 : vector<8x128xf32>
    %536 = vector.extract_strided_slice %525 {offsets = [0, 128], sizes = [8, 128], strides = [1, 1]} : vector<8x384xf32> to vector<8x128xf32>
    %537 = vector.extract_strided_slice %527 {offsets = [0, 128], sizes = [8, 128], strides = [1, 1]} : vector<8x384xf32> to vector<8x128xf32>
    %538 = arith.addf %536, %537 : vector<8x128xf32>
    %539 = arith.negf %538 : vector<8x128xf32>
    %540 = math.exp %539 : vector<8x128xf32>
    %cst_179 = arith.constant 1.000000e+00 : f32
    %541 = vector.broadcast %cst_179 : f32 to vector<8x128xf32>
    %542 = arith.addf %541, %540 : vector<8x128xf32>
    %543 = arith.divf %541, %542 : vector<8x128xf32>
    %544 = vector.extract_strided_slice %525 {offsets = [0, 256], sizes = [8, 128], strides = [1, 1]} : vector<8x384xf32> to vector<8x128xf32>
    %545 = vector.extract_strided_slice %527 {offsets = [0, 256], sizes = [8, 128], strides = [1, 1]} : vector<8x384xf32> to vector<8x128xf32>
    %c0_180 = arith.constant 0 : index
    %c0_181 = arith.constant 0 : index
    %546 = vector.load %arg8[%c0_180, %c0_181] : memref<1x128xf32, #tpu.memory_space<vmem>>, vector<1x128xf32>
    %547 = vector.broadcast %546 : vector<1x128xf32> to vector<8x128xf32>
    %548 = arith.addf %545, %547 : vector<8x128xf32>
    %549 = arith.mulf %535, %548 : vector<8x128xf32>
    %550 = arith.addf %544, %549 : vector<8x128xf32>
    %551 = math.tanh %550 : vector<8x128xf32>
    %cst_182 = arith.constant 1.000000e+00 : f32
    %552 = vector.broadcast %cst_182 : f32 to vector<8x128xf32>
    %553 = arith.subf %552, %543 : vector<8x128xf32>
    %554 = arith.mulf %553, %551 : vector<8x128xf32>
    %555 = arith.mulf %543, %521 : vector<8x128xf32>
    %556 = arith.addf %554, %555 : vector<8x128xf32>
    %c7_i32_183 = arith.constant 7 : i32
    %c8_i32_184 = arith.constant 8 : i32
    %557 = arith.muli %c7_i32_183, %c8_i32_184 : i32
    %558 = tpu.assume_multiple %557, 8 : i32
    %559 = arith.index_cast %558 : i32 to index
    %c0_185 = arith.constant 0 : index
    %560 = vector.load %arg14[%559, %c0_185] : memref<64x384xf32, #tpu.memory_space<vmem>>, vector<8x384xf32>
    %c0_186 = arith.constant 0 : index
    %c0_187 = arith.constant 0 : index
    %561 = vector.load %arg6[%c0_186, %c0_187] : memref<128x384xf32, #tpu.memory_space<vmem>>, vector<128x384xf32>
    %cst_188 = arith.constant dense<0.000000e+00> : vector<8x384xf32>
    %562 = tpu.matmul %556, %561, %cst_188 {dimension_numbers = #tpu.dot_dimension_numbers<[1], [0], [0], [1], [0, 0, 1, 1], [], []>} : vector<8x128xf32>, vector<128x384xf32>, vector<8x384xf32> -> vector<8x384xf32>
    %563 = vector.extract_strided_slice %560 {offsets = [0, 0], sizes = [8, 128], strides = [1, 1]} : vector<8x384xf32> to vector<8x128xf32>
    %564 = vector.extract_strided_slice %562 {offsets = [0, 0], sizes = [8, 128], strides = [1, 1]} : vector<8x384xf32> to vector<8x128xf32>
    %565 = arith.addf %563, %564 : vector<8x128xf32>
    %566 = arith.negf %565 : vector<8x128xf32>
    %567 = math.exp %566 : vector<8x128xf32>
    %cst_189 = arith.constant 1.000000e+00 : f32
    %568 = vector.broadcast %cst_189 : f32 to vector<8x128xf32>
    %569 = arith.addf %568, %567 : vector<8x128xf32>
    %570 = arith.divf %568, %569 : vector<8x128xf32>
    %571 = vector.extract_strided_slice %560 {offsets = [0, 128], sizes = [8, 128], strides = [1, 1]} : vector<8x384xf32> to vector<8x128xf32>
    %572 = vector.extract_strided_slice %562 {offsets = [0, 128], sizes = [8, 128], strides = [1, 1]} : vector<8x384xf32> to vector<8x128xf32>
    %573 = arith.addf %571, %572 : vector<8x128xf32>
    %574 = arith.negf %573 : vector<8x128xf32>
    %575 = math.exp %574 : vector<8x128xf32>
    %cst_190 = arith.constant 1.000000e+00 : f32
    %576 = vector.broadcast %cst_190 : f32 to vector<8x128xf32>
    %577 = arith.addf %576, %575 : vector<8x128xf32>
    %578 = arith.divf %576, %577 : vector<8x128xf32>
    %579 = vector.extract_strided_slice %560 {offsets = [0, 256], sizes = [8, 128], strides = [1, 1]} : vector<8x384xf32> to vector<8x128xf32>
    %580 = vector.extract_strided_slice %562 {offsets = [0, 256], sizes = [8, 128], strides = [1, 1]} : vector<8x384xf32> to vector<8x128xf32>
    %c0_191 = arith.constant 0 : index
    %c0_192 = arith.constant 0 : index
    %581 = vector.load %arg8[%c0_191, %c0_192] : memref<1x128xf32, #tpu.memory_space<vmem>>, vector<1x128xf32>
    %582 = vector.broadcast %581 : vector<1x128xf32> to vector<8x128xf32>
    %583 = arith.addf %580, %582 : vector<8x128xf32>
    %584 = arith.mulf %570, %583 : vector<8x128xf32>
    %585 = arith.addf %579, %584 : vector<8x128xf32>
    %586 = math.tanh %585 : vector<8x128xf32>
    %cst_193 = arith.constant 1.000000e+00 : f32
    %587 = vector.broadcast %cst_193 : f32 to vector<8x128xf32>
    %588 = arith.subf %587, %578 : vector<8x128xf32>
    %589 = arith.mulf %588, %586 : vector<8x128xf32>
    %590 = arith.mulf %578, %556 : vector<8x128xf32>
    %591 = arith.addf %589, %590 : vector<8x128xf32>
    %c8_i32_194 = arith.constant 8 : i32
    %c0_195 = arith.constant 0 : index
    %c0_196 = arith.constant 0 : index
    %592 = vector.load %arg9[%c0_195, %c0_196] : memref<128x128xf32, #tpu.memory_space<vmem>>, vector<128x128xf32>
    %cst_197 = arith.constant dense<0.000000e+00> : vector<8x128xf32>
    %593 = tpu.matmul %591, %592, %cst_197 {dimension_numbers = #tpu.dot_dimension_numbers<[1], [0], [0], [1], [0, 0, 1, 1], [], []>} : vector<8x128xf32>, vector<128x128xf32>, vector<8x128xf32> -> vector<8x128xf32>
    %c0_198 = arith.constant 0 : index
    %c0_199 = arith.constant 0 : index
    %594 = vector.load %arg10[%c0_198, %c0_199] : memref<1x128xf32, #tpu.memory_space<vmem>>, vector<1x128xf32>
    %595 = vector.broadcast %594 : vector<1x128xf32> to vector<8x128xf32>
    %596 = arith.addf %593, %595 : vector<8x128xf32>
    %cst_200 = arith.constant 0.000000e+00 : f32
    %597 = vector.broadcast %cst_200 : f32 to vector<8x128xf32>
    %598 = arith.maximumf %596, %597 : vector<8x128xf32>
    %c0_201 = arith.constant 0 : index
    %c0_202 = arith.constant 0 : index
    %599 = vector.load %arg11[%c0_201, %c0_202] : memref<128x128xf32, #tpu.memory_space<vmem>>, vector<128x128xf32>
    %cst_203 = arith.constant dense<0.000000e+00> : vector<8x128xf32>
    %600 = tpu.matmul %598, %599, %cst_203 {dimension_numbers = #tpu.dot_dimension_numbers<[1], [0], [0], [1], [0, 0, 1, 1], [], []>} : vector<8x128xf32>, vector<128x128xf32>, vector<8x128xf32> -> vector<8x128xf32>
    %c0_204 = arith.constant 0 : index
    %c0_205 = arith.constant 0 : index
    %601 = vector.load %arg12[%c0_204, %c0_205] : memref<1x128xf32, #tpu.memory_space<vmem>>, vector<1x128xf32>
    %602 = vector.broadcast %601 : vector<1x128xf32> to vector<8x128xf32>
    %603 = arith.addf %600, %602 : vector<8x128xf32>
    %c0_206 = arith.constant 0 : index
    %c0_207 = arith.constant 0 : index
    %604 = vector.load %arg13[%c0_206, %c0_207] : memref<8x128xf32, #tpu.memory_space<vmem>>, vector<8x128xf32>
    tpu.vector_store %arg13[%c0_206, %c0_207], %603 {strides = array<i32>} : memref<8x128xf32, #tpu.memory_space<vmem>>, vector<8x128xf32>,
    return
  }
}

</mosaic_0001>

<bundles_post_ra>
// kernel: gru_model_forward.1
= control target key start
LH: loop header
LB: loop body
LE: loop exit
PB: predicated region body
PF: predicated region fallthrough
CT: control target
= control target key end

     0   :  { %18 = vsyncpa [#allocation5], 0  ;;  %s7816_s0 = inlined_call_operand.vmem [shape: f32[64,16], index: 0, kind: input, shape index: {}]   ;;  %s7817_s1 = inlined_call_operand.hbm [shape: f32[16,384], index: 1, kind: input, shape index: {}]   ;;  %s7818_s2 = inlined_call_operand.hbm [shape: f32[128,384], index: 2, kind: input, shape index: {}]   ;;  %s7819_s3 = inlined_call_operand.vmem [shape: f32[1,384], index: 3, kind: input, shape index: {}]   ;;  %s7820_s4 = inlined_call_operand.vmem [shape: f32[1,128], index: 4, kind: input, shape index: {}]   ;;  %s7821_s5 = inlined_call_operand.hbm [shape: f32[128,384], index: 5, kind: input, shape index: {}]   ;;  %s7822_s6 = inlined_call_operand.hbm [shape: f32[128,384], index: 6, kind: input, shape index: {}]   ;;  %s7823_s7 = inlined_call_operand.vmem [shape: f32[1,384], index: 7, kind: input, shape index: {}]   ;;  %s7824_s8 = inlined_call_operand.vmem [shape: f32[1,128], index: 8, kind: input, shape index: {}]   ;;  %s7825_s9 = inlined_call_operand.vmem [shape: f32[128,128], index: 9, kind: input, shape index: {}]   ;;  %s7826_s10 = inlined_call_operand.vmem [shape: f32[1,128], index: 10, kind: input, shape index: {}]   ;;  %s7827_s11 = inlined_call_operand.hbm [shape: f32[128,128], index: 11, kind: input, shape index: {}]   ;;  %s7828_s12 = inlined_call_operand.vmem [shape: f32[1,128], index: 12, kind: input, shape index: {}]   ;;  %s7829_s13 = inlined_call_operand.vmem [shape: f32[8,128], index: 13, kind: output, shape index: {}]  }
   0x1   :  { %19 = vsyncpa [#allocation7], 0 }
   0x2   :  { %20 = vsyncpa [#allocation10], 0  ;;  %s6574_s25 = smov [#allocation6]   ;;  %s6575_s27 = smov [#allocation9]  }
   0x3   :  { %s40_s26 = sshll.u32 %s6574_s25, 4  ;;  %s68_s28 = sshll.u32 %s6575_s27, 4  ;;  %s41_s26 = int_to_ptr.vmem [resolvable:$true] %s40_s26  ;;  %s6656_s28 = int_to_ptr.vmem [resolvable:$true] %s68_s28 }
   0x4   :  { %s6458_s14 = scalar_lea.hbm %s7818_s2, 6144 }
   0x5   :  { %p6459_p0 = scmp.ne.s32.totalorder %s7818_s2, %s6458_s14  ;;  %p6462_p1 = scmp.lt.u32.totalorder %s6458_s14, %s7818_s2 }
   0x7   :  { %p6464_p2 = pnand %p6462_p1, %p6459_p0 }
   0x9   :  { %6467 = shalt.err (!%p6464_p2)
}
   0xa   :  { %s6468_s19 = scalar_lea.vmem %s41_s26, 6144  ;;  %p6473_p4 = scmp.lt.s32.totalorder %s41_s26, %s41_s26 }
   0xb   :  { %p6469_p3 = scmp.ne.s32.totalorder %s41_s26, %s6468_s19  ;;  %p6474_p5 = scmp.lt.s32.totalorder %s6468_s19, %s6468_s19 }
   0xd   :  { %p6475_p6 = por %p6474_p5, %p6473_p4 }
   0xf   :  { %p6476_p7 = pnand %p6475_p6, %p6469_p3 }
  0x11   :  { %6479 = shalt.err (!%p6476_p7)
}
  0x12   :  { %s6576_s20 = smov 384   ;;  %s6577_s21 = smov 24  }
  0x13   :  { %46 = dma.hbm_to_vmem [thread:$0]  %s7818_s2, 6144, %s41_s26, [#allocation7], %s6576_s20, %s6576_s20, %s6577_s21  }
  0x14   :  { %s6480_s27 = scalar_lea.hbm %s7822_s6, 6144 }
  0x15   :  { %p6481_p8 = scmp.ne.s32.totalorder %s7822_s6, %s6480_s27  ;;  %p6484_p9 = scmp.lt.u32.totalorder %s6480_s27, %s7822_s6 }
  0x17   :  { %p6486_p10 = pnand %p6484_p9, %p6481_p8 }
  0x19   :  { %6489 = shalt.err (!%p6486_p10)
}
  0x1a   :  { %s6490_s16 = scalar_lea.vmem %s6656_s28, 6144  ;;  %p6495_p12 = scmp.lt.s32.totalorder %s6656_s28, %s6656_s28 }
  0x1b   :  { %p6491_p11 = scmp.ne.s32.totalorder %s6656_s28, %s6490_s16  ;;  %p6496_p13 = scmp.lt.s32.totalorder %s6490_s16, %s6490_s16 }
  0x1d   :  { %p6497_p0 = por %p6496_p13, %p6495_p12 }
  0x1f   :  { %p6498_p1 = pnand %p6497_p0, %p6491_p11 }
  0x21   :  { %6501 = shalt.err (!%p6498_p1)
}
  0x22   :  { %74 = dma.hbm_to_vmem [thread:$0]  %s7822_s6, 6144, %s6656_s28, [#allocation10], %s6576_s20, %s6576_s20, %s6577_s21  }
  0x23   :  { %s6578_s17 = smov [#allocation4]   ;;  %s6579_s19 = smov [#allocation8]  }
  0x24   :  { %s28_s18 = sshll.u32 %s6578_s17, 4  ;;  %s56_s22 = sshll.u32 %s6579_s19, 4  ;;  %s29_s18 = int_to_ptr.vmem [resolvable:$true] %s28_s18  ;;  %s6693_s22 = int_to_ptr.vmem [resolvable:$true] %s56_s22 }
  0x25   :  { %s6502_s25 = scalar_lea.hbm %s7817_s1, 768 }
  0x26   :  { %p6503_p2 = scmp.ne.s32.totalorder %s7817_s1, %s6502_s25  ;;  %p6506_p3 = scmp.lt.u32.totalorder %s6502_s25, %s7817_s1 }
  0x28   :  { %p6508_p4 = pnand %p6506_p3, %p6503_p2 }
  0x2a   :  { %6511 = shalt.err (!%p6508_p4)
}
  0x2b   :  { %s6512_s6 = scalar_lea.vmem %s29_s18, 768  ;;  %p6517_p6 = scmp.lt.s32.totalorder %s29_s18, %s29_s18 }
  0x2c   :  { %p6513_p5 = scmp.ne.s32.totalorder %s29_s18, %s6512_s6  ;;  %p6518_p7 = scmp.lt.s32.totalorder %s6512_s6, %s6512_s6 }
  0x2e   :  { %p6519_p8 = por %p6518_p7, %p6517_p6 }
  0x30   :  { %p6520_p9 = pnand %p6519_p8, %p6513_p5 }
  0x32   :  { %6523 = shalt.err (!%p6520_p9)
}
  0x33   :  { %34 = dma.hbm_to_vmem [thread:$0]  %s7817_s1, 768, %s29_s18, [#allocation5], %s6576_s20, %s6576_s20, %s6577_s21  }
  0x34   :  { %s6524_s26 = scalar_lea.hbm %s7821_s5, 6144 }
  0x35   :  { %p6525_p10 = scmp.ne.s32.totalorder %s7821_s5, %s6524_s26  ;;  %p6528_p11 = scmp.lt.u32.totalorder %s6524_s26, %s7821_s5 }
  0x37   :  { %p6530_p12 = pnand %p6528_p11, %p6525_p10 }
  0x39   :  { %6533 = shalt.err (!%p6530_p12)
}
  0x3a   :  { %s6534_s25 = scalar_lea.vmem %s6693_s22, 6144  ;;  %p6539_p0 = scmp.lt.s32.totalorder %s6693_s22, %s6693_s22 }
  0x3b   :  { %p6535_p13 = scmp.ne.s32.totalorder %s6693_s22, %s6534_s25  ;;  %p6540_p1 = scmp.lt.s32.totalorder %s6534_s25, %s6534_s25 }
  0x3d   :  { %p6541_p2 = por %p6540_p1, %p6539_p0 }
  0x3f   :  { %p6542_p3 = pnand %p6541_p2, %p6535_p13 }
  0x41   :  { %6545 = shalt.err (!%p6542_p3)
}
  0x42   :  { %62 = dma.hbm_to_vmem [thread:$0]  %s7821_s5, 6144, %s6693_s22, [#allocation7], %s6576_s20, %s6576_s20, %s6577_s21  }
  0x43   :  { %s6580_s27 = smov [#allocation11]   ;;  %s6546_s6 = scalar_lea.hbm %s7827_s11, 2048 }
  0x44   :  { %s88_s29 = sshll.u32 %s6580_s27, 4  ;;  %p6547_p4 = scmp.ne.s32.totalorder %s7827_s11, %s6546_s6  ;;  %s89_s29 = int_to_ptr.vmem [resolvable:$true] %s88_s29 }
  0x45   :  { %p6550_p5 = scmp.lt.u32.totalorder %s6546_s6, %s7827_s11 }
  0x47   :  { %p6552_p6 = pnand %p6550_p5, %p6547_p4 }
  0x49   :  { %6555 = shalt.err (!%p6552_p6)
}
  0x4a   :  { %s6556_s26 = scalar_lea.vmem %s89_s29, 2048  ;;  %p6561_p8 = scmp.lt.s32.totalorder %s89_s29, %s89_s29 }
  0x4b   :  { %p6557_p7 = scmp.ne.s32.totalorder %s89_s29, %s6556_s26  ;;  %p6562_p9 = scmp.lt.s32.totalorder %s6556_s26, %s6556_s26 }
  0x4d   :  { %p6563_p10 = por %p6562_p9, %p6561_p8 }
  0x4f   :  { %p6564_p11 = pnand %p6563_p10, %p6557_p7 }
  0x51   :  { %6567 = shalt.err (!%p6564_p11)
}
  0x52   :  { %s6581_s5 = smov 128   ;;  %s6582_s20 = smov 8  }
  0x53   :  { %94 = dma.hbm_to_vmem [thread:$0]  %s7827_s11, 2048, %s89_s29, [#allocation10], %s6581_s5, %s6581_s5, %s6582_s20  }
  0x54   :  { %6568 = dma.done.wait [#allocation5], 768  }
  0x55   :  { %6569 = vsyncadd [#allocation5], 4294966528 }
  0x56   :  { %6570 = dma.done.wait [#allocation7], 12288  }
  0x57   :  { %6571 = vsyncadd [#allocation7], 4294955008 }
  0x58   :  { %6572 = dma.done.wait [#allocation10], 8192  }
  0x59   :  { %6573 = vsyncadd [#allocation10], 4294959104  ;;  %v6583_v0 = vmov 0.0   ;;  %v121_v1 = vld [vmem:[#allocation4 + $0x8] sm:$0xff]  ;;  %v124_v2 = vld [vmem:[#allocation4 + $0x20] sm:$0xff]  ;;  %vm143_vm0 = vcmask 130048  }
  0x5a   :  { %232 = vmatprep.mubr.f32.mxu0 %v6583_v0  ;;  %v120_v3 = vld [vmem:[#allocation4] sm:$0xff]  ;;  %v5206_v4 = vpack.c.bf16 %v124_v2, %v121_v1  ;;  %v123_v5 = vld [vmem:[#allocation4 + $0x18] sm:$0xff]  ;;  %v420_v9 = vld [vmem:[#allocation6 + $0x20] sm:$0xff]  ;;  %v6584_v48 = vmov 0.0|0.0   ;;  %vm6585_vm1 = vmmov 0  }
  0x5b   :  { %v112_v6 = vld [vmem:[%s7816_s0] sm:$0xff]  ;;  %v417_v7 = vld [vmem:[#allocation6 + $0x8] sm:$0xff]  ;;  %v5208_v8 = vpack.c.bf16 %v123_v5, %v120_v3  ;;  %v416_v10 = vld [vmem:[#allocation6] sm:$0xff] }
  0x5c   :  { %v419_v11 = vld [vmem:[#allocation6 + $0x18] sm:$0xff]  ;;  %4520 = vmatprep.mubr.msk.f32.mxu1 %vm143_vm0, %v112_v6  ;;  %5207 = vmatprep.subr.bf16.mxu0 %v5206_v4  ;;  %v6747_v12 = vpack.c.bf16 %v420_v9, %v417_v7  ;;  %v426_v14 = vld [vmem:[#allocation6 + $0x50] sm:$0xff]  ;;  %v425_v18 = vld [vmem:[#allocation6 + $0x48] sm:$0xff] }
  0x5d   :  { %v423_v13 = vld [vmem:[#allocation6 + $0x38] sm:$0xff]  ;;  %5209 = vmatpush1.bf16.msra.mxu0 %v5208_v8  ;;  %v6749_v15 = vpack.c.bf16 %v419_v11, %v416_v10  ;;  %v422_v17 = vld [vmem:[#allocation6 + $0x30] sm:$0xff]  ;;  %v429_v19 = vld [vmem:[#allocation6 + $0x68] sm:$0xff] }
  0x5e   :  { %5215 = vmatprep.subr.bf16.mxu0 %v6747_v12  ;;  %v6752_v16 = vpack.c.bf16 %v426_v14, %v423_v13  ;;  %v432_v20 = vld [vmem:[#allocation6 + $0x80] sm:$0xff]  ;;  %v113_v21 = vld [vmem:[%s7816_s0 + $0x8] sm:$0xff]  ;;  %v6760_v22 = vpack.c.bf16 %v425_v18, %v422_v17  ;;  %v438_v27 = vld [vmem:[#allocation6 + $0xb0] sm:$0xff] }
  0x5f   :  { %v6763_v23 = vpack.c.bf16 %v432_v20, %v429_v19  ;;  %v428_v24 = vld [vmem:[#allocation6 + $0x60] sm:$0xff]  ;;  %v431_v25 = vld [vmem:[#allocation6 + $0x78] sm:$0xff]  ;;  %v434_v34 = vld [vmem:[#allocation6 + $0x90] sm:$0xff] }
  0x60   :  { %4117 = vmatmul.mubr.msk.f32.vlgmr.msra.gmra.mrb[0].mxu0 %vm143_vm0, %v112_v6  ;;  %v435_v26 = vld [vmem:[#allocation6 + $0x98] sm:$0xff]  ;;  %v122_v28 = vld [vmem:[#allocation4 + $0x10] sm:$0xff]  ;;  %v6771_v31 = vpack.c.bf16 %v431_v25, %v428_v24  ;;  %v437_v35 = vld [vmem:[#allocation6 + $0xa8] sm:$0xff] }
  0x61   :  { %5217 = vmatpush1.bf16.msra.mxu0 %v6749_v15  ;;  %238 = vmatprep.mubr.f32.mxu0 %v6583_v0  ;;  %v125_v29 = vld [vmem:[#allocation4 + $0x28] sm:$0xff]  ;;  %v114_v30 = vld [vmem:[%s7816_s0 + $0x10] sm:$0xff]  ;;  %v6774_v33 = vpack.c.bf16 %v438_v27, %v435_v26  ;;  %v418_v36 = vld [vmem:[#allocation6 + $0x10] sm:$0xff]  ;;  %v6784_v42 = vpack.c.bf16 %v437_v35, %v434_v34  ;;  %v128_v35 = vlaneseq }
  0x62   :  { %5219 = vmatprep.subr.bf16.mxu0 %v6752_v16  ;;  %v5210_v32 = vpack.c.bf16 %v125_v29, %v122_v28  ;;  %v441_v37 = vld [vmem:[#allocation6 + $0xc8] sm:$0xff]  ;;  %v444_v38 = vld [vmem:[#allocation6 + $0xe0] sm:$0xff]  ;;  %v427_v44 = vld [vmem:[#allocation6 + $0x58] sm:$0xff] }
  0x63   :  { %v421_v39 = vld [vmem:[#allocation6 + $0x28] sm:$0xff]  ;;  %v424_v43 = vld [vmem:[#allocation6 + $0x40] sm:$0xff]  ;;  %v6787_v45 = vpack.c.bf16 %v444_v38, %v441_v37  ;;  %v443_v47 = vld [vmem:[#allocation6 + $0xd8] sm:$0xff] }
  0x64   :  { %4118 = vmatmul.mubr.msk.f32.gmra.mrb[2].mxu0 %vm143_vm0, %v113_v21  ;;  %5211 = vmatprep.subr.bf16.mxu1 %v5210_v32  ;;  %v6777_v40 = vpack.c.bf16 %v421_v39, %v418_v36  ;;  %v115_v41 = vld [vmem:[%s7816_s0 + $0x18] sm:$0xff]  ;;  %v440_v46 = vld [vmem:[#allocation6 + $0xc0] sm:$0xff]  ;;  %v447_v49 = vld [vmem:[#allocation6 + $0xf8] sm:$0xff]  ;;  %v6793_v51 = vpack.c.bf16 %v427_v44, %v424_v43  ;;  %v6912_v36 = vshrl.u32 %v128_v35, 7 }
  0x65   :  { %5221 = vmatpush1.bf16.msra.mxu0 %v6760_v22  ;;  %244 = vmatprep.mubr.f32.mxu0 %v6583_v0  ;;  %v450_v50 = vld [vmem:[#allocation6 + $0x110] sm:$0xff]  ;;  %v6800_v53 = vpack.c.bf16 %v443_v47, %v440_v46  ;;  %v433_v55 = vld [vmem:[#allocation6 + $0x88] sm:$0xff]  ;;  %v456_v60 = vld [vmem:[#allocation6 + $0x140] sm:$0xff] }
  0x66   :  { %5223 = vmatprep.subr.bf16.mxu0 %v6763_v23  ;;  %5213 = vmatpush3.bf16.msra.mxu1 %v5210_v32  ;;  %v116_v52 = vld [vmem:[%s7816_s0 + $0x20] sm:$0xff]  ;;  %v6803_v56 = vpack.c.bf16 %v450_v50, %v447_v49  ;;  %v449_v58 = vld [vmem:[#allocation6 + $0x108] sm:$0xff]  ;;  %v117_v62 = vld [vmem:[%s7816_s0 + $0x28] sm:$0xff]  ;;  %v138_v37 = vsub.s32 2, %v6912_v36 }
  0x67   :  { %5246 = vmatprep.subr.bf16.mxu1 %v6584_v48  ;;  %v430_v54 = vld [vmem:[#allocation6 + $0x70] sm:$0xff]  ;;  %v453_v59 = vld [vmem:[#allocation6 + $0x128] sm:$0xff]  ;;  %v436_v1 = vld [vmem:[#allocation6 + $0xa0] sm:$0xff] }
  0x68   :  { %4119 = vmatmul.mubr.msk.f32.gmra.mrb[4].mxu0 %vm143_vm0, %v114_v30  ;;  %v446_v57 = vld [vmem:[#allocation6 + $0xf0] sm:$0xff]  ;;  %v6809_v61 = vpack.c.bf16 %v433_v55, %v430_v54  ;;  %v439_v2 = vld [vmem:[#allocation6 + $0xb8] sm:$0xff]  ;;  %v6819_v3 = vpack.c.bf16 %v456_v60, %v453_v59  ;;  %v452_v4 = vld [vmem:[#allocation6 + $0x120] sm:$0xff]  ;;  %v134_v55 = vsub.s32 1, %v6912_v36 }
  0x69   :  { %5225 = vmatpush1.bf16.msra.mxu0 %v6771_v31  ;;  %250 = vmatprep.mubr.f32.mxu0 %v6583_v0  ;;  %v6816_v63 = vpack.c.bf16 %v449_v58, %v446_v57  ;;  %v455_v5 = vld [vmem:[#allocation6 + $0x138] sm:$0xff]  ;;  %v462_v7 = vld [vmem:[#allocation6 + $0x170] sm:$0xff]  ;;  %v6825_v8 = vpack.c.bf16 %v439_v2, %v436_v1  ;;  %v118_v9 = vld [vmem:[%s7816_s0 + $0x30] sm:$0xff] }
  0x6a   :  { %5227 = vmatprep.subr.bf16.mxu0 %v6774_v33  ;;  %4521 = vmatmul.mubr.msk.f32.vlgmr.msra.gmra.mrb[0].mxu1 %vm143_vm0, %v113_v21  ;;  %v459_v6 = vld [vmem:[#allocation6 + $0x158] sm:$0xff]  ;;  %v6832_v10 = vpack.c.bf16 %v455_v5, %v452_v4  ;;  %v442_v11 = vld [vmem:[#allocation6 + $0xd0] sm:$0xff]  ;;  %v445_v13 = vld [vmem:[#allocation6 + $0xe8] sm:$0xff] }
  0x6b   :  { %5248 = vmatpush3.bf16.msra.mxu1 %v6777_v40  ;;  %4523 = vmatprep.mubr.msk.f32.mxu1 %vm143_vm0, %v114_v30  ;;  %v6835_v14 = vpack.c.bf16 %v462_v7, %v459_v6  ;;  %v458_v17 = vld [vmem:[#allocation6 + $0x150] sm:$0xff]  ;;  %v461_v18 = vld [vmem:[#allocation6 + $0x168] sm:$0xff]  ;;  %v6841_v19 = vpack.c.bf16 %v445_v13, %v442_v11  ;;  %v448_v24 = vld [vmem:[#allocation6 + $0x100] sm:$0xff] }
  0x6c   :  { %4120 = vmatmul.mubr.msk.f32.gmra.mrb[6].mxu0 %vm143_vm0, %v115_v41  ;;  %5249 = vmatprep.subr.bf16.mxu1 %v6584_v48  ;;  %v119_v20 = vld [vmem:[%s7816_s0 + $0x38] sm:$0xff]  ;;  %v6848_v21 = vpack.c.bf16 %v461_v18, %v458_v17  ;;  %v451_v25 = vld [vmem:[#allocation6 + $0x118] sm:$0xff]  ;;  %v454_v27 = vld [vmem:[#allocation6 + $0x130] sm:$0xff] }
  0x6d   :  { %5229 = vmatpush1.bf16.msra.mxu0 %v6784_v42  ;;  %256 = vmatprep.mubr.f32.mxu0 %v6583_v0  ;;  %v6855_v26 = vpack.c.bf16 %v451_v25, %v448_v24  ;;  %v457_v28 = vld [vmem:[#allocation6 + $0x148] sm:$0xff]  ;;  %v460_v30 = vld [vmem:[#allocation6 + $0x160] sm:$0xff]  ;;  %v463_v32 = vld [vmem:[#allocation6 + $0x178] sm:$0xff] }
  0x6e   :  { %5231 = vmatprep.subr.bf16.mxu0 %v6787_v45  ;;  %4524 = vmatmul.mubr.msk.f32.gmra.mrb[2].mxu1 %vm143_vm0, %v115_v41  ;;  %v6865_v29 = vpack.c.bf16 %v457_v28, %v454_v27  ;;  %v6874_v34 = vpack.c.bf16 %v463_v32, %v460_v30  ;;  %v126_v38 = vld [vmem:[%s7819_s3] sm:$0x7] }
  0x6f   :  { %5251 = vmatpush3.bf16.msra.mxu1 %v6793_v51  ;;  %4526 = vmatprep.mubr.msk.f32.mxu1 %vm143_vm0, %v116_v52  ;;  %v139_v39 = vrot.slane %v126_v38, %v138_v37  ;;  %v6938_v2 = vrot.slane %v126_v38, %v134_v55  ;;  %v6949_v28 = vld [vmem:[%s7820_s4] ss:$0 sm:$0xff] }
  0x70   :  { %4121 = vmatmul.mubr.msk.f32.gmra.mrb[8].mxu0 %vm143_vm0, %v116_v52  ;;  %5252 = vmatprep.subr.bf16.mxu1 %v6584_v48  ;;  %v130_v52 = vsub.s32 0, %v6912_v36 }
  0x71   :  { %5233 = vmatpush1.bf16.msra.mxu0 %v6800_v53  ;;  %262 = vmatprep.mubr.f32.mxu0 %v6583_v0 }
  0x72   :  { %5235 = vmatprep.subr.bf16.mxu0 %v6803_v56  ;;  %4527 = vmatmul.mubr.msk.f32.gmra.mrb[4].mxu1 %vm143_vm0, %v117_v62  ;;  %v6932_v59 = vrot.slane %v126_v38, %v130_v52 }
  0x73   :  { %5254 = vmatpush3.bf16.msra.mxu1 %v6809_v61  ;;  %4529 = vmatprep.mubr.msk.f32.mxu1 %vm143_vm0, %v118_v9 }
  0x74   :  { %4122 = vmatmul.mubr.msk.f32.gmra.mrb[10].mxu0 %vm143_vm0, %v117_v62  ;;  %5255 = vmatprep.subr.bf16.mxu1 %v6584_v48 }
  0x75   :  { %5237 = vmatpush1.bf16.msra.mxu0 %v6816_v63  ;;  %268 = vmatprep.mubr.f32.mxu0 %v6583_v0 }
  0x76   :  { %5239 = vmatprep.subr.bf16.mxu0 %v6819_v3  ;;  %4530 = vmatmul.mubr.msk.f32.gmra.mrb[6].mxu1 %vm143_vm0, %v119_v20 }
  0x77   :  { %5257 = vmatpush3.bf16.msra.mxu1 %v6825_v8  ;;  %4564 = vmatprep.mubr.msk.f32.mxu1 %vm6585_vm1, %v6583_v0 }
  0x78   :  { %4123 = vmatmul.mubr.msk.f32.gmra.mrb[12].mxu0 %vm143_vm0, %v118_v9  ;;  %5258 = vmatprep.subr.bf16.mxu1 %v6584_v48 }
  0x79   :  { %5241 = vmatpush1.bf16.msra.mxu0 %v6832_v10  ;;  %274 = vmatprep.mubr.f32.mxu0 %v6583_v0 }
  0x7a   :  { %5243 = vmatprep.subr.bf16.mxu0 %v6835_v14 }
  0x7b   :  { %5260 = vmatpush3.bf16.msra.mxu1 %v6841_v19 }
  0x7c   :  { %4124 = vmatmul.mubr.msk.f32.gmra.mrb[14].mxu0 %vm143_vm0, %v119_v20  ;;  %5261 = vmatprep.subr.bf16.mxu1 %v6584_v48 }
  0x7d   :  { %5245 = vmatpush1.bf16.msra.mxu0 %v6848_v21  ;;  %528 = vmatprep.mubr.f32.mxu0 %v6583_v0 }
  0x7e   :  { %5271 = vmatprep.subr.bf16.mxu0 %v6747_v12 }
  0x7f   :  { %5263 = vmatpush3.bf16.msra.mxu1 %v6855_v26 }
  0x80   :  { %529 = vmatmul.mubr.f32.vlgmr.msra.gmra.mrb[0].mxu0 %v6583_v0  ;;  %5264 = vmatprep.subr.bf16.mxu1 %v6584_v48 }
  0x81   :  { %5273 = vmatpush1.bf16.msra.mxu0 %v6749_v15  ;;  %753 = vmatprep.mubr.f32.mxu0 %v6583_v0 }
  0x82   :  { %5275 = vmatprep.subr.bf16.mxu0 %v6752_v16 }
  0x83   :  { %5266 = vmatpush3.bf16.msra.mxu1 %v6865_v29 }
  0x84   :  { %5267 = vmatprep.subr.bf16.mxu1 %v6584_v48 }
  0x85   :  { %5277 = vmatpush1.bf16.msra.mxu0 %v6760_v22 }
  0x86   :  { %5279 = vmatprep.subr.bf16.mxu0 %v6763_v23 }
  0x87   :  { %5269 = vmatpush3.bf16.msra.mxu1 %v6874_v34 }
  0x88   :  { %5302 = vmatprep.subr.bf16.mxu1 %v6584_v48 }
  0x89   :  { %5281 = vmatpush1.bf16.msra.mxu0 %v6771_v31 }
  0x8a   :  { %4565 = vmatmul.mubr.f32.vlgmr.msra.gmra.mrb[8].mxu1 %v6583_v0  ;;  %5283 = vmatprep.subr.bf16.mxu0 %v6774_v33 }
  0x8b   :  { %5304 = vmatpush3.bf16.msra.mxu1 %v6777_v40  ;;  %4599 = vmatprep.mubr.msk.f32.mxu1 %vm6585_vm1, %v6583_v0 }
  0x8c   :  { %5305 = vmatprep.subr.bf16.mxu1 %v6584_v48 }
  0x8d   :  { %5285 = vmatpush1.bf16.msra.mxu0 %v6784_v42 }
  0x8e   :  { %5287 = vmatprep.subr.bf16.mxu0 %v6787_v45 }
  0x8f   :  { %5307 = vmatpush3.bf16.msra.mxu1 %v6793_v51 }
  0x90   :  { %5308 = vmatprep.subr.bf16.mxu1 %v6584_v48 }
  0x91   :  { %5289 = vmatpush1.bf16.msra.mxu0 %v6800_v53 }
  0x92   :  { %5291 = vmatprep.subr.bf16.mxu0 %v6803_v56 }
  0x93   :  { %5310 = vmatpush3.bf16.msra.mxu1 %v6809_v61 }
  0x94   :  { %5311 = vmatprep.subr.bf16.mxu1 %v6584_v48 }
  0x95   :  { %5293 = vmatpush1.bf16.msra.mxu0 %v6816_v63 }
  0x96   :  { %5295 = vmatprep.subr.bf16.mxu0 %v6819_v3 }
  0x97   :  { %5313 = vmatpush3.bf16.msra.mxu1 %v6825_v8 }
  0x98   :  { %5314 = vmatprep.subr.bf16.mxu1 %v6584_v48 }
  0x99   :  { %5297 = vmatpush1.bf16.msra.mxu0 %v6832_v10 }
  0x9a   :  { %5299 = vmatprep.subr.bf16.mxu0 %v6835_v14 }
  0x9b   :  { %5316 = vmatpush3.bf16.msra.mxu1 %v6841_v19 }
  0x9c   :  { %5317 = vmatprep.subr.bf16.mxu1 %v6584_v48 }
  0x9d   :  { %5301 = vmatpush1.bf16.msra.mxu0 %v6848_v21 }
  0x9e   :  { %5327 = vmatprep.subr.bf16.mxu0 %v6747_v12 }
  0x9f   :  { %5319 = vmatpush3.bf16.msra.mxu1 %v6855_v26 }
  0xa0   :  { %5320 = vmatprep.subr.bf16.mxu1 %v6584_v48 }
  0xa3   :  { %5322 = vmatpush3.bf16.msra.mxu1 %v6865_v29 }
  0xa4   :  { %5323 = vmatprep.subr.bf16.mxu1 %v6584_v48 }
  0xa7   :  { %5325 = vmatpush3.bf16.msra.mxu1 %v6874_v34 }
  0xa8   :  { %5358 = vmatprep.subr.bf16.mxu1 %v6584_v48 }
 0x13d   :  { %v4522_v41 = vpop.f32.mrb[0].mxu1 }
 0x13e   :  { %v6920_v43 = vadd.f32 %v4522_v41, %v139_v39  ;;  %v347_v44 = vpop.f32.mrb[1].mxu1 }
 0x13f   :  { %v348_v38 = vadd.f32 %v347_v44, %v139_v39 }
 0x141   :  { %v4525_v46 = vpop.f32.mrb[2].mxu1 }
 0x142   :  { %v6922_v47 = vadd.f32 %v4525_v46, %v139_v39  ;;  %v357_v49 = vpop.f32.mrb[3].mxu1 }
 0x143   :  { %v6924_v50 = vadd.f32 %v357_v49, %v139_v39 }
 0x145   :  { %v4528_v54 = vpop.f32.mrb[4].mxu1 }
 0x146   :  { %v6928_v57 = vadd.f32 %v4528_v54, %v139_v39  ;;  %v367_v58 = vpop.f32.mrb[5].mxu1 }
 0x147   :  { %v6934_v60 = vadd.f32 %v367_v58, %v139_v39 }
 0x149   :  { %v4531_v62 = vpop.f32.mrb[6].mxu1 }
 0x14a   :  { %v6940_v4 = vadd.f32 %v4531_v62, %v139_v39  ;;  %v377_v5 = vpop.f32.mrb[7].mxu1 }
 0x14b   :  { %v6943_v9 = vadd.f32 %v377_v5, %v139_v39 }
 0x153   :  { %v530_v1 = vpop.f32.mrb[0].mxu0 }
 0x154   :  { %v6222_v6 = vadd.f32 %v530_v1, %v6932_v59  ;;  %v532_v7 = vpop.f32.mrb[1].mxu0 }
 0x155   :  { %v6223_v13 = vadd.f32 %v532_v7, %v6938_v2 }
 0x156   :  { %v4133_v11 = vmul.f32 -1.442695, %v6222_v6 }
 0x157   :  { %v4134_v17 = vmul.f32 -1.442695, %v6223_v13 }
 0x158   :  { %6298 = vpow2.f32 %v4133_v11 }
 0x159   :  { %6300 = vpow2.f32 %v4134_v17 }
 0x15d   :  { %v601_v18 = vpop.f32.mrb[8].mxu1 }
 0x15e   :  { %v4566_v20 = vpop.f32.mrb[9].mxu1  ;;  %v626_v32 = vadd.f32 %v6949_v28, %v601_v18 }
 0x162   :  { %v6299_v24 = vpop.eup %6298 }
 0x163   :  { %v609_v25 = vadd.f32 1.0, %v6299_v24  ;;  %v6301_v27 = vpop.eup %6300 }
 0x164   :  { %v616_v30 = vadd.f32 1.0, %v6301_v27 }
 0x165   :  { %6302 = vrcp.f32 %v609_v25 }
 0x166   :  { %6304 = vrcp.f32 %v616_v30 }
 0x16f   :  { %v6303_v35 = vpop.eup %6302 }
 0x170   :  { %v627_v41 = vmul.f32 %v6303_v35, %v626_v32  ;;  %v6305_v49 = vpop.eup %6304 }
 0x171   :  { %v630_v54 = vsub.f32 1.0, %v6305_v49  ;;  %v632_v1 = vmul.f32 0.0, %v6305_v49 }
 0x172   :  { %v628_v46 = vadd.f32 %v627_v41, %v348_v38 }
 0x174   :  { %6306 = vtanh.f32 %v628_v46 }
 0x17e   :  { %v6307_v58 = vpop.eup %6306 }
 0x17f   :  { %v631_v62 = vmul.f32 %v6307_v58, %v630_v54 }
 0x181   :  { %v6952_v5 = vadd.f32 %v632_v1, %v631_v62  ;;  %v1323_v1 = vld [vmem:[#allocation6 + $0x20] sm:$0xff] }
 0x183   :  { %754 = vmatmul.mubr.f32.vlgmr.msra.gmra.mrb[2].mxu0 %v6952_v5  ;;  %4600 = vmatmul.mubr.f32.vlgmr.msra.gmra.mrb[10].mxu1 %v6952_v5 }
 0x184   :  { %5329 = vmatpush1.bf16.msra.mxu0 %v6749_v15  ;;  %5360 = vmatpush3.bf16.msra.mxu1 %v6777_v40 }
 0x185   :  { %5331 = vmatprep.subr.bf16.mxu0 %v6752_v16  ;;  %5361 = vmatprep.subr.bf16.mxu1 %v6584_v48 }
 0x186   :  { %979 = vmatprep.mubr.f32.mxu0 %v6583_v0  ;;  %4634 = vmatprep.mubr.msk.f32.mxu1 %vm6585_vm1, %v6583_v0 }
 0x188   :  { %5333 = vmatpush1.bf16.msra.mxu0 %v6760_v22  ;;  %5363 = vmatpush3.bf16.msra.mxu1 %v6793_v51 }
 0x189   :  { %5335 = vmatprep.subr.bf16.mxu0 %v6763_v23  ;;  %5364 = vmatprep.subr.bf16.mxu1 %v6584_v48 }
 0x18c   :  { %5337 = vmatpush1.bf16.msra.mxu0 %v6771_v31  ;;  %5366 = vmatpush3.bf16.msra.mxu1 %v6809_v61 }
 0x18d   :  { %5339 = vmatprep.subr.bf16.mxu0 %v6774_v33  ;;  %5367 = vmatprep.subr.bf16.mxu1 %v6584_v48 }
 0x190   :  { %5341 = vmatpush1.bf16.msra.mxu0 %v6784_v42  ;;  %5369 = vmatpush3.bf16.msra.mxu1 %v6825_v8 }
 0x191   :  { %5343 = vmatprep.subr.bf16.mxu0 %v6787_v45  ;;  %5370 = vmatprep.subr.bf16.mxu1 %v6584_v48 }
 0x194   :  { %5345 = vmatpush1.bf16.msra.mxu0 %v6800_v53  ;;  %5372 = vmatpush3.bf16.msra.mxu1 %v6841_v19 }
 0x195   :  { %5347 = vmatprep.subr.bf16.mxu0 %v6803_v56  ;;  %5373 = vmatprep.subr.bf16.mxu1 %v6584_v48 }
 0x198   :  { %5349 = vmatpush1.bf16.msra.mxu0 %v6816_v63  ;;  %5375 = vmatpush3.bf16.msra.mxu1 %v6855_v26 }
 0x199   :  { %5351 = vmatprep.subr.bf16.mxu0 %v6819_v3  ;;  %5376 = vmatprep.subr.bf16.mxu1 %v6584_v48 }
 0x19c   :  { %5353 = vmatpush1.bf16.msra.mxu0 %v6832_v10  ;;  %5378 = vmatpush3.bf16.msra.mxu1 %v6865_v29 }
 0x19d   :  { %5355 = vmatprep.subr.bf16.mxu0 %v6835_v14  ;;  %5379 = vmatprep.subr.bf16.mxu1 %v6584_v48 }
 0x1a0   :  { %5357 = vmatpush1.bf16.msra.mxu0 %v6848_v21  ;;  %5381 = vmatpush3.bf16.msra.mxu1 %v6874_v34 }
 0x1a1   :  { %5383 = vmatprep.subr.bf16.mxu0 %v6747_v12  ;;  %5414 = vmatprep.subr.bf16.mxu1 %v6584_v48 }
 0x256   :  { %v755_v39 = vpop.f32.mrb[2].mxu0  ;;  %v826_v44 = vpop.f32.mrb[10].mxu1 }
 0x257   :  { %v6224_v6 = vadd.f32 %v755_v39, %v6932_v59  ;;  %v757_v7 = vpop.f32.mrb[3].mxu0  ;;  %v4601_v11 = vpop.f32.mrb[11].mxu1  ;;  %v851_v12 = vadd.f32 %v6949_v28, %v826_v44  ;;  %v1322_v44 = vld [vmem:[#allocation6 + $0x18] sm:$0xff] }
 0x258   :  { %v6225_v17 = vadd.f32 %v757_v7, %v6938_v2  ;;  %v1326_v7 = vld [vmem:[#allocation6 + $0x38] sm:$0xff] }
 0x259   :  { %v4136_v13 = vmul.f32 -1.442695, %v6224_v6 }
 0x25a   :  { %v4137_v18 = vmul.f32 -1.442695, %v6225_v17 }
 0x25b   :  { %6308 = vpow2.f32 %v4136_v13  ;;  %v1325_v13 = vld [vmem:[#allocation6 + $0x30] sm:$0xff] }
 0x25c   :  { %6310 = vpow2.f32 %v4137_v18  ;;  %v1332_v18 = vld [vmem:[#allocation6 + $0x68] sm:$0xff] }
 0x265   :  { %v6309_v20 = vpop.eup %6308 }
 0x266   :  { %v834_v24 = vadd.f32 1.0, %v6309_v20  ;;  %v6311_v25 = vpop.eup %6310  ;;  %v1335_v20 = vld [vmem:[#allocation6 + $0x80] sm:$0xff] }
 0x267   :  { %v841_v27 = vadd.f32 1.0, %v6311_v25  ;;  %v1331_v25 = vld [vmem:[#allocation6 + $0x60] sm:$0xff] }
 0x268   :  { %6312 = vrcp.f32 %v834_v24  ;;  %v7064_v24 = vpack.c.bf16 %v1335_v20, %v1332_v18 }
 0x269   :  { %6314 = vrcp.f32 %v841_v27  ;;  %v1334_v27 = vld [vmem:[#allocation6 + $0x78] sm:$0xff] }
 0x272   :  { %v6313_v30 = vpop.eup %6312 }
 0x273   :  { %v852_v32 = vmul.f32 %v6313_v30, %v851_v12  ;;  %v6315_v38 = vpop.eup %6314  ;;  %v7066_v12 = vpack.c.bf16 %v1334_v27, %v1331_v25  ;;  %v1338_v30 = vld [vmem:[#allocation6 + $0x98] sm:$0xff]  ;;  %v1361_v25 = vld [vmem:[#allocation6 + $0x150] sm:$0xff]  ;;  %v1364_v27 = vld [vmem:[#allocation6 + $0x168] sm:$0xff] }
 0x274   :  { %v855_v41 = vsub.f32 1.0, %v6315_v38  ;;  %v857_v54 = vmul.f32 %v6315_v38, %v6952_v5  ;;  %v1337_v38 = vld [vmem:[#allocation6 + $0x90] sm:$0xff] }
 0x275   :  { %v853_v35 = vadd.f32 %v852_v32, %v6920_v43  ;;  %v1341_v32 = vld [vmem:[#allocation6 + $0xb0] sm:$0xff] }
 0x277   :  { %6316 = vtanh.f32 %v853_v35  ;;  %v7070_v35 = vpack.c.bf16 %v1341_v32, %v1338_v30  ;;  %v1363_v30 = vld [vmem:[#allocation6 + $0x160] sm:$0xff]  ;;  %v1366_v32 = vld [vmem:[#allocation6 + $0x178] sm:$0xff] }
 0x281   :  { %v6317_v46 = vpop.eup %6316 }
 0x282   :  { %v856_v49 = vmul.f32 %v6317_v46, %v855_v41  ;;  %v1340_v41 = vld [vmem:[#allocation6 + $0xa8] sm:$0xff]  ;;  %v1339_v46 = vld [vmem:[#allocation6 + $0xa0] sm:$0xff] }
 0x284   :  { %v6996_v58 = vadd.f32 %v857_v54, %v856_v49  ;;  %v7072_v49 = vpack.c.bf16 %v1340_v41, %v1337_v38  ;;  %v1342_v54 = vld [vmem:[#allocation6 + $0xb8] sm:$0xff]  ;;  %v7110_v38 = vpack.c.bf16 %v1364_v27, %v1361_v25  ;;  %v7114_v41 = vpack.c.bf16 %v1366_v32, %v1363_v30  ;;  %v1550_v25 = vld [vmem:[#allocation6 + $0x28] sm:$0xff]  ;;  %v1553_v30 = vld [vmem:[#allocation6 + $0x40] sm:$0xff] }
 0x285   :  { %v1556_v32 = vld [vmem:[#allocation6 + $0x58] sm:$0xff] }
 0x286   :  { %980 = vmatmul.mubr.f32.vlgmr.msra.gmra.mrb[4].mxu0 %v6996_v58  ;;  %4635 = vmatmul.mubr.f32.vlgmr.msra.gmra.mrb[12].mxu1 %v6996_v58 }
 0x287   :  { %5385 = vmatpush1.bf16.msra.mxu0 %v6749_v15  ;;  %5416 = vmatpush3.bf16.msra.mxu1 %v6777_v40 }
 0x288   :  { %5387 = vmatprep.subr.bf16.mxu0 %v6752_v16  ;;  %5417 = vmatprep.subr.bf16.mxu1 %v6584_v48 }
 0x289   :  { %1205 = vmatprep.mubr.f32.mxu0 %v6583_v0  ;;  %4669 = vmatprep.mubr.msk.f32.mxu1 %vm6585_vm1, %v6583_v0 }
 0x28b   :  { %5389 = vmatpush1.bf16.msra.mxu0 %v6760_v22  ;;  %5419 = vmatpush3.bf16.msra.mxu1 %v6793_v51 }
 0x28c   :  { %5391 = vmatprep.subr.bf16.mxu0 %v6763_v23  ;;  %5420 = vmatprep.subr.bf16.mxu1 %v6584_v48 }
 0x28f   :  { %5393 = vmatpush1.bf16.msra.mxu0 %v6771_v31  ;;  %5422 = vmatpush3.bf16.msra.mxu1 %v6809_v61 }
 0x290   :  { %5395 = vmatprep.subr.bf16.mxu0 %v6774_v33  ;;  %5423 = vmatprep.subr.bf16.mxu1 %v6584_v48 }
 0x293   :  { %5397 = vmatpush1.bf16.msra.mxu0 %v6784_v42  ;;  %5425 = vmatpush3.bf16.msra.mxu1 %v6825_v8 }
 0x294   :  { %5399 = vmatprep.subr.bf16.mxu0 %v6787_v45  ;;  %5426 = vmatprep.subr.bf16.mxu1 %v6584_v48 }
 0x297   :  { %5401 = vmatpush1.bf16.msra.mxu0 %v6800_v53  ;;  %5428 = vmatpush3.bf16.msra.mxu1 %v6841_v19 }
 0x298   :  { %5403 = vmatprep.subr.bf16.mxu0 %v6803_v56  ;;  %5429 = vmatprep.subr.bf16.mxu1 %v6584_v48 }
 0x29b   :  { %5405 = vmatpush1.bf16.msra.mxu0 %v6816_v63  ;;  %5431 = vmatpush3.bf16.msra.mxu1 %v6855_v26 }
 0x29c   :  { %5407 = vmatprep.subr.bf16.mxu0 %v6819_v3  ;;  %5432 = vmatprep.subr.bf16.mxu1 %v6584_v48 }
 0x29f   :  { %5409 = vmatpush1.bf16.msra.mxu0 %v6832_v10  ;;  %5434 = vmatpush3.bf16.msra.mxu1 %v6865_v29 }
 0x2a0   :  { %5411 = vmatprep.subr.bf16.mxu0 %v6835_v14  ;;  %5435 = vmatprep.subr.bf16.mxu1 %v6584_v48 }
 0x2a3   :  { %5413 = vmatpush1.bf16.msra.mxu0 %v6848_v21  ;;  %5437 = vmatpush3.bf16.msra.mxu1 %v6874_v34 }
 0x2a4   :  { %5470 = vmatprep.subr.bf16.mxu1 %v6584_v48 }
 0x359   :  { %v981_v15 = vpop.f32.mrb[4].mxu0  ;;  %v1052_v16 = vpop.f32.mrb[12].mxu1 }
 0x35a   :  { %v6226_v22 = vadd.f32 %v981_v15, %v6932_v59  ;;  %v983_v23 = vpop.f32.mrb[5].mxu0  ;;  %v4636_v31 = vpop.f32.mrb[13].mxu1  ;;  %v1077_v8 = vadd.f32 %v6949_v28, %v1052_v16  ;;  %v7075_v15 = vpack.c.bf16 %v1342_v54, %v1339_v46  ;;  %v1344_v16 = vld [vmem:[#allocation6 + $0xc8] sm:$0xff] }
 0x35b   :  { %v6227_v42 = vadd.f32 %v983_v23, %v6938_v2  ;;  %v1343_v31 = vld [vmem:[#allocation6 + $0xc0] sm:$0xff] }
 0x35c   :  { %v4139_v33 = vmul.f32 -1.442695, %v6226_v22  ;;  %v1347_v22 = vld [vmem:[#allocation6 + $0xe0] sm:$0xff] }
 0x35d   :  { %v4140_v45 = vmul.f32 -1.442695, %v6227_v42  ;;  %v7079_v23 = vpack.c.bf16 %v1347_v22, %v1344_v16  ;;  %v1345_v42 = vld [vmem:[#allocation6 + $0xd0] sm:$0xff] }
 0x35e   :  { %6318 = vpow2.f32 %v4139_v33  ;;  %v1346_v33 = vld [vmem:[#allocation6 + $0xd8] sm:$0xff] }
 0x35f   :  { %6320 = vpow2.f32 %v4140_v45  ;;  %v7082_v45 = vpack.c.bf16 %v1346_v33, %v1343_v31 }
 0x368   :  { %v6319_v53 = vpop.eup %6318 }
 0x369   :  { %v1060_v56 = vadd.f32 1.0, %v6319_v53  ;;  %v6321_v63 = vpop.eup %6320  ;;  %v1348_v53 = vld [vmem:[#allocation6 + $0xe8] sm:$0xff] }
 0x36a   :  { %v1067_v3 = vadd.f32 1.0, %v6321_v63  ;;  %v1350_v63 = vld [vmem:[#allocation6 + $0xf8] sm:$0xff] }
 0x36b   :  { %6322 = vrcp.f32 %v1060_v56  ;;  %v7085_v56 = vpack.c.bf16 %v1348_v53, %v1345_v42 }
 0x36c   :  { %6324 = vrcp.f32 %v1067_v3  ;;  %v1353_v3 = vld [vmem:[#allocation6 + $0x110] sm:$0xff] }
 0x375   :  { %v6323_v10 = vpop.eup %6322 }
 0x376   :  { %v1078_v14 = vmul.f32 %v6323_v10, %v1077_v8  ;;  %v6325_v21 = vpop.eup %6324  ;;  %v1349_v8 = vld [vmem:[#allocation6 + $0xf0] sm:$0xff]  ;;  %v7089_v10 = vpack.c.bf16 %v1353_v3, %v1350_v63 }
 0x377   :  { %v1081_v26 = vsub.f32 1.0, %v6325_v21  ;;  %v1083_v43 = vmul.f32 %v6325_v21, %v6996_v58  ;;  %v1354_v21 = vld [vmem:[#allocation6 + $0x118] sm:$0xff] }
 0x378   :  { %v1079_v19 = vadd.f32 %v1078_v14, %v6924_v50  ;;  %v1320_v50 = vld [vmem:[#allocation6 + $0x8] sm:$0xff] }
 0x379   :  { %v7052_v39 = vpack.c.bf16 %v1323_v1, %v1320_v50  ;;  %v1352_v14 = vld [vmem:[#allocation6 + $0x108] sm:$0xff]  ;;  %v1355_v50 = vld [vmem:[#allocation6 + $0x120] sm:$0xff] }
 0x37a   :  { %6326 = vtanh.f32 %v1079_v19  ;;  %v1351_v19 = vld [vmem:[#allocation6 + $0x100] sm:$0xff] }
 0x37b   :  { %5439 = vmatprep.subr.bf16.mxu0 %v7052_v39 }
 0x384   :  { %v6327_v29 = vpop.eup %6326 }
 0x385   :  { %v1082_v34 = vmul.f32 %v6327_v29, %v1081_v26  ;;  %v7092_v26 = vpack.c.bf16 %v1352_v14, %v1349_v8  ;;  %v7094_v29 = vpack.c.bf16 %v1354_v21, %v1351_v19 }
 0x387   :  { %v7039_v62 = vadd.f32 %v1083_v43, %v1082_v34  ;;  %v1356_v34 = vld [vmem:[#allocation6 + $0x128] sm:$0xff]  ;;  %v1359_v43 = vld [vmem:[#allocation6 + $0x140] sm:$0xff] }
 0x388   :  { %v7097_v1 = vpack.c.bf16 %v1359_v43, %v1356_v34 }
 0x389   :  { %1206 = vmatmul.mubr.f32.vlgmr.msra.gmra.mrb[6].mxu0 %v7039_v62  ;;  %4670 = vmatmul.mubr.f32.vlgmr.msra.gmra.mrb[14].mxu1 %v7039_v62 }
 0x38a   :  { %5472 = vmatpush3.bf16.msra.mxu1 %v6777_v40  ;;  %1431 = vmatprep.mubr.f32.mxu0 %v6583_v0  ;;  %v1319_v40 = vld [vmem:[#allocation6] sm:$0xff] }
 0x38b   :  { %5473 = vmatprep.subr.bf16.mxu1 %v6584_v48  ;;  %4704 = vmatprep.mubr.msk.f32.mxu1 %vm6585_vm1, %v6583_v0  ;;  %v7054_v6 = vpack.c.bf16 %v1322_v44, %v1319_v40  ;;  %v1358_v40 = vld [vmem:[#allocation6 + $0x138] sm:$0xff]  ;;  %v1357_v44 = vld [vmem:[#allocation6 + $0x130] sm:$0xff] }
 0x38d   :  { %5441 = vmatpush1.bf16.msra.mxu0 %v7054_v6 }
 0x38e   :  { %5475 = vmatpush3.bf16.msra.mxu1 %v6793_v51  ;;  %v1329_v51 = vld [vmem:[#allocation6 + $0x50] sm:$0xff] }
 0x38f   :  { %5476 = vmatprep.subr.bf16.mxu1 %v6584_v48  ;;  %v7058_v11 = vpack.c.bf16 %v1329_v51, %v1326_v7  ;;  %v1360_v7 = vld [vmem:[#allocation6 + $0x148] sm:$0xff]  ;;  %v7100_v51 = vpack.c.bf16 %v1358_v40, %v1355_v50 }
 0x390   :  { %v7104_v18 = vpack.c.bf16 %v1360_v7, %v1357_v44 }
 0x391   :  { %5443 = vmatprep.subr.bf16.mxu0 %v7058_v11 }
 0x392   :  { %5478 = vmatpush3.bf16.msra.mxu1 %v6809_v61  ;;  %v1328_v61 = vld [vmem:[#allocation6 + $0x48] sm:$0xff] }
 0x393   :  { %5479 = vmatprep.subr.bf16.mxu1 %v6584_v48  ;;  %v7060_v17 = vpack.c.bf16 %v1328_v61, %v1325_v13  ;;  %v1362_v13 = vld [vmem:[#allocation6 + $0x158] sm:$0xff]  ;;  %v1365_v61 = vld [vmem:[#allocation6 + $0x170] sm:$0xff] }
 0x394   :  { %v7106_v20 = vpack.c.bf16 %v1365_v61, %v1362_v13 }
 0x395   :  { %5445 = vmatpush1.bf16.msra.mxu0 %v7060_v17 }
 0x396   :  { %5447 = vmatprep.subr.bf16.mxu0 %v7064_v24  ;;  %5481 = vmatpush3.bf16.msra.mxu1 %v7075_v15 }
 0x397   :  { %5482 = vmatprep.subr.bf16.mxu1 %v6584_v48 }
 0x399   :  { %5449 = vmatpush1.bf16.msra.mxu0 %v7066_v12 }
 0x39a   :  { %5451 = vmatprep.subr.bf16.mxu0 %v7070_v35  ;;  %5484 = vmatpush3.bf16.msra.mxu1 %v7085_v56 }
 0x39b   :  { %5485 = vmatprep.subr.bf16.mxu1 %v6584_v48 }
 0x39d   :  { %5453 = vmatpush1.bf16.msra.mxu0 %v7072_v49 }
 0x39e   :  { %5455 = vmatprep.subr.bf16.mxu0 %v7079_v23  ;;  %5487 = vmatpush3.bf16.msra.mxu1 %v7094_v29 }
 0x39f   :  { %5488 = vmatprep.subr.bf16.mxu1 %v6584_v48 }
 0x3a1   :  { %5457 = vmatpush1.bf16.msra.mxu0 %v7082_v45 }
 0x3a2   :  { %5459 = vmatprep.subr.bf16.mxu0 %v7089_v10  ;;  %5490 = vmatpush3.bf16.msra.mxu1 %v7104_v18 }
 0x3a3   :  { %5491 = vmatprep.subr.bf16.mxu1 %v6584_v48 }
 0x3a5   :  { %5461 = vmatpush1.bf16.msra.mxu0 %v7092_v26 }
 0x3a6   :  { %5463 = vmatprep.subr.bf16.mxu0 %v7097_v1  ;;  %5493 = vmatpush3.bf16.msra.mxu1 %v7114_v41 }
 0x3a7   :  { %5526 = vmatprep.subr.bf16.mxu1 %v6584_v48 }
 0x3a9   :  { %5465 = vmatpush1.bf16.msra.mxu0 %v7100_v51 }
 0x3aa   :  { %5467 = vmatprep.subr.bf16.mxu0 %v7106_v20 }
 0x3ad   :  { %5469 = vmatpush1.bf16.msra.mxu0 %v7110_v38 }
 0x3ae   :  { %5495 = vmatprep.subr.bf16.mxu0 %v7052_v39 }
 0x45c   :  { %v1207_v46 = vpop.f32.mrb[6].mxu0  ;;  %v1278_v54 = vpop.f32.mrb[14].mxu1 }
 0x45d   :  { %v6228_v16 = vadd.f32 %v1207_v46, %v6932_v59  ;;  %v1209_v22 = vpop.f32.mrb[7].mxu0  ;;  %v4671_v31 = vpop.f32.mrb[15].mxu1  ;;  %v1303_v19 = vadd.f32 %v6949_v28, %v1278_v54  ;;  %v7153_v46 = vpack.c.bf16 %v1556_v32, %v1553_v30  ;;  %v1559_v54 = vld [vmem:[#allocation6 + $0x70] sm:$0xff] }
 0x45e   :  { %v6229_v42 = vadd.f32 %v1209_v22, %v6938_v2 }
 0x45f   :  { %v4142_v33 = vmul.f32 -1.442695, %v6228_v16  ;;  %v1562_v16 = vld [vmem:[#allocation6 + $0x88] sm:$0xff] }
 0x460   :  { %v4143_v53 = vmul.f32 -1.442695, %v6229_v42  ;;  %v7157_v22 = vpack.c.bf16 %v1562_v16, %v1559_v54 }
 0x461   :  { %6328 = vpow2.f32 %v4142_v33 }
 0x462   :  { %6330 = vpow2.f32 %v4143_v53 }
 0x46b   :  { %v6329_v63 = vpop.eup %6328 }
 0x46c   :  { %v1286_v3 = vadd.f32 1.0, %v6329_v63  ;;  %v6331_v8 = vpop.eup %6330 }
 0x46d   :  { %v1293_v14 = vadd.f32 1.0, %v6331_v8 }
 0x46e   :  { %6332 = vrcp.f32 %v1286_v3 }
 0x46f   :  { %6334 = vrcp.f32 %v1293_v14 }
 0x478   :  { %v6333_v21 = vpop.eup %6332 }
 0x479   :  { %v1304_v34 = vmul.f32 %v6333_v21, %v1303_v19  ;;  %v6335_v50 = vpop.eup %6334 }
 0x47a   :  { %v1307_v40 = vsub.f32 1.0, %v6335_v50  ;;  %v1309_v13 = vmul.f32 %v6335_v50, %v7039_v62 }
 0x47b   :  { %v1305_v43 = vadd.f32 %v1304_v34, %v6922_v47  ;;  %v1547_v47 = vld [vmem:[#allocation6 + $0x10] sm:$0xff] }
 0x47c   :  { %v7149_v27 = vpack.c.bf16 %v1550_v25, %v1547_v47 }
 0x47d   :  { %6336 = vtanh.f32 %v1305_v43 }
 0x487   :  { %v6337_v44 = vpop.eup %6336 }
 0x488   :  { %v1308_v7 = vmul.f32 %v6337_v44, %v1307_v40 }
 0x48a   :  { %v7126_v61 = vadd.f32 %v1309_v13, %v1308_v7 }
 0x48c   :  { %1432 = vmatmul.mubr.f32.vlgmr.msra.gmra.mrb[8].mxu0 %v7126_v61  ;;  %4705 = vmatmul.mubr.f32.vlgmr.msra.gmra.mrb[16].mxu1 %v7126_v61 }
 0x48d   :  { %5497 = vmatpush1.bf16.msra.mxu0 %v7054_v6  ;;  %1657 = vmatprep.mubr.f32.mxu0 %v6583_v0 }
 0x48e   :  { %5499 = vmatprep.subr.bf16.mxu0 %v7058_v11  ;;  %4739 = vmatprep.mubr.msk.f32.mxu1 %vm6585_vm1, %v6583_v0 }
 0x48f   :  { %5528 = vmatpush3.bf16.msra.mxu1 %v7149_v27 }
 0x490   :  { %5529 = vmatprep.subr.bf16.mxu1 %v6584_v48 }
 0x491   :  { %5501 = vmatpush1.bf16.msra.mxu0 %v7060_v17 }
 0x492   :  { %5503 = vmatprep.subr.bf16.mxu0 %v7064_v24 }
 0x493   :  { %5531 = vmatpush3.bf16.msra.mxu1 %v7153_v46 }
 0x494   :  { %5532 = vmatprep.subr.bf16.mxu1 %v6584_v48 }
 0x495   :  { %5505 = vmatpush1.bf16.msra.mxu0 %v7066_v12 }
 0x496   :  { %5507 = vmatprep.subr.bf16.mxu0 %v7070_v35 }
 0x497   :  { %5534 = vmatpush3.bf16.msra.mxu1 %v7157_v22 }
 0x498   :  { %5535 = vmatprep.subr.bf16.mxu1 %v6584_v48 }
 0x499   :  { %5509 = vmatpush1.bf16.msra.mxu0 %v7072_v49 }
 0x49a   :  { %5511 = vmatprep.subr.bf16.mxu0 %v7079_v23 }
 0x49b   :  { %5537 = vmatpush3.bf16.msra.mxu1 %v7075_v15 }
 0x49c   :  { %5538 = vmatprep.subr.bf16.mxu1 %v6584_v48 }
 0x49d   :  { %5513 = vmatpush1.bf16.msra.mxu0 %v7082_v45 }
 0x49e   :  { %5515 = vmatprep.subr.bf16.mxu0 %v7089_v10 }
 0x49f   :  { %5540 = vmatpush3.bf16.msra.mxu1 %v7085_v56 }
 0x4a0   :  { %5541 = vmatprep.subr.bf16.mxu1 %v6584_v48 }
 0x4a1   :  { %5517 = vmatpush1.bf16.msra.mxu0 %v7092_v26 }
 0x4a2   :  { %5519 = vmatprep.subr.bf16.mxu0 %v7097_v1 }
 0x4a3   :  { %5543 = vmatpush3.bf16.msra.mxu1 %v7094_v29 }
 0x4a4   :  { %5544 = vmatprep.subr.bf16.mxu1 %v6584_v48 }
 0x4a5   :  { %5521 = vmatpush1.bf16.msra.mxu0 %v7100_v51 }
 0x4a6   :  { %5523 = vmatprep.subr.bf16.mxu0 %v7106_v20 }
 0x4a7   :  { %5546 = vmatpush3.bf16.msra.mxu1 %v7104_v18 }
 0x4a8   :  { %5547 = vmatprep.subr.bf16.mxu1 %v6584_v48 }
 0x4a9   :  { %5525 = vmatpush1.bf16.msra.mxu0 %v7110_v38 }
 0x4aa   :  { %5551 = vmatprep.subr.bf16.mxu0 %v7052_v39 }
 0x4ab   :  { %5549 = vmatpush3.bf16.msra.mxu1 %v7114_v41 }
 0x4ac   :  { %5582 = vmatprep.subr.bf16.mxu1 %v6584_v48 }
 0x55f   :  { %v1433_v31 = vpop.f32.mrb[8].mxu0  ;;  %v1504_v33 = vpop.f32.mrb[16].mxu1 }
 0x560   :  { %v6230_v42 = vadd.f32 %v1433_v31, %v6932_v59  ;;  %v1435_v53 = vpop.f32.mrb[9].mxu0  ;;  %v4706_v63 = vpop.f32.mrb[17].mxu1  ;;  %v1529_v50 = vadd.f32 %v6949_v28, %v1504_v33 }
 0x561   :  { %v6231_v8 = vadd.f32 %v1435_v53, %v6938_v2 }
 0x562   :  { %v4145_v3 = vmul.f32 -1.442695, %v6230_v42 }
 0x563   :  { %v4146_v14 = vmul.f32 -1.442695, %v6231_v8 }
 0x564   :  { %6338 = vpow2.f32 %v4145_v3 }
 0x565   :  { %6340 = vpow2.f32 %v4146_v14 }
 0x56e   :  { %v6339_v19 = vpop.eup %6338 }
 0x56f   :  { %v1512_v21 = vadd.f32 1.0, %v6339_v19  ;;  %v6341_v34 = vpop.eup %6340 }
 0x570   :  { %v1519_v43 = vadd.f32 1.0, %v6341_v34 }
 0x571   :  { %6342 = vrcp.f32 %v1512_v21 }
 0x572   :  { %6344 = vrcp.f32 %v1519_v43 }
 0x57b   :  { %v6343_v40 = vpop.eup %6342 }
 0x57c   :  { %v1530_v44 = vmul.f32 %v6343_v40, %v1529_v50  ;;  %v6345_v13 = vpop.eup %6344 }
 0x57d   :  { %v1533_v47 = vsub.f32 1.0, %v6345_v13  ;;  %v1535_v32 = vmul.f32 %v6345_v13, %v7126_v61 }
 0x57e   :  { %v1531_v7 = vadd.f32 %v1530_v44, %v6934_v60 }
 0x580   :  { %6346 = vtanh.f32 %v1531_v7 }
 0x58a   :  { %v6347_v25 = vpop.eup %6346 }
 0x58b   :  { %v1534_v30 = vmul.f32 %v6347_v25, %v1533_v47 }
 0x58d   :  { %v7176_v54 = vadd.f32 %v1535_v32, %v1534_v30  ;;  %v2225_v30 = vld [vmem:[#allocation8] sm:$0xff]  ;;  %v2228_v32 = vld [vmem:[#allocation8 + $0x18] sm:$0xff] }
 0x58f   :  { %1658 = vmatmul.mubr.f32.vlgmr.msra.gmra.mrb[10].mxu0 %v7176_v54  ;;  %4740 = vmatmul.mubr.f32.vlgmr.msra.gmra.mrb[18].mxu1 %v7176_v54 }
 0x590   :  { %5553 = vmatpush1.bf16.msra.mxu0 %v7054_v6  ;;  %5584 = vmatpush3.bf16.msra.mxu1 %v7149_v27 }
 0x591   :  { %5555 = vmatprep.subr.bf16.mxu0 %v7058_v11  ;;  %5585 = vmatprep.subr.bf16.mxu1 %v6584_v48 }
 0x592   :  { %1883 = vmatprep.mubr.f32.mxu0 %v6583_v0  ;;  %4774 = vmatprep.mubr.msk.f32.mxu1 %vm6585_vm1, %v6583_v0 }
 0x594   :  { %5557 = vmatpush1.bf16.msra.mxu0 %v7060_v17  ;;  %5587 = vmatpush3.bf16.msra.mxu1 %v7153_v46 }
 0x595   :  { %5559 = vmatprep.subr.bf16.mxu0 %v7064_v24  ;;  %5588 = vmatprep.subr.bf16.mxu1 %v6584_v48 }
 0x598   :  { %5561 = vmatpush1.bf16.msra.mxu0 %v7066_v12  ;;  %5590 = vmatpush3.bf16.msra.mxu1 %v7157_v22 }
 0x599   :  { %5563 = vmatprep.subr.bf16.mxu0 %v7070_v35  ;;  %5591 = vmatprep.subr.bf16.mxu1 %v6584_v48 }
 0x59c   :  { %5565 = vmatpush1.bf16.msra.mxu0 %v7072_v49  ;;  %5593 = vmatpush3.bf16.msra.mxu1 %v7075_v15 }
 0x59d   :  { %5567 = vmatprep.subr.bf16.mxu0 %v7079_v23  ;;  %5594 = vmatprep.subr.bf16.mxu1 %v6584_v48 }
 0x5a0   :  { %5569 = vmatpush1.bf16.msra.mxu0 %v7082_v45  ;;  %5596 = vmatpush3.bf16.msra.mxu1 %v7085_v56 }
 0x5a1   :  { %5571 = vmatprep.subr.bf16.mxu0 %v7089_v10  ;;  %5597 = vmatprep.subr.bf16.mxu1 %v6584_v48 }
 0x5a4   :  { %5573 = vmatpush1.bf16.msra.mxu0 %v7092_v26  ;;  %5599 = vmatpush3.bf16.msra.mxu1 %v7094_v29 }
 0x5a5   :  { %5575 = vmatprep.subr.bf16.mxu0 %v7097_v1  ;;  %5600 = vmatprep.subr.bf16.mxu1 %v6584_v48 }
 0x5a8   :  { %5577 = vmatpush1.bf16.msra.mxu0 %v7100_v51  ;;  %5602 = vmatpush3.bf16.msra.mxu1 %v7104_v18 }
 0x5a9   :  { %5579 = vmatprep.subr.bf16.mxu0 %v7106_v20  ;;  %5603 = vmatprep.subr.bf16.mxu1 %v6584_v48 }
 0x5ac   :  { %5581 = vmatpush1.bf16.msra.mxu0 %v7110_v38  ;;  %5605 = vmatpush3.bf16.msra.mxu1 %v7114_v41 }
 0x5ad   :  { %5607 = vmatprep.subr.bf16.mxu0 %v7052_v39  ;;  %5638 = vmatprep.subr.bf16.mxu1 %v6584_v48  ;;  %v7220_v39 = vld [vmem:[%s7820_s4] ss:$0 sm:$0xff] }
 0x662   :  { %v1659_v60 = vpop.f32.mrb[10].mxu0  ;;  %v1730_v28 = vpop.f32.mrb[18].mxu1 }
 0x663   :  { %v6232_v16 = vadd.f32 %v1659_v60, %v6932_v59  ;;  %v1661_v31 = vpop.f32.mrb[11].mxu0  ;;  %v4741_v33 = vpop.f32.mrb[19].mxu1  ;;  %v1755_v21 = vadd.f32 %v7220_v39, %v1730_v28  ;;  %v2232_v28 = vld [vmem:[#allocation8 + $0x38] sm:$0xff] }
 0x664   :  { %v6233_v53 = vadd.f32 %v1661_v31, %v6938_v2 }
 0x665   :  { %v4148_v42 = vmul.f32 -1.442695, %v6232_v16  ;;  %v2235_v16 = vld [vmem:[#allocation8 + $0x50] sm:$0xff] }
 0x666   :  { %v4149_v63 = vmul.f32 -1.442695, %v6233_v53  ;;  %v2236_v53 = vld [vmem:[#allocation8 + $0x58] sm:$0xff] }
 0x667   :  { %6348 = vpow2.f32 %v4148_v42  ;;  %v2233_v42 = vld [vmem:[#allocation8 + $0x40] sm:$0xff] }
 0x668   :  { %6350 = vpow2.f32 %v4149_v63  ;;  %v5664_v63 = vpack.c.bf16 %v2228_v32, %v2225_v30  ;;  %v2255_v32 = vld [vmem:[#allocation8 + $0xf0] sm:$0xff] }
 0x671   :  { %v6349_v3 = vpop.eup %6348 }
 0x672   :  { %v1738_v8 = vadd.f32 1.0, %v6349_v3  ;;  %v6351_v14 = vpop.eup %6350 }
 0x673   :  { %v1745_v19 = vadd.f32 1.0, %v6351_v14  ;;  %v2231_v14 = vld [vmem:[#allocation8 + $0x30] sm:$0xff] }
 0x674   :  { %6352 = vrcp.f32 %v1738_v8  ;;  %v5666_v8 = vpack.c.bf16 %v2235_v16, %v2232_v28  ;;  %v2262_v28 = vld [vmem:[#allocation8 + $0x128] sm:$0xff]  ;;  %v2265_v16 = vld [vmem:[#allocation8 + $0x140] sm:$0xff] }
 0x675   :  { %6354 = vrcp.f32 %v1745_v19  ;;  %v2234_v19 = vld [vmem:[#allocation8 + $0x48] sm:$0xff] }
 0x67e   :  { %v6353_v34 = vpop.eup %6352 }
 0x67f   :  { %v1756_v43 = vmul.f32 %v6353_v34, %v1755_v21  ;;  %v6355_v40 = vpop.eup %6354  ;;  %v5698_v21 = vpack.c.bf16 %v2236_v53, %v2233_v42  ;;  %v2241_v34 = vld [vmem:[#allocation8 + $0x80] sm:$0xff]  ;;  %v5686_v53 = vpack.c.bf16 %v2265_v16, %v2262_v28  ;;  %v2568_v28 = vld [vmem:[#allocation9 + $0x108] sm:$0xff] }
 0x680   :  { %v1759_v44 = vsub.f32 1.0, %v6355_v40  ;;  %v1761_v47 = vmul.f32 %v6355_v40, %v7176_v54  ;;  %v5668_v40 = vpack.c.bf16 %v2234_v19, %v2231_v14  ;;  %v2264_v14 = vld [vmem:[#allocation8 + $0x138] sm:$0xff] }
 0x681   :  { %v1757_v50 = vadd.f32 %v1756_v43, %v6928_v57  ;;  %v2226_v57 = vld [vmem:[#allocation8 + $0x8] sm:$0xff]  ;;  %v2239_v43 = vld [vmem:[#allocation8 + $0x70] sm:$0xff]  ;;  %v2268_v19 = vld [vmem:[#allocation8 + $0x158] sm:$0xff] }
 0x683   :  { %6356 = vtanh.f32 %v1757_v50  ;;  %v2242_v50 = vld [vmem:[#allocation8 + $0x88] sm:$0xff] }
 0x68d   :  { %v6357_v7 = vpop.eup %6356 }
 0x68e   :  { %v1760_v13 = vmul.f32 %v6357_v7, %v1759_v44  ;;  %v5702_v7 = vpack.c.bf16 %v2242_v50, %v2239_v43 }
 0x690   :  { %v7225_v25 = vadd.f32 %v1761_v47, %v1760_v13  ;;  %v2237_v13 = vld [vmem:[#allocation8 + $0x60] sm:$0xff]  ;;  %v2240_v47 = vld [vmem:[#allocation8 + $0x78] sm:$0xff] }
 0x692   :  { %1884 = vmatmul.mubr.f32.vlgmr.msra.gmra.mrb[12].mxu0 %v7225_v25  ;;  %4775 = vmatmul.mubr.f32.vlgmr.msra.gmra.mrb[20].mxu1 %v7225_v25 }
 0x693   :  { %5609 = vmatpush1.bf16.msra.mxu0 %v7054_v6  ;;  %5640 = vmatpush3.bf16.msra.mxu1 %v7149_v27  ;;  %v2229_v6 = vld [vmem:[#allocation8 + $0x20] sm:$0xff] }
 0x694   :  { %5611 = vmatprep.subr.bf16.mxu0 %v7058_v11  ;;  %5641 = vmatprep.subr.bf16.mxu1 %v6584_v48  ;;  %v2227_v11 = vld [vmem:[#allocation8 + $0x10] sm:$0xff] }
 0x695   :  { %2109 = vmatprep.mubr.f32.mxu0 %v6583_v0  ;;  %4809 = vmatprep.mubr.msk.f32.mxu1 %vm6585_vm1, %v6583_v0 }
 0x697   :  { %5613 = vmatpush1.bf16.msra.mxu0 %v7060_v17  ;;  %5643 = vmatpush3.bf16.msra.mxu1 %v7153_v46  ;;  %v5662_v17 = vpack.c.bf16 %v2229_v6, %v2226_v57  ;;  %v2244_v57 = vld [vmem:[#allocation8 + $0x98] sm:$0xff]  ;;  %v2247_v6 = vld [vmem:[#allocation8 + $0xb0] sm:$0xff] }
 0x698   :  { %5615 = vmatprep.subr.bf16.mxu0 %v7064_v24  ;;  %5644 = vmatprep.subr.bf16.mxu1 %v6584_v48  ;;  %v2230_v24 = vld [vmem:[#allocation8 + $0x28] sm:$0xff] }
 0x69b   :  { %5617 = vmatpush1.bf16.msra.mxu0 %v7066_v12  ;;  %5646 = vmatpush3.bf16.msra.mxu1 %v7157_v22  ;;  %v5694_v12 = vpack.c.bf16 %v2230_v24, %v2227_v11  ;;  %v2245_v11 = vld [vmem:[#allocation8 + $0xa0] sm:$0xff]  ;;  %v5672_v24 = vpack.c.bf16 %v2240_v47, %v2237_v13 }
 0x69c   :  { %5619 = vmatprep.subr.bf16.mxu0 %v7070_v35  ;;  %5647 = vmatprep.subr.bf16.mxu1 %v6584_v48  ;;  %v2535_v47 = vld [vmem:[#allocation9] sm:$0xff] }
 0x69f   :  { %5621 = vmatpush1.bf16.msra.mxu0 %v7072_v49  ;;  %5649 = vmatpush3.bf16.msra.mxu1 %v7075_v15 }
 0x6a0   :  { %5623 = vmatprep.subr.bf16.mxu0 %v7079_v23  ;;  %5650 = vmatprep.subr.bf16.mxu1 %v6584_v48 }
 0x6a3   :  { %5625 = vmatpush1.bf16.msra.mxu0 %v7082_v45  ;;  %5652 = vmatpush3.bf16.msra.mxu1 %v7085_v56 }
 0x6a4   :  { %5627 = vmatprep.subr.bf16.mxu0 %v7089_v10  ;;  %5653 = vmatprep.subr.bf16.mxu1 %v6584_v48 }
 0x6a7   :  { %5629 = vmatpush1.bf16.msra.mxu0 %v7092_v26  ;;  %5655 = vmatpush3.bf16.msra.mxu1 %v7094_v29 }
 0x6a8   :  { %5631 = vmatprep.subr.bf16.mxu0 %v7097_v1  ;;  %5656 = vmatprep.subr.bf16.mxu1 %v6584_v48 }
 0x6ab   :  { %5633 = vmatpush1.bf16.msra.mxu0 %v7100_v51  ;;  %5658 = vmatpush3.bf16.msra.mxu1 %v7104_v18 }
 0x6ac   :  { %5635 = vmatprep.subr.bf16.mxu0 %v7106_v20  ;;  %5659 = vmatprep.subr.bf16.mxu1 %v6584_v48 }
 0x6af   :  { %5637 = vmatpush1.bf16.msra.mxu0 %v7110_v38  ;;  %5661 = vmatpush3.bf16.msra.mxu1 %v7114_v41 }
 0x6b0   :  { %5663 = vmatprep.subr.bf16.mxu0 %v5662_v17  ;;  %5695 = vmatprep.subr.bf16.mxu1 %v5694_v12  ;;  %v2248_v17 = vld [vmem:[#allocation8 + $0xb8] sm:$0xff] }
 0x765   :  { %v1885_v35 = vpop.f32.mrb[12].mxu0  ;;  %v1956_v49 = vpop.f32.mrb[20].mxu1 }
 0x766   :  { %v6234_v15 = vadd.f32 %v1885_v35, %v6932_v59  ;;  %v1887_v23 = vpop.f32.mrb[13].mxu0  ;;  %v4776_v45 = vpop.f32.mrb[21].mxu1  ;;  %v1981_v20 = vadd.f32 %v7220_v39, %v1956_v49  ;;  %v5706_v35 = vpack.c.bf16 %v2248_v17, %v2245_v11  ;;  %v2243_v49 = vld [vmem:[#allocation8 + $0x90] sm:$0xff]  ;;  %v2544_v17 = vld [vmem:[#allocation9 + $0x48] sm:$0xff] }
 0x767   :  { %v6235_v10 = vadd.f32 %v1887_v23, %v6938_v2  ;;  %v2250_v23 = vld [vmem:[#allocation8 + $0xc8] sm:$0xff]  ;;  %v2253_v45 = vld [vmem:[#allocation8 + $0xe0] sm:$0xff]  ;;  %v2541_v11 = vld [vmem:[#allocation9 + $0x30] sm:$0xff] }
 0x768   :  { %v4151_v56 = vmul.f32 -1.442695, %v6234_v15  ;;  %v2246_v15 = vld [vmem:[#allocation8 + $0xa8] sm:$0xff] }
 0x769   :  { %v4152_v26 = vmul.f32 -1.442695, %v6235_v10  ;;  %v2254_v10 = vld [vmem:[#allocation8 + $0xe8] sm:$0xff] }
 0x76a   :  { %6358 = vpow2.f32 %v4151_v56  ;;  %v2251_v56 = vld [vmem:[#allocation8 + $0xd0] sm:$0xff] }
 0x76b   :  { %6360 = vpow2.f32 %v4152_v26  ;;  %v5676_v26 = vpack.c.bf16 %v2246_v15, %v2243_v49  ;;  %v2547_v15 = vld [vmem:[#allocation9 + $0x60] sm:$0xff] }
 0x774   :  { %v6359_v29 = vpop.eup %6358 }
 0x775   :  { %v1964_v1 = vadd.f32 1.0, %v6359_v29  ;;  %v6361_v51 = vpop.eup %6360  ;;  %v5678_v29 = vpack.c.bf16 %v2253_v45, %v2250_v23  ;;  %v2550_v23 = vld [vmem:[#allocation9 + $0x78] sm:$0xff] }
 0x776   :  { %v1971_v18 = vadd.f32 1.0, %v6361_v51  ;;  %v2249_v51 = vld [vmem:[#allocation8 + $0xc0] sm:$0xff]  ;;  %v7308_v45 = vpack.c.bf16 %v2550_v23, %v2547_v15  ;;  %v2570_v23 = vld [vmem:[#allocation9 + $0x118] sm:$0xff] }
 0x777   :  { %6362 = vrcp.f32 %v1964_v1  ;;  %v5710_v1 = vpack.c.bf16 %v2254_v10, %v2251_v56  ;;  %v2554_v56 = vld [vmem:[#allocation9 + $0x98] sm:$0xff]  ;;  %v2557_v10 = vld [vmem:[#allocation9 + $0xb0] sm:$0xff]  ;;  %v2567_v15 = vld [vmem:[#allocation9 + $0x100] sm:$0xff] }
 0x778   :  { %6364 = vrcp.f32 %v1971_v18  ;;  %v2252_v18 = vld [vmem:[#allocation8 + $0xd8] sm:$0xff] }
 0x781   :  { %v6363_v38 = vpop.eup %6362 }
 0x782   :  { %v1982_v41 = vmul.f32 %v6363_v38, %v1981_v20  ;;  %v6365_v46 = vpop.eup %6364  ;;  %v2256_v20 = vld [vmem:[#allocation8 + $0xf8] sm:$0xff]  ;;  %v2259_v38 = vld [vmem:[#allocation8 + $0x110] sm:$0xff] }
 0x783   :  { %v1985_v22 = vsub.f32 1.0, %v6365_v46  ;;  %v1987_v33 = vmul.f32 %v6365_v46, %v7225_v25  ;;  %v5680_v46 = vpack.c.bf16 %v2252_v18, %v2249_v51  ;;  %v2560_v18 = vld [vmem:[#allocation9 + $0xc8] sm:$0xff] }
 0x784   :  { %v1983_v27 = vadd.f32 %v1982_v41, %v6943_v9  ;;  %v2238_v9 = vld [vmem:[#allocation8 + $0x68] sm:$0xff]  ;;  %v2257_v41 = vld [vmem:[#allocation8 + $0x100] sm:$0xff] }
 0x785   :  { %v5670_v44 = vpack.c.bf16 %v2241_v34, %v2238_v9  ;;  %v2271_v9 = vld [vmem:[#allocation8 + $0x170] sm:$0xff]  ;;  %v2272_v34 = vld [vmem:[#allocation8 + $0x178] sm:$0xff] }
 0x786   :  { %6366 = vtanh.f32 %v1983_v27  ;;  %v2260_v27 = vld [vmem:[#allocation8 + $0x118] sm:$0xff]  ;;  %v5690_v50 = vpack.c.bf16 %v2271_v9, %v2268_v19 }
 0x787   :  { %v5714_v30 = vpack.c.bf16 %v2260_v27, %v2257_v41  ;;  %v2559_v41 = vld [vmem:[#allocation9 + $0xc0] sm:$0xff]  ;;  %v2562_v27 = vld [vmem:[#allocation9 + $0xd8] sm:$0xff] }
 0x790   :  { %v6367_v60 = vpop.eup %6366 }
 0x791   :  { %v1986_v31 = vmul.f32 %v6367_v60, %v1985_v22  ;;  %v5682_v22 = vpack.c.bf16 %v2259_v38, %v2256_v20  ;;  %v2258_v60 = vld [vmem:[#allocation8 + $0x108] sm:$0xff]  ;;  %v2563_v20 = vld [vmem:[#allocation9 + $0xe0] sm:$0xff] }
 0x792   :  { %v5684_v42 = vpack.c.bf16 %v2258_v60, %v2255_v32  ;;  %v7318_v38 = vpack.c.bf16 %v2563_v20, %v2560_v18  ;;  %v2565_v60 = vld [vmem:[#allocation9 + $0xf0] sm:$0xff]  ;;  %v2579_v18 = vld [vmem:[#allocation9 + $0x160] sm:$0xff]  ;;  %v2582_v20 = vld [vmem:[#allocation9 + $0x178] sm:$0xff] }
 0x793   :  { %v7267_v3 = vadd.f32 %v1987_v33, %v1986_v31  ;;  %v2263_v31 = vld [vmem:[#allocation8 + $0x130] sm:$0xff]  ;;  %v2266_v33 = vld [vmem:[#allocation8 + $0x148] sm:$0xff]  ;;  %v7326_v16 = vpack.c.bf16 %v2568_v28, %v2565_v60 }
 0x795   :  { %2110 = vmatmul.mubr.f32.vlgmr.msra.gmra.mrb[14].mxu0 %v7267_v3  ;;  %4810 = vmatmul.mubr.f32.vlgmr.msra.gmra.mrb[22].mxu1 %v7267_v3 }
 0x796   :  { %5665 = vmatpush1.bf16.msra.mxu0 %v5664_v63  ;;  %5697 = vmatpush3.bf16.msra.mxu1 %v5694_v12  ;;  %v5674_v12 = vpack.c.bf16 %v2247_v6, %v2244_v57  ;;  %v5718_v63 = vpack.c.bf16 %v2266_v33, %v2263_v31  ;;  %v2572_v31 = vld [vmem:[#allocation9 + $0x128] sm:$0xff]  ;;  %v2575_v33 = vld [vmem:[#allocation9 + $0x140] sm:$0xff] }
 0x797   :  { %4844 = vmatprep.mubr.f32.mxu1 %v6952_v5  ;;  %5667 = vmatprep.subr.bf16.mxu0 %v5666_v8  ;;  %v2261_v8 = vld [vmem:[#allocation8 + $0x120] sm:$0xff] }
 0x798   :  { %5699 = vmatprep.subr.bf16.mxu1 %v5698_v21  ;;  %2354 = vmatprep.mubr.f32.mxu0 %v6583_v0  ;;  %v5688_v43 = vpack.c.bf16 %v2264_v14, %v2261_v8  ;;  %v2537_v8 = vld [vmem:[#allocation9 + $0x10] sm:$0xff]  ;;  %v2540_v14 = vld [vmem:[#allocation9 + $0x28] sm:$0xff] }
 0x799   :  { %v7334_v9 = vpack.c.bf16 %v2540_v14, %v2537_v8 }
 0x79a   :  { %5669 = vmatpush1.bf16.msra.mxu0 %v5668_v40  ;;  %5701 = vmatpush3.bf16.msra.mxu1 %v5698_v21  ;;  %v2269_v21 = vld [vmem:[#allocation8 + $0x160] sm:$0xff] }
 0x79b   :  { %5671 = vmatprep.subr.bf16.mxu0 %v5670_v44  ;;  %5703 = vmatprep.subr.bf16.mxu1 %v5702_v7  ;;  %v5722_v40 = vpack.c.bf16 %v2272_v34, %v2269_v21  ;;  %v2267_v44 = vld [vmem:[#allocation8 + $0x150] sm:$0xff]  ;;  %v2578_v21 = vld [vmem:[#allocation9 + $0x158] sm:$0xff] }
 0x79c   :  { %v2581_v34 = vld [vmem:[#allocation9 + $0x170] sm:$0xff] }
 0x79e   :  { %5673 = vmatpush1.bf16.msra.mxu0 %v5672_v24  ;;  %5705 = vmatpush3.bf16.msra.mxu1 %v5702_v7  ;;  %v2270_v7 = vld [vmem:[#allocation8 + $0x168] sm:$0xff]  ;;  %v7302_v24 = vpack.c.bf16 %v2544_v17, %v2541_v11  ;;  %v2561_v17 = vld [vmem:[#allocation9 + $0xd0] sm:$0xff] }
 0x79f   :  { %5675 = vmatprep.subr.bf16.mxu0 %v5674_v12  ;;  %5707 = vmatprep.subr.bf16.mxu1 %v5706_v35  ;;  %v5692_v13 = vpack.c.bf16 %v2270_v7, %v2267_v44  ;;  %v2548_v12 = vld [vmem:[#allocation9 + $0x68] sm:$0xff]  ;;  %v2543_v7 = vld [vmem:[#allocation9 + $0x40] sm:$0xff] }
 0x7a2   :  { %5677 = vmatpush1.bf16.msra.mxu0 %v5676_v26  ;;  %5709 = vmatpush3.bf16.msra.mxu1 %v5706_v35  ;;  %v2551_v35 = vld [vmem:[#allocation9 + $0x80] sm:$0xff]  ;;  %v7312_v26 = vpack.c.bf16 %v2557_v10, %v2554_v56  ;;  %v7362_v56 = vpack.c.bf16 %v2570_v23, %v2567_v15  ;;  %v2573_v10 = vld [vmem:[#allocation9 + $0x130] sm:$0xff] }
 0x7a3   :  { %5679 = vmatprep.subr.bf16.mxu0 %v5678_v29  ;;  %5711 = vmatprep.subr.bf16.mxu1 %v5710_v1  ;;  %v7306_v49 = vpack.c.bf16 %v2551_v35, %v2548_v12  ;;  %v2553_v29 = vld [vmem:[#allocation9 + $0x90] sm:$0xff]  ;;  %v2564_v12 = vld [vmem:[#allocation9 + $0xe8] sm:$0xff] }
 0x7a4   :  { %v7358_v35 = vpack.c.bf16 %v2564_v12, %v2561_v17 }
 0x7a6   :  { %5681 = vmatpush1.bf16.msra.mxu0 %v5680_v46  ;;  %5713 = vmatpush3.bf16.msra.mxu1 %v5710_v1  ;;  %v2556_v1 = vld [vmem:[#allocation9 + $0xa8] sm:$0xff]  ;;  %v7320_v46 = vpack.c.bf16 %v2562_v27, %v2559_v41  ;;  %v7370_v41 = vpack.c.bf16 %v2582_v20, %v2579_v18 }
 0x7a7   :  { %5683 = vmatprep.subr.bf16.mxu0 %v5682_v22  ;;  %5715 = vmatprep.subr.bf16.mxu1 %v5714_v30  ;;  %v7314_v51 = vpack.c.bf16 %v2556_v1, %v2553_v29  ;;  %v2566_v22 = vld [vmem:[#allocation9 + $0xf8] sm:$0xff]  ;;  %v2576_v29 = vld [vmem:[#allocation9 + $0x148] sm:$0xff] }
 0x7a8   :  { %v7366_v1 = vpack.c.bf16 %v2576_v29, %v2573_v10 }
 0x7aa   :  { %5685 = vmatpush1.bf16.msra.mxu0 %v5684_v42  ;;  %5717 = vmatpush3.bf16.msra.mxu1 %v5714_v30  ;;  %v2569_v30 = vld [vmem:[#allocation9 + $0x110] sm:$0xff]  ;;  %v2571_v42 = vld [vmem:[#allocation9 + $0x120] sm:$0xff] }
 0x7ab   :  { %5687 = vmatprep.subr.bf16.mxu0 %v5686_v53  ;;  %5719 = vmatprep.subr.bf16.mxu1 %v5718_v63  ;;  %v7324_v32 = vpack.c.bf16 %v2569_v30, %v2566_v22  ;;  %v7330_v53 = vpack.c.bf16 %v2575_v33, %v2572_v31 }
 0x7ae   :  { %5689 = vmatpush1.bf16.msra.mxu0 %v5688_v43  ;;  %5721 = vmatpush3.bf16.msra.mxu1 %v5718_v63  ;;  %v2574_v63 = vld [vmem:[#allocation9 + $0x138] sm:$0xff]  ;;  %v7339_v43 = vpack.c.bf16 %v2581_v34, %v2578_v21 }
 0x7af   :  { %5691 = vmatprep.subr.bf16.mxu0 %v5690_v50  ;;  %5723 = vmatprep.subr.bf16.mxu1 %v5722_v40  ;;  %v7332_v19 = vpack.c.bf16 %v2574_v63, %v2571_v42  ;;  %v2577_v50 = vld [vmem:[#allocation9 + $0x150] sm:$0xff] }
 0x7b2   :  { %5693 = vmatpush1.bf16.msra.mxu0 %v5692_v13  ;;  %5725 = vmatpush3.bf16.msra.mxu1 %v5722_v40  ;;  %v2580_v40 = vld [vmem:[#allocation9 + $0x168] sm:$0xff]  ;;  %v2546_v13 = vld [vmem:[#allocation9 + $0x58] sm:$0xff] }
 0x7b3   :  { %5758 = vmatprep.subr.bf16.mxu1 %v6584_v48  ;;  %v7342_v44 = vpack.c.bf16 %v2580_v40, %v2577_v50 }
 0x7b5   :  { %2355 = vmatmul.mubr.f32.vlgmr.msra.gmra.mrb[16].mxu0 %v6952_v5  ;;  %4845 = vmatmul.mubr.f32.vlgmr.msra.gmra.mrb[24].mxu1 %v6996_v58  ;;  %v2536_v5 = vld [vmem:[#allocation9 + $0x8] sm:$0xff] }
 0x7b6   :  { %4847 = vmatprep.mubr.f32.mxu1 %v7039_v62  ;;  %2360 = vmatprep.mubr.f32.mxu0 %v6583_v0 }
 0x7b7   :  { %5760 = vmatpush3.bf16.msra.mxu1 %v7334_v9 }
 0x7b8   :  { %5761 = vmatprep.subr.bf16.mxu1 %v6584_v48 }
 0x7b9   :  { %2361 = vmatmul.mubr.f32.gmra.mrb[18].mxu0 %v6996_v58  ;;  %4848 = vmatmul.mubr.f32.gmra.mrb[26].mxu1 %v7126_v61  ;;  %v2539_v58 = vld [vmem:[#allocation9 + $0x20] sm:$0xff] }
 0x7ba   :  { %4850 = vmatprep.mubr.f32.mxu1 %v7176_v54  ;;  %2366 = vmatprep.mubr.f32.mxu0 %v6583_v0 }
 0x7bd   :  { %2367 = vmatmul.mubr.f32.gmra.mrb[20].mxu0 %v7039_v62  ;;  %4851 = vmatmul.mubr.f32.gmra.mrb[28].mxu1 %v7225_v25  ;;  %v7294_v62 = vpack.c.bf16 %v2539_v58, %v2536_v5  ;;  %v7345_v5 = vpack.c.bf16 %v2546_v13, %v2543_v7  ;;  %v2549_v58 = vld [vmem:[#allocation9 + $0x70] sm:$0xff] }
 0x7be   :  { %4853 = vmatprep.mubr.f32.mxu1 %v7267_v3  ;;  %2372 = vmatprep.mubr.f32.mxu0 %v6583_v0 }
 0x7bf   :  { %5727 = vmatprep.subr.bf16.mxu0 %v7294_v62  ;;  %5763 = vmatpush3.bf16.msra.mxu1 %v7345_v5 }
 0x7c0   :  { %5764 = vmatprep.subr.bf16.mxu1 %v6584_v48 }
 0x7c1   :  { %2373 = vmatmul.mubr.f32.gmra.mrb[22].mxu0 %v7126_v61  ;;  %v2538_v61 = vld [vmem:[#allocation9 + $0x18] sm:$0xff] }
 0x7c2   :  { %2378 = vmatprep.mubr.f32.mxu0 %v6583_v0  ;;  %v7296_v57 = vpack.c.bf16 %v2538_v61, %v2535_v47  ;;  %v2552_v47 = vld [vmem:[#allocation9 + $0x88] sm:$0xff]  ;;  %v2555_v61 = vld [vmem:[#allocation9 + $0xa0] sm:$0xff] }
 0x7c4   :  { %5729 = vmatpush1.bf16.msra.mxu0 %v7296_v57 }
 0x7c5   :  { %2379 = vmatmul.mubr.f32.gmra.mrb[24].mxu0 %v7176_v54  ;;  %v2542_v54 = vld [vmem:[#allocation9 + $0x38] sm:$0xff] }
 0x7c6   :  { %2384 = vmatprep.mubr.f32.mxu0 %v6583_v0 }
 0x7c9   :  { %2385 = vmatmul.mubr.f32.gmra.mrb[26].mxu0 %v7225_v25  ;;  %v2545_v25 = vld [vmem:[#allocation9 + $0x50] sm:$0xff] }
 0x7ca   :  { %2390 = vmatprep.mubr.f32.mxu0 %v6583_v0  ;;  %v7300_v6 = vpack.c.bf16 %v2545_v25, %v2542_v54  ;;  %v7351_v54 = vpack.c.bf16 %v2552_v47, %v2549_v58  ;;  %v2558_v25 = vld [vmem:[#allocation9 + $0xb8] sm:$0xff] }
 0x7cb   :  { %v7354_v11 = vpack.c.bf16 %v2558_v25, %v2555_v61 }
 0x7cc   :  { %5731 = vmatprep.subr.bf16.mxu0 %v7300_v6  ;;  %5766 = vmatpush3.bf16.msra.mxu1 %v7351_v54 }
 0x7cd   :  { %2391 = vmatmul.mubr.f32.gmra.mrb[28].mxu0 %v7267_v3  ;;  %5767 = vmatprep.subr.bf16.mxu1 %v6584_v48 }
 0x7ce   :  { %2396 = vmatprep.mubr.f32.mxu0 %v6583_v0  ;;  %5733 = vmatpush1.bf16.msra.mxu0 %v7302_v24 }
 0x7cf   :  { %5735 = vmatprep.subr.bf16.mxu0 %v7306_v49 }
 0x7d0   :  { %5769 = vmatpush3.bf16.msra.mxu1 %v7354_v11 }
 0x7d1   :  { %5770 = vmatprep.subr.bf16.mxu1 %v6584_v48 }
 0x7d2   :  { %5737 = vmatpush1.bf16.msra.mxu0 %v7308_v45 }
 0x7d3   :  { %5739 = vmatprep.subr.bf16.mxu0 %v7312_v26 }
 0x7d4   :  { %5772 = vmatpush3.bf16.msra.mxu1 %v7358_v35 }
 0x7d5   :  { %5773 = vmatprep.subr.bf16.mxu1 %v6584_v48 }
 0x7d6   :  { %5741 = vmatpush1.bf16.msra.mxu0 %v7314_v51 }
 0x7d7   :  { %5743 = vmatprep.subr.bf16.mxu0 %v7318_v38 }
 0x7d8   :  { %5775 = vmatpush3.bf16.msra.mxu1 %v7362_v56 }
 0x7d9   :  { %5776 = vmatprep.subr.bf16.mxu1 %v6584_v48 }
 0x7da   :  { %5745 = vmatpush1.bf16.msra.mxu0 %v7320_v46 }
 0x7db   :  { %5747 = vmatprep.subr.bf16.mxu0 %v7324_v32 }
 0x7dc   :  { %5778 = vmatpush3.bf16.msra.mxu1 %v7366_v1 }
 0x7dd   :  { %5779 = vmatprep.subr.bf16.mxu1 %v6584_v48 }
 0x7de   :  { %5749 = vmatpush1.bf16.msra.mxu0 %v7326_v16 }
 0x7df   :  { %5751 = vmatprep.subr.bf16.mxu0 %v7330_v53 }
 0x7e0   :  { %5781 = vmatpush3.bf16.msra.mxu1 %v7370_v41 }
 0x7e1   :  { %5814 = vmatprep.subr.bf16.mxu1 %v6584_v48 }
 0x7e2   :  { %5753 = vmatpush1.bf16.msra.mxu0 %v7332_v19 }
 0x7e3   :  { %5755 = vmatprep.subr.bf16.mxu0 %v7339_v43 }
 0x7e6   :  { %5757 = vmatpush1.bf16.msra.mxu0 %v7342_v44 }
 0x7e7   :  { %5783 = vmatprep.subr.bf16.mxu0 %v7294_v62 }
 0x868   :  { %v2111_v27 = vpop.f32.mrb[14].mxu0  ;;  %v2182_v22 = vpop.f32.mrb[22].mxu1 }
 0x869   :  { %v6236_v30 = vadd.f32 %v2111_v27, %v6932_v59  ;;  %v2113_v60 = vpop.f32.mrb[15].mxu0  ;;  %v4811_v28 = vpop.f32.mrb[23].mxu1  ;;  %v2207_v34 = vadd.f32 %v7220_v39, %v2182_v22 }
 0x86a   :  { %v6237_v33 = vadd.f32 %v2113_v60, %v6938_v2 }
 0x86b   :  { %v4154_v31 = vmul.f32 -1.442695, %v6236_v30 }
 0x86c   :  { %v4155_v42 = vmul.f32 -1.442695, %v6237_v33 }
 0x86d   :  { %6368 = vpow2.f32 %v4154_v31 }
 0x86e   :  { %6370 = vpow2.f32 %v4155_v42 }
 0x877   :  { %v6369_v63 = vpop.eup %6368 }
 0x878   :  { %v2190_v8 = vadd.f32 1.0, %v6369_v63  ;;  %v6371_v14 = vpop.eup %6370 }
 0x879   :  { %v2197_v21 = vadd.f32 1.0, %v6371_v14 }
 0x87a   :  { %6372 = vrcp.f32 %v2190_v8 }
 0x87b   :  { %6374 = vrcp.f32 %v2197_v21 }
 0x884   :  { %v6373_v50 = vpop.eup %6372 }
 0x885   :  { %v2208_v40 = vmul.f32 %v6373_v50, %v2207_v34  ;;  %v6375_v47 = vpop.eup %6374 }
 0x886   :  { %v2211_v39 = vsub.f32 1.0, %v6375_v47  ;;  %v2213_v15 = vmul.f32 %v6375_v47, %v7267_v3  ;;  %v2273_v3 = vld [vmem:[%s7823_s7] sm:$0x7] }
 0x887   :  { %v2209_v59 = vadd.f32 %v2208_v40, %v6940_v4  ;;  %v7441_v29 = vrot.slane %v2273_v3, %v130_v52  ;;  %v7445_v20 = vrot.slane %v2273_v3, %v134_v55  ;;  %v7452_v55 = vld [vmem:[%s7824_s8] ss:$0 sm:$0xff]  ;;  %v7456_v8 = vrot.slane %v2273_v3, %v138_v37 }
 0x888   :  { %v7379_v7 = vpop.f32.mrb[24].mxu1 }
 0x889   :  { %6376 = vtanh.f32 %v2209_v59  ;;  %v7381_v13 = vpop.f32.mrb[25].mxu1 }
 0x88a   :  { %v2470_v50 = vadd.f32 %v7381_v13, %v7456_v8 }
 0x88c   :  { %v7383_v2 = vpop.f32.mrb[26].mxu1 }
 0x88d   :  { %v7385_v58 = vpop.f32.mrb[27].mxu1 }
 0x890   :  { %v7387_v61 = vpop.f32.mrb[28].mxu1 }
 0x891   :  { %v7389_v25 = vpop.f32.mrb[29].mxu1 }
 0x893   :  { %v6377_v17 = vpop.eup %6376 }
 0x894   :  { %v2212_v12 = vmul.f32 %v6377_v17, %v2211_v39 }
 0x896   :  { %v2214_v4 = vadd.f32 %v2213_v15, %v2212_v12 }
 0x898   :  { %2397 = vmatmul.mubr.f32.gmra.mrb[30].mxu0 %v2214_v4  ;;  %4854 = vmatmul.mubr.f32.gmra.mrb[30].mxu1 %v2214_v4 }
 0x899   :  { %2647 = vmatprep.mubr.f32.mxu0 %v6583_v0  ;;  %4888 = vmatprep.mubr.msk.f32.mxu1 %vm6585_vm1, %v6583_v0 }
 0x89c   :  { %2648 = vmatmul.mubr.f32.vlgmr.msra.gmra.mrb[16].mxu0 %v6583_v0  ;;  %4889 = vmatmul.mubr.f32.vlgmr.msra.gmra.mrb[32].mxu1 %v6583_v0 }
 0x89d   :  { %5785 = vmatpush1.bf16.msra.mxu0 %v7296_v57  ;;  %5816 = vmatpush3.bf16.msra.mxu1 %v7334_v9 }
 0x89e   :  { %5787 = vmatprep.subr.bf16.mxu0 %v7300_v6  ;;  %5817 = vmatprep.subr.bf16.mxu1 %v6584_v48 }
 0x89f   :  { %2820 = vmatprep.mubr.f32.mxu0 %v6583_v0  ;;  %4923 = vmatprep.mubr.msk.f32.mxu1 %vm6585_vm1, %v6583_v0 }
 0x8a1   :  { %5789 = vmatpush1.bf16.msra.mxu0 %v7302_v24  ;;  %5819 = vmatpush3.bf16.msra.mxu1 %v7345_v5 }
 0x8a2   :  { %5791 = vmatprep.subr.bf16.mxu0 %v7306_v49  ;;  %5820 = vmatprep.subr.bf16.mxu1 %v6584_v48 }
 0x8a5   :  { %5793 = vmatpush1.bf16.msra.mxu0 %v7308_v45  ;;  %5822 = vmatpush3.bf16.msra.mxu1 %v7351_v54 }
 0x8a6   :  { %5795 = vmatprep.subr.bf16.mxu0 %v7312_v26  ;;  %5823 = vmatprep.subr.bf16.mxu1 %v6584_v48 }
 0x8a9   :  { %5797 = vmatpush1.bf16.msra.mxu0 %v7314_v51  ;;  %5825 = vmatpush3.bf16.msra.mxu1 %v7354_v11 }
 0x8aa   :  { %5799 = vmatprep.subr.bf16.mxu0 %v7318_v38  ;;  %5826 = vmatprep.subr.bf16.mxu1 %v6584_v48 }
 0x8ad   :  { %5801 = vmatpush1.bf16.msra.mxu0 %v7320_v46  ;;  %5828 = vmatpush3.bf16.msra.mxu1 %v7358_v35 }
 0x8ae   :  { %5803 = vmatprep.subr.bf16.mxu0 %v7324_v32  ;;  %5829 = vmatprep.subr.bf16.mxu1 %v6584_v48 }
 0x8b1   :  { %5805 = vmatpush1.bf16.msra.mxu0 %v7326_v16  ;;  %5831 = vmatpush3.bf16.msra.mxu1 %v7362_v56 }
 0x8b2   :  { %5807 = vmatprep.subr.bf16.mxu0 %v7330_v53  ;;  %5832 = vmatprep.subr.bf16.mxu1 %v6584_v48 }
 0x8b5   :  { %5809 = vmatpush1.bf16.msra.mxu0 %v7332_v19  ;;  %5834 = vmatpush3.bf16.msra.mxu1 %v7366_v1 }
 0x8b6   :  { %5811 = vmatprep.subr.bf16.mxu0 %v7339_v43  ;;  %5835 = vmatprep.subr.bf16.mxu1 %v6584_v48 }
 0x8b9   :  { %5813 = vmatpush1.bf16.msra.mxu0 %v7342_v44  ;;  %5837 = vmatpush3.bf16.msra.mxu1 %v7370_v41 }
 0x8ba   :  { %5839 = vmatprep.subr.bf16.mxu0 %v7294_v62  ;;  %5870 = vmatprep.subr.bf16.mxu1 %v6584_v48 }
 0x96b   :  { %v7435_v23 = vpop.f32.mrb[30].mxu1 }
 0x96c   :  { %v7437_v10 = vpop.f32.mrb[31].mxu1 }
 0x96f   :  { %v2649_v18 = vpop.f32.mrb[16].mxu0  ;;  %v2720_v27 = vpop.f32.mrb[32].mxu1 }
 0x970   :  { %v6238_v22 = vadd.f32 %v2649_v18, %v7441_v29  ;;  %v2651_v30 = vpop.f32.mrb[17].mxu0  ;;  %v4890_v60 = vpop.f32.mrb[33].mxu1  ;;  %v2745_v21 = vadd.f32 %v7452_v55, %v2720_v27 }
 0x971   :  { %v6239_v31 = vadd.f32 %v2651_v30, %v7445_v20 }
 0x972   :  { %v4157_v28 = vmul.f32 -1.442695, %v6238_v22 }
 0x973   :  { %v4158_v33 = vmul.f32 -1.442695, %v6239_v31 }
 0x974   :  { %6378 = vpow2.f32 %v4157_v28 }
 0x975   :  { %6380 = vpow2.f32 %v4158_v33 }
 0x97e   :  { %v6379_v42 = vpop.eup %6378 }
 0x97f   :  { %v2728_v63 = vadd.f32 1.0, %v6379_v42  ;;  %v6381_v52 = vpop.eup %6380 }
 0x980   :  { %v2735_v14 = vadd.f32 1.0, %v6381_v52  ;;  %v2475_v52 = vadd.f32 %v7379_v7, %v7456_v8 }
 0x981   :  { %6382 = vrcp.f32 %v2728_v63 }
 0x982   :  { %6384 = vrcp.f32 %v2735_v14 }
 0x98b   :  { %v6383_v34 = vpop.eup %6382 }
 0x98c   :  { %v2746_v40 = vmul.f32 %v6383_v34, %v2745_v21  ;;  %v6385_v47 = vpop.eup %6384 }
 0x98d   :  { %v2749_v39 = vsub.f32 1.0, %v6385_v47  ;;  %v2751_v15 = vmul.f32 0.0, %v6385_v47 }
 0x98e   :  { %v2747_v59 = vadd.f32 %v2746_v40, %v2470_v50 }
 0x990   :  { %6386 = vtanh.f32 %v2747_v59 }
 0x99a   :  { %v6387_v17 = vpop.eup %6386 }
 0x99b   :  { %v2750_v12 = vmul.f32 %v6387_v17, %v2749_v39 }
 0x99d   :  { %v7461_v4 = vadd.f32 %v2751_v15, %v2750_v12 }
 0x99f   :  { %2821 = vmatmul.mubr.f32.vlgmr.msra.gmra.mrb[18].mxu0 %v7461_v4  ;;  %4924 = vmatmul.mubr.f32.vlgmr.msra.gmra.mrb[34].mxu1 %v7461_v4 }
 0x9a0   :  { %5841 = vmatpush1.bf16.msra.mxu0 %v7296_v57  ;;  %5872 = vmatpush3.bf16.msra.mxu1 %v7334_v9 }
 0x9a1   :  { %5843 = vmatprep.subr.bf16.mxu0 %v7300_v6  ;;  %5873 = vmatprep.subr.bf16.mxu1 %v6584_v48 }
 0x9a2   :  { %2986 = vmatprep.mubr.f32.mxu0 %v6583_v0  ;;  %4958 = vmatprep.mubr.msk.f32.mxu1 %vm6585_vm1, %v6583_v0 }
 0x9a4   :  { %5845 = vmatpush1.bf16.msra.mxu0 %v7302_v24  ;;  %5875 = vmatpush3.bf16.msra.mxu1 %v7345_v5 }
 0x9a5   :  { %5847 = vmatprep.subr.bf16.mxu0 %v7306_v49  ;;  %5876 = vmatprep.subr.bf16.mxu1 %v6584_v48 }
 0x9a8   :  { %5849 = vmatpush1.bf16.msra.mxu0 %v7308_v45  ;;  %5878 = vmatpush3.bf16.msra.mxu1 %v7351_v54 }
 0x9a9   :  { %5851 = vmatprep.subr.bf16.mxu0 %v7312_v26  ;;  %5879 = vmatprep.subr.bf16.mxu1 %v6584_v48 }
 0x9ac   :  { %5853 = vmatpush1.bf16.msra.mxu0 %v7314_v51  ;;  %5881 = vmatpush3.bf16.msra.mxu1 %v7354_v11 }
 0x9ad   :  { %5855 = vmatprep.subr.bf16.mxu0 %v7318_v38  ;;  %5882 = vmatprep.subr.bf16.mxu1 %v6584_v48 }
 0x9b0   :  { %5857 = vmatpush1.bf16.msra.mxu0 %v7320_v46  ;;  %5884 = vmatpush3.bf16.msra.mxu1 %v7358_v35 }
 0x9b1   :  { %5859 = vmatprep.subr.bf16.mxu0 %v7324_v32  ;;  %5885 = vmatprep.subr.bf16.mxu1 %v6584_v48 }
 0x9b4   :  { %5861 = vmatpush1.bf16.msra.mxu0 %v7326_v16  ;;  %5887 = vmatpush3.bf16.msra.mxu1 %v7362_v56 }
 0x9b5   :  { %5863 = vmatprep.subr.bf16.mxu0 %v7330_v53  ;;  %5888 = vmatprep.subr.bf16.mxu1 %v6584_v48 }
 0x9b8   :  { %5865 = vmatpush1.bf16.msra.mxu0 %v7332_v19  ;;  %5890 = vmatpush3.bf16.msra.mxu1 %v7366_v1 }
 0x9b9   :  { %5867 = vmatprep.subr.bf16.mxu0 %v7339_v43  ;;  %5891 = vmatprep.subr.bf16.mxu1 %v6584_v48 }
 0x9bc   :  { %5869 = vmatpush1.bf16.msra.mxu0 %v7342_v44  ;;  %5893 = vmatpush3.bf16.msra.mxu1 %v7370_v41 }
 0x9bd   :  { %5895 = vmatprep.subr.bf16.mxu0 %v7294_v62  ;;  %5926 = vmatprep.subr.bf16.mxu1 %v6584_v48 }
 0xa72   :  { %v2822_v36 = vpop.f32.mrb[18].mxu0  ;;  %v2893_v37 = vpop.f32.mrb[34].mxu1 }
 0xa73   :  { %v6240_v13 = vadd.f32 %v2822_v36, %v7441_v29  ;;  %v2824_v3 = vpop.f32.mrb[19].mxu0  ;;  %v4925_v18 = vpop.f32.mrb[35].mxu1  ;;  %v2911_v42 = vadd.f32 %v7452_v55, %v2893_v37 }
 0xa74   :  { %v6241_v22 = vadd.f32 %v2824_v3, %v7445_v20 }
 0xa75   :  { %v4160_v27 = vmul.f32 -1.442695, %v6240_v13 }
 0xa76   :  { %v4161_v30 = vmul.f32 -1.442695, %v6241_v22 }
 0xa77   :  { %6388 = vpow2.f32 %v4160_v27 }
 0xa78   :  { %6390 = vpow2.f32 %v4161_v30 }
 0xa81   :  { %v6389_v60 = vpop.eup %6388 }
 0xa82   :  { %v2901_v28 = vadd.f32 1.0, %v6389_v60  ;;  %v6391_v31 = vpop.eup %6390 }
 0xa83   :  { %v2908_v33 = vadd.f32 1.0, %v6391_v31 }
 0xa84   :  { %6392 = vrcp.f32 %v2901_v28  ;;  %v2480_v28 = vadd.f32 %v7385_v58, %v7456_v8 }
 0xa85   :  { %6394 = vrcp.f32 %v2908_v33 }
 0xa8e   :  { %v6393_v63 = vpop.eup %6392 }
 0xa8f   :  { %v2912_v14 = vmul.f32 %v6393_v63, %v2911_v42  ;;  %v6395_v34 = vpop.eup %6394 }
 0xa90   :  { %v2915_v50 = vsub.f32 1.0, %v6395_v34  ;;  %v2917_v47 = vmul.f32 %v6395_v34, %v7461_v4 }
 0xa91   :  { %v2913_v21 = vadd.f32 %v2912_v14, %v2475_v52 }
 0xa93   :  { %6396 = vtanh.f32 %v2913_v21 }
 0xa9d   :  { %v6397_v40 = vpop.eup %6396 }
 0xa9e   :  { %v2916_v59 = vmul.f32 %v6397_v40, %v2915_v50 }
 0xaa0   :  { %v7506_v39 = vadd.f32 %v2917_v47, %v2916_v59 }
 0xaa2   :  { %2987 = vmatmul.mubr.f32.vlgmr.msra.gmra.mrb[20].mxu0 %v7506_v39  ;;  %4959 = vmatmul.mubr.f32.vlgmr.msra.gmra.mrb[36].mxu1 %v7506_v39 }
 0xaa3   :  { %5897 = vmatpush1.bf16.msra.mxu0 %v7296_v57  ;;  %5928 = vmatpush3.bf16.msra.mxu1 %v7334_v9 }
 0xaa4   :  { %5899 = vmatprep.subr.bf16.mxu0 %v7300_v6  ;;  %5929 = vmatprep.subr.bf16.mxu1 %v6584_v48 }
 0xaa5   :  { %3152 = vmatprep.mubr.f32.mxu0 %v6583_v0  ;;  %4993 = vmatprep.mubr.msk.f32.mxu1 %vm6585_vm1, %v6583_v0 }
 0xaa7   :  { %5901 = vmatpush1.bf16.msra.mxu0 %v7302_v24  ;;  %5931 = vmatpush3.bf16.msra.mxu1 %v7345_v5 }
 0xaa8   :  { %5903 = vmatprep.subr.bf16.mxu0 %v7306_v49  ;;  %5932 = vmatprep.subr.bf16.mxu1 %v6584_v48 }
 0xaab   :  { %5905 = vmatpush1.bf16.msra.mxu0 %v7308_v45  ;;  %5934 = vmatpush3.bf16.msra.mxu1 %v7351_v54 }
 0xaac   :  { %5907 = vmatprep.subr.bf16.mxu0 %v7312_v26  ;;  %5935 = vmatprep.subr.bf16.mxu1 %v6584_v48 }
 0xaaf   :  { %5909 = vmatpush1.bf16.msra.mxu0 %v7314_v51  ;;  %5937 = vmatpush3.bf16.msra.mxu1 %v7354_v11 }
 0xab0   :  { %5911 = vmatprep.subr.bf16.mxu0 %v7318_v38  ;;  %5938 = vmatprep.subr.bf16.mxu1 %v6584_v48 }
 0xab3   :  { %5913 = vmatpush1.bf16.msra.mxu0 %v7320_v46  ;;  %5940 = vmatpush3.bf16.msra.mxu1 %v7358_v35 }
 0xab4   :  { %5915 = vmatprep.subr.bf16.mxu0 %v7324_v32  ;;  %5941 = vmatprep.subr.bf16.mxu1 %v6584_v48 }
 0xab7   :  { %5917 = vmatpush1.bf16.msra.mxu0 %v7326_v16  ;;  %5943 = vmatpush3.bf16.msra.mxu1 %v7362_v56 }
 0xab8   :  { %5919 = vmatprep.subr.bf16.mxu0 %v7330_v53  ;;  %5944 = vmatprep.subr.bf16.mxu1 %v6584_v48 }
 0xabb   :  { %5921 = vmatpush1.bf16.msra.mxu0 %v7332_v19  ;;  %5946 = vmatpush3.bf16.msra.mxu1 %v7366_v1 }
 0xabc   :  { %5923 = vmatprep.subr.bf16.mxu0 %v7339_v43  ;;  %5947 = vmatprep.subr.bf16.mxu1 %v6584_v48 }
 0xabf   :  { %5925 = vmatpush1.bf16.msra.mxu0 %v7342_v44  ;;  %5949 = vmatpush3.bf16.msra.mxu1 %v7370_v41 }
 0xac0   :  { %5951 = vmatprep.subr.bf16.mxu0 %v7294_v62  ;;  %5982 = vmatprep.subr.bf16.mxu1 %v6584_v48 }
 0xb75   :  { %v2988_v7 = vpop.f32.mrb[20].mxu0  ;;  %v3059_v17 = vpop.f32.mrb[36].mxu1 }
 0xb76   :  { %v6242_v12 = vadd.f32 %v2988_v7, %v7441_v29  ;;  %v2990_v15 = vpop.f32.mrb[21].mxu0  ;;  %v4960_v4 = vpop.f32.mrb[37].mxu1  ;;  %v3077_v30 = vadd.f32 %v7452_v55, %v3059_v17 }
 0xb77   :  { %v6243_v37 = vadd.f32 %v2990_v15, %v7445_v20 }
 0xb78   :  { %v4162_v36 = vmul.f32 -1.442695, %v6242_v12 }
 0xb79   :  { %v4163_v13 = vmul.f32 -1.442695, %v6243_v37 }
 0xb7a   :  { %6398 = vpow2.f32 %v4162_v36 }
 0xb7b   :  { %6400 = vpow2.f32 %v4163_v13 }
 0xb84   :  { %v6399_v3 = vpop.eup %6398 }
 0xb85   :  { %v3067_v18 = vadd.f32 1.0, %v6399_v3  ;;  %v6401_v27 = vpop.eup %6400  ;;  %v2485_v3 = vadd.f32 %v7383_v2, %v7456_v8 }
 0xb86   :  { %v3074_v22 = vadd.f32 1.0, %v6401_v27 }
 0xb87   :  { %6402 = vrcp.f32 %v3067_v18 }
 0xb88   :  { %6404 = vrcp.f32 %v3074_v22 }
 0xb91   :  { %v6403_v60 = vpop.eup %6402 }
 0xb92   :  { %v3078_v31 = vmul.f32 %v6403_v60, %v3077_v30  ;;  %v6405_v42 = vpop.eup %6404 }
 0xb93   :  { %v3081_v63 = vsub.f32 1.0, %v6405_v42  ;;  %v3083_v21 = vmul.f32 %v6405_v42, %v7506_v39 }
 0xb94   :  { %v3079_v33 = vadd.f32 %v3078_v31, %v2480_v28 }
 0xb96   :  { %6406 = vtanh.f32 %v3079_v33 }
 0xba0   :  { %v6407_v52 = vpop.eup %6406 }
 0xba1   :  { %v3082_v14 = vmul.f32 %v6407_v52, %v3081_v63 }
 0xba3   :  { %v7551_v34 = vadd.f32 %v3083_v21, %v3082_v14 }
 0xba5   :  { %3153 = vmatmul.mubr.f32.vlgmr.msra.gmra.mrb[22].mxu0 %v7551_v34  ;;  %4994 = vmatmul.mubr.f32.vlgmr.msra.gmra.mrb[38].mxu1 %v7551_v34 }
 0xba6   :  { %5953 = vmatpush1.bf16.msra.mxu0 %v7296_v57  ;;  %5984 = vmatpush3.bf16.msra.mxu1 %v7334_v9 }
 0xba7   :  { %5955 = vmatprep.subr.bf16.mxu0 %v7300_v6  ;;  %5985 = vmatprep.subr.bf16.mxu1 %v6584_v48 }
 0xba8   :  { %3318 = vmatprep.mubr.f32.mxu0 %v6583_v0  ;;  %5028 = vmatprep.mubr.msk.f32.mxu1 %vm6585_vm1, %v6583_v0 }
 0xbaa   :  { %5957 = vmatpush1.bf16.msra.mxu0 %v7302_v24  ;;  %5987 = vmatpush3.bf16.msra.mxu1 %v7345_v5 }
 0xbab   :  { %5959 = vmatprep.subr.bf16.mxu0 %v7306_v49  ;;  %5988 = vmatprep.subr.bf16.mxu1 %v6584_v48 }
 0xbae   :  { %5961 = vmatpush1.bf16.msra.mxu0 %v7308_v45  ;;  %5990 = vmatpush3.bf16.msra.mxu1 %v7351_v54 }
 0xbaf   :  { %5963 = vmatprep.subr.bf16.mxu0 %v7312_v26  ;;  %5991 = vmatprep.subr.bf16.mxu1 %v6584_v48 }
 0xbb2   :  { %5965 = vmatpush1.bf16.msra.mxu0 %v7314_v51  ;;  %5993 = vmatpush3.bf16.msra.mxu1 %v7354_v11 }
 0xbb3   :  { %5967 = vmatprep.subr.bf16.mxu0 %v7318_v38  ;;  %5994 = vmatprep.subr.bf16.mxu1 %v6584_v48 }
 0xbb6   :  { %5969 = vmatpush1.bf16.msra.mxu0 %v7320_v46  ;;  %5996 = vmatpush3.bf16.msra.mxu1 %v7358_v35 }
 0xbb7   :  { %5971 = vmatprep.subr.bf16.mxu0 %v7324_v32  ;;  %5997 = vmatprep.subr.bf16.mxu1 %v6584_v48 }
 0xbba   :  { %5973 = vmatpush1.bf16.msra.mxu0 %v7326_v16  ;;  %5999 = vmatpush3.bf16.msra.mxu1 %v7362_v56 }
 0xbbb   :  { %5975 = vmatprep.subr.bf16.mxu0 %v7330_v53  ;;  %6000 = vmatprep.subr.bf16.mxu1 %v6584_v48 }
 0xbbe   :  { %5977 = vmatpush1.bf16.msra.mxu0 %v7332_v19  ;;  %6002 = vmatpush3.bf16.msra.mxu1 %v7366_v1 }
 0xbbf   :  { %5979 = vmatprep.subr.bf16.mxu0 %v7339_v43  ;;  %6003 = vmatprep.subr.bf16.mxu1 %v6584_v48 }
 0xbc2   :  { %5981 = vmatpush1.bf16.msra.mxu0 %v7342_v44  ;;  %6005 = vmatpush3.bf16.msra.mxu1 %v7370_v41 }
 0xbc3   :  { %6007 = vmatprep.subr.bf16.mxu0 %v7294_v62  ;;  %6038 = vmatprep.subr.bf16.mxu1 %v6584_v48 }
 0xc78   :  { %v3154_v58 = vpop.f32.mrb[22].mxu0  ;;  %v3225_v50 = vpop.f32.mrb[38].mxu1 }
 0xc79   :  { %v6244_v40 = vadd.f32 %v3154_v58, %v7441_v29  ;;  %v3156_v59 = vpop.f32.mrb[23].mxu0  ;;  %v4995_v47 = vpop.f32.mrb[39].mxu1  ;;  %v3243_v37 = vadd.f32 %v7452_v55, %v3225_v50 }
 0xc7a   :  { %v6245_v7 = vadd.f32 %v3156_v59, %v7445_v20 }
 0xc7b   :  { %v4164_v39 = vmul.f32 -1.442695, %v6244_v40 }
 0xc7c   :  { %v4165_v17 = vmul.f32 -1.442695, %v6245_v7 }
 0xc7d   :  { %6408 = vpow2.f32 %v4164_v39 }
 0xc7e   :  { %6410 = vpow2.f32 %v4165_v17  ;;  %v2490_v17 = vadd.f32 %v7389_v25, %v7456_v8 }
 0xc87   :  { %v6409_v12 = vpop.eup %6408 }
 0xc88   :  { %v3233_v15 = vadd.f32 1.0, %v6409_v12  ;;  %v6411_v4 = vpop.eup %6410 }
 0xc89   :  { %v3240_v36 = vadd.f32 1.0, %v6411_v4 }
 0xc8a   :  { %6412 = vrcp.f32 %v3233_v15 }
 0xc8b   :  { %6414 = vrcp.f32 %v3240_v36 }
 0xc94   :  { %v6413_v13 = vpop.eup %6412 }
 0xc95   :  { %v3244_v18 = vmul.f32 %v6413_v13, %v3243_v37  ;;  %v6415_v22 = vpop.eup %6414 }
 0xc96   :  { %v3247_v30 = vsub.f32 1.0, %v6415_v22  ;;  %v3249_v31 = vmul.f32 %v6415_v22, %v7551_v34 }
 0xc97   :  { %v3245_v27 = vadd.f32 %v3244_v18, %v2485_v3 }
 0xc99   :  { %6416 = vtanh.f32 %v3245_v27 }
 0xca3   :  { %v6417_v60 = vpop.eup %6416 }
 0xca4   :  { %v3248_v28 = vmul.f32 %v6417_v60, %v3247_v30 }
 0xca6   :  { %v7596_v33 = vadd.f32 %v3249_v31, %v3248_v28 }
 0xca8   :  { %3319 = vmatmul.mubr.f32.vlgmr.msra.gmra.mrb[24].mxu0 %v7596_v33  ;;  %5029 = vmatmul.mubr.f32.vlgmr.msra.gmra.mrb[40].mxu1 %v7596_v33 }
 0xca9   :  { %6009 = vmatpush1.bf16.msra.mxu0 %v7296_v57  ;;  %6040 = vmatpush3.bf16.msra.mxu1 %v7334_v9 }
 0xcaa   :  { %6011 = vmatprep.subr.bf16.mxu0 %v7300_v6  ;;  %6041 = vmatprep.subr.bf16.mxu1 %v6584_v48 }
 0xcab   :  { %3484 = vmatprep.mubr.f32.mxu0 %v6583_v0  ;;  %5063 = vmatprep.mubr.msk.f32.mxu1 %vm6585_vm1, %v6583_v0 }
 0xcad   :  { %6013 = vmatpush1.bf16.msra.mxu0 %v7302_v24  ;;  %6043 = vmatpush3.bf16.msra.mxu1 %v7345_v5 }
 0xcae   :  { %6015 = vmatprep.subr.bf16.mxu0 %v7306_v49  ;;  %6044 = vmatprep.subr.bf16.mxu1 %v6584_v48 }
 0xcb1   :  { %6017 = vmatpush1.bf16.msra.mxu0 %v7308_v45  ;;  %6046 = vmatpush3.bf16.msra.mxu1 %v7351_v54 }
 0xcb2   :  { %6019 = vmatprep.subr.bf16.mxu0 %v7312_v26  ;;  %6047 = vmatprep.subr.bf16.mxu1 %v6584_v48 }
 0xcb5   :  { %6021 = vmatpush1.bf16.msra.mxu0 %v7314_v51  ;;  %6049 = vmatpush3.bf16.msra.mxu1 %v7354_v11 }
 0xcb6   :  { %6023 = vmatprep.subr.bf16.mxu0 %v7318_v38  ;;  %6050 = vmatprep.subr.bf16.mxu1 %v6584_v48 }
 0xcb9   :  { %6025 = vmatpush1.bf16.msra.mxu0 %v7320_v46  ;;  %6052 = vmatpush3.bf16.msra.mxu1 %v7358_v35 }
 0xcba   :  { %6027 = vmatprep.subr.bf16.mxu0 %v7324_v32  ;;  %6053 = vmatprep.subr.bf16.mxu1 %v6584_v48 }
 0xcbd   :  { %6029 = vmatpush1.bf16.msra.mxu0 %v7326_v16  ;;  %6055 = vmatpush3.bf16.msra.mxu1 %v7362_v56 }
 0xcbe   :  { %6031 = vmatprep.subr.bf16.mxu0 %v7330_v53  ;;  %6056 = vmatprep.subr.bf16.mxu1 %v6584_v48 }
 0xcc1   :  { %6033 = vmatpush1.bf16.msra.mxu0 %v7332_v19  ;;  %6058 = vmatpush3.bf16.msra.mxu1 %v7366_v1 }
 0xcc2   :  { %6035 = vmatprep.subr.bf16.mxu0 %v7339_v43  ;;  %6059 = vmatprep.subr.bf16.mxu1 %v6584_v48 }
 0xcc5   :  { %6037 = vmatpush1.bf16.msra.mxu0 %v7342_v44  ;;  %6061 = vmatpush3.bf16.msra.mxu1 %v7370_v41 }
 0xcc6   :  { %6063 = vmatprep.subr.bf16.mxu0 %v7294_v62  ;;  %6094 = vmatprep.subr.bf16.mxu1 %v6584_v48 }
 0xd7b   :  { %v3320_v2 = vpop.f32.mrb[24].mxu0  ;;  %v3391_v42 = vpop.f32.mrb[40].mxu1 }
 0xd7c   :  { %v6246_v63 = vadd.f32 %v3320_v2, %v7441_v29  ;;  %v3322_v52 = vpop.f32.mrb[25].mxu0  ;;  %v5030_v14 = vpop.f32.mrb[41].mxu1  ;;  %v3409_v39 = vadd.f32 %v7452_v55, %v3391_v42 }
 0xd7d   :  { %v6247_v34 = vadd.f32 %v3322_v52, %v7445_v20 }
 0xd7e   :  { %v4166_v21 = vmul.f32 -1.442695, %v6246_v63 }
 0xd7f   :  { %v4167_v58 = vmul.f32 -1.442695, %v6247_v34 }
 0xd80   :  { %6418 = vpow2.f32 %v4166_v21  ;;  %v2495_v21 = vadd.f32 %v7387_v61, %v7456_v8  ;;  %v3915_v61 = vld [vmem:[%s7825_s9] sm:$0xff] }
 0xd81   :  { %6420 = vpow2.f32 %v4167_v58 }
 0xd8a   :  { %v6419_v50 = vpop.eup %6418 }
 0xd8b   :  { %v3399_v40 = vadd.f32 1.0, %v6419_v50  ;;  %v6421_v59 = vpop.eup %6420 }
 0xd8c   :  { %v3406_v47 = vadd.f32 1.0, %v6421_v59 }
 0xd8d   :  { %6422 = vrcp.f32 %v3399_v40 }
 0xd8e   :  { %6424 = vrcp.f32 %v3406_v47 }
 0xd97   :  { %v6423_v7 = vpop.eup %6422 }
 0xd98   :  { %v3410_v12 = vmul.f32 %v6423_v7, %v3409_v39  ;;  %v6425_v4 = vpop.eup %6424 }
 0xd99   :  { %v3413_v36 = vsub.f32 1.0, %v6425_v4  ;;  %v3415_v3 = vmul.f32 %v6425_v4, %v7596_v33  ;;  %v3919_v4 = vld [vmem:[%s7825_s9 + $0x20] sm:$0xff] }
 0xd9a   :  { %v3411_v15 = vadd.f32 %v3410_v12, %v2490_v17  ;;  %v3917_v12 = vld [vmem:[%s7825_s9 + $0x10] sm:$0xff] }
 0xd9c   :  { %6426 = vtanh.f32 %v3411_v15 }
 0xda6   :  { %v6427_v37 = vpop.eup %6426 }
 0xda7   :  { %v3414_v13 = vmul.f32 %v6427_v37, %v3413_v36  ;;  %v3920_v36 = vld [vmem:[%s7825_s9 + $0x28] sm:$0xff] }
 0xda8   :  { %v6181_v37 = vpack.c.bf16 %v3920_v36, %v3919_v4 }
 0xda9   :  { %v7641_v18 = vadd.f32 %v3415_v3, %v3414_v13  ;;  %v3921_v13 = vld [vmem:[%s7825_s9 + $0x30] sm:$0xff]  ;;  %v3922_v3 = vld [vmem:[%s7825_s9 + $0x38] sm:$0xff] }
 0xdab   :  { %3485 = vmatmul.mubr.f32.vlgmr.msra.gmra.mrb[26].mxu0 %v7641_v18  ;;  %5064 = vmatmul.mubr.f32.vlgmr.msra.gmra.mrb[42].mxu1 %v7641_v18 }
 0xdac   :  { %6065 = vmatpush1.bf16.msra.mxu0 %v7296_v57  ;;  %6096 = vmatpush3.bf16.msra.mxu1 %v7334_v9 }
 0xdad   :  { %6067 = vmatprep.subr.bf16.mxu0 %v7300_v6  ;;  %6097 = vmatprep.subr.bf16.mxu1 %v6584_v48 }
 0xdae   :  { %3650 = vmatprep.mubr.f32.mxu0 %v6583_v0  ;;  %5098 = vmatprep.mubr.msk.f32.mxu1 %vm6585_vm1, %v6583_v0 }
 0xdb0   :  { %6069 = vmatpush1.bf16.msra.mxu0 %v7302_v24  ;;  %6099 = vmatpush3.bf16.msra.mxu1 %v7345_v5 }
 0xdb1   :  { %6071 = vmatprep.subr.bf16.mxu0 %v7306_v49  ;;  %6100 = vmatprep.subr.bf16.mxu1 %v6584_v48 }
 0xdb4   :  { %6073 = vmatpush1.bf16.msra.mxu0 %v7308_v45  ;;  %6102 = vmatpush3.bf16.msra.mxu1 %v7351_v54 }
 0xdb5   :  { %6075 = vmatprep.subr.bf16.mxu0 %v7312_v26  ;;  %6103 = vmatprep.subr.bf16.mxu1 %v6584_v48 }
 0xdb8   :  { %6077 = vmatpush1.bf16.msra.mxu0 %v7314_v51  ;;  %6105 = vmatpush3.bf16.msra.mxu1 %v7354_v11 }
 0xdb9   :  { %6079 = vmatprep.subr.bf16.mxu0 %v7318_v38  ;;  %6106 = vmatprep.subr.bf16.mxu1 %v6584_v48 }
 0xdbc   :  { %6081 = vmatpush1.bf16.msra.mxu0 %v7320_v46  ;;  %6108 = vmatpush3.bf16.msra.mxu1 %v7358_v35 }
 0xdbd   :  { %6083 = vmatprep.subr.bf16.mxu0 %v7324_v32  ;;  %6109 = vmatprep.subr.bf16.mxu1 %v6584_v48 }
 0xdc0   :  { %6085 = vmatpush1.bf16.msra.mxu0 %v7326_v16  ;;  %6111 = vmatpush3.bf16.msra.mxu1 %v7362_v56 }
 0xdc1   :  { %6087 = vmatprep.subr.bf16.mxu0 %v7330_v53  ;;  %6112 = vmatprep.subr.bf16.mxu1 %v6584_v48 }
 0xdc4   :  { %6089 = vmatpush1.bf16.msra.mxu0 %v7332_v19  ;;  %6114 = vmatpush3.bf16.msra.mxu1 %v7366_v1 }
 0xdc5   :  { %6091 = vmatprep.subr.bf16.mxu0 %v7339_v43  ;;  %6115 = vmatprep.subr.bf16.mxu1 %v6584_v48 }
 0xdc8   :  { %6093 = vmatpush1.bf16.msra.mxu0 %v7342_v44  ;;  %6117 = vmatpush3.bf16.msra.mxu1 %v7370_v41 }
 0xdc9   :  { %6119 = vmatprep.subr.bf16.mxu0 %v7294_v62  ;;  %6150 = vmatprep.subr.bf16.mxu1 %v6584_v48 }
 0xe7e   :  { %v3486_v25 = vpop.f32.mrb[26].mxu0  ;;  %v3557_v27 = vpop.f32.mrb[42].mxu1 }
 0xe7f   :  { %v6248_v22 = vadd.f32 %v3486_v25, %v7441_v29  ;;  %v3488_v30 = vpop.f32.mrb[27].mxu0  ;;  %v5065_v60 = vpop.f32.mrb[43].mxu1  ;;  %v3575_v62 = vadd.f32 %v7452_v55, %v3557_v27  ;;  %v3923_v25 = vld [vmem:[%s7825_s9 + $0x40] sm:$0xff]  ;;  %v3924_v27 = vld [vmem:[%s7825_s9 + $0x48] sm:$0xff] }
 0xe80   :  { %v6249_v31 = vadd.f32 %v3488_v30, %v7445_v20  ;;  %v3925_v30 = vld [vmem:[%s7825_s9 + $0x50] sm:$0xff]  ;;  %v3926_v60 = vld [vmem:[%s7825_s9 + $0x58] sm:$0xff] }
 0xe81   :  { %v4168_v28 = vmul.f32 -1.442695, %v6248_v22  ;;  %v6187_v22 = vpack.c.bf16 %v3924_v27, %v3923_v25  ;;  %v4175_v27 = vld [vmem:[%s7828_s12] ss:$0 sm:$0xff] }
 0xe82   :  { %v4169_v33 = vmul.f32 -1.442695, %v6249_v31  ;;  %v3927_v31 = vld [vmem:[%s7825_s9 + $0x60] sm:$0xff] }
 0xe83   :  { %6428 = vpow2.f32 %v4168_v28  ;;  %v6190_v28 = vpack.c.bf16 %v3926_v60, %v3925_v30 }
 0xe84   :  { %6430 = vpow2.f32 %v4169_v33  ;;  %v3928_v33 = vld [vmem:[%s7825_s9 + $0x68] sm:$0xff] }
 0xe8d   :  { %v6429_v2 = vpop.eup %6428 }
 0xe8e   :  { %v3565_v42 = vadd.f32 1.0, %v6429_v2  ;;  %v6431_v63 = vpop.eup %6430  ;;  %v6193_v2 = vpack.c.bf16 %v3928_v33, %v3927_v31 }
 0xe8f   :  { %v3572_v52 = vadd.f32 1.0, %v6431_v63  ;;  %v3930_v63 = vld [vmem:[%s7825_s9 + $0x78] sm:$0xff] }
 0xe90   :  { %6432 = vrcp.f32 %v3565_v42  ;;  %v3929_v42 = vld [vmem:[%s7825_s9 + $0x70] sm:$0xff] }
 0xe91   :  { %6434 = vrcp.f32 %v3572_v52  ;;  %v6196_v52 = vpack.c.bf16 %v3930_v63, %v3929_v42 }
 0xe9a   :  { %v6433_v14 = vpop.eup %6432 }
 0xe9b   :  { %v3576_v34 = vmul.f32 %v6433_v14, %v3575_v62  ;;  %v6435_v50 = vpop.eup %6434  ;;  %v4009_v62 = vld [vmem:[#allocation11] sm:$0xff]  ;;  %v4010_v14 = vld [vmem:[#allocation11 + $0x8] sm:$0xff] }
 0xe9c   :  { %v3579_v40 = vsub.f32 1.0, %v6435_v50  ;;  %v3581_v39 = vmul.f32 %v6435_v50, %v7641_v18  ;;  %v6184_v18 = vpack.c.bf16 %v3922_v3, %v3921_v13  ;;  %v4024_v13 = vld [vmem:[#allocation11 + $0x78] sm:$0xff] }
 0xe9d   :  { %v3577_v58 = vadd.f32 %v3576_v34, %v2495_v21  ;;  %v4011_v21 = vld [vmem:[#allocation11 + $0x10] sm:$0xff]  ;;  %v6199_v34 = vpack.c.bf16 %v4010_v14, %v4009_v62 }
 0xe9f   :  { %6436 = vtanh.f32 %v3577_v58  ;;  %v4012_v58 = vld [vmem:[#allocation11 + $0x18] sm:$0xff] }
 0xea0   :  { %v6202_v50 = vpack.c.bf16 %v4012_v58, %v4011_v21 }
 0xea9   :  { %v6437_v59 = vpop.eup %6436 }
 0xeaa   :  { %v3580_v47 = vmul.f32 %v6437_v59, %v3579_v40  ;;  %v4013_v40 = vld [vmem:[#allocation11 + $0x20] sm:$0xff]  ;;  %v4014_v59 = vld [vmem:[#allocation11 + $0x28] sm:$0xff] }
 0xeac   :  { %v7686_v7 = vadd.f32 %v3581_v39, %v3580_v47  ;;  %v6205_v47 = vpack.c.bf16 %v4014_v59, %v4013_v40  ;;  %v4015_v39 = vld [vmem:[#allocation11 + $0x30] sm:$0xff] }
 0xeae   :  { %3651 = vmatmul.mubr.f32.vlgmr.msra.gmra.mrb[28].mxu0 %v7686_v7  ;;  %5099 = vmatmul.mubr.f32.vlgmr.msra.gmra.mrb[44].mxu1 %v7686_v7 }
 0xeaf   :  { %6121 = vmatpush1.bf16.msra.mxu0 %v7296_v57  ;;  %6152 = vmatpush3.bf16.msra.mxu1 %v7334_v9 }
 0xeb0   :  { %6123 = vmatprep.subr.bf16.mxu0 %v7300_v6  ;;  %6153 = vmatprep.subr.bf16.mxu1 %v6584_v48 }
 0xeb1   :  { %3816 = vmatprep.mubr.f32.mxu0 %v6583_v0  ;;  %5133 = vmatprep.mubr.msk.f32.mxu1 %vm6585_vm1, %v6583_v0 }
 0xeb3   :  { %6125 = vmatpush1.bf16.msra.mxu0 %v7302_v24  ;;  %6155 = vmatpush3.bf16.msra.mxu1 %v7345_v5 }
 0xeb4   :  { %6127 = vmatprep.subr.bf16.mxu0 %v7306_v49  ;;  %6156 = vmatprep.subr.bf16.mxu1 %v6584_v48 }
 0xeb7   :  { %6129 = vmatpush1.bf16.msra.mxu0 %v7308_v45  ;;  %6158 = vmatpush3.bf16.msra.mxu1 %v7351_v54 }
 0xeb8   :  { %6131 = vmatprep.subr.bf16.mxu0 %v7312_v26  ;;  %6159 = vmatprep.subr.bf16.mxu1 %v6584_v48 }
 0xebb   :  { %6133 = vmatpush1.bf16.msra.mxu0 %v7314_v51  ;;  %6161 = vmatpush3.bf16.msra.mxu1 %v7354_v11 }
 0xebc   :  { %6135 = vmatprep.subr.bf16.mxu0 %v7318_v38  ;;  %6162 = vmatprep.subr.bf16.mxu1 %v6584_v48 }
 0xebf   :  { %6137 = vmatpush1.bf16.msra.mxu0 %v7320_v46  ;;  %6164 = vmatpush3.bf16.msra.mxu1 %v7358_v35 }
 0xec0   :  { %6139 = vmatprep.subr.bf16.mxu0 %v7324_v32  ;;  %6165 = vmatprep.subr.bf16.mxu1 %v6584_v48 }
 0xec3   :  { %6141 = vmatpush1.bf16.msra.mxu0 %v7326_v16  ;;  %6167 = vmatpush3.bf16.msra.mxu1 %v7362_v56 }
 0xec4   :  { %6143 = vmatprep.subr.bf16.mxu0 %v7330_v53  ;;  %6168 = vmatprep.subr.bf16.mxu1 %v6584_v48 }
 0xec7   :  { %6145 = vmatpush1.bf16.msra.mxu0 %v7332_v19  ;;  %6170 = vmatpush3.bf16.msra.mxu1 %v7366_v1 }
 0xec8   :  { %6147 = vmatprep.subr.bf16.mxu0 %v7339_v43  ;;  %6171 = vmatprep.subr.bf16.mxu1 %v6584_v48  ;;  %v2500_v43 = vadd.f32 %v7437_v10, %v7456_v8  ;;  %v3916_v10 = vld [vmem:[%s7825_s9 + $0x8] sm:$0xff] }
 0xec9   :  { %v6175_v17 = vpack.c.bf16 %v3916_v10, %v3915_v61  ;;  %v2505_v10 = vadd.f32 %v7435_v23, %v7456_v8  ;;  %v4174_v23 = vld [vmem:[%s7826_s10] ss:$0 sm:$0xff] }
 0xecb   :  { %6149 = vmatpush1.bf16.msra.mxu0 %v7342_v44  ;;  %6173 = vmatpush3.bf16.msra.mxu1 %v7370_v41 }
 0xecc   :  { %6174 = vmatprep.subr.bf16.mxu0 %v6584_v48  ;;  %6198 = vmatprep.subr.bf16.mxu1 %v6584_v48 }
 0xf81   :  { %v3652_v57 = vpop.f32.mrb[28].mxu0  ;;  %v3723_v6 = vpop.f32.mrb[44].mxu1 }
 0xf82   :  { %v6250_v24 = vadd.f32 %v3652_v57, %v7441_v29  ;;  %v3654_v49 = vpop.f32.mrb[29].mxu0  ;;  %v5100_v45 = vpop.f32.mrb[45].mxu1  ;;  %v3741_v19 = vadd.f32 %v7452_v55, %v3723_v6  ;;  %v4017_v6 = vld [vmem:[#allocation11 + $0x40] sm:$0xff] }
 0xf83   :  { %v6251_v51 = vadd.f32 %v3654_v49, %v7445_v20  ;;  %v4019_v45 = vld [vmem:[#allocation11 + $0x50] sm:$0xff] }
 0xf84   :  { %v4170_v26 = vmul.f32 -1.442695, %v6250_v24  ;;  %v4018_v24 = vld [vmem:[#allocation11 + $0x48] sm:$0xff] }
 0xf85   :  { %v4171_v38 = vmul.f32 -1.442695, %v6251_v51  ;;  %v6211_v49 = vpack.c.bf16 %v4018_v24, %v4017_v6 }
 0xf86   :  { %6438 = vpow2.f32 %v4170_v26  ;;  %v4020_v26 = vld [vmem:[#allocation11 + $0x58] sm:$0xff] }
 0xf87   :  { %6440 = vpow2.f32 %v4171_v38  ;;  %v6214_v51 = vpack.c.bf16 %v4020_v26, %v4019_v45  ;;  %v4021_v38 = vld [vmem:[#allocation11 + $0x60] sm:$0xff] }
 0xf90   :  { %v6439_v46 = vpop.eup %6438 }
 0xf91   :  { %v3731_v32 = vadd.f32 1.0, %v6439_v46  ;;  %v6441_v16 = vpop.eup %6440  ;;  %v4022_v46 = vld [vmem:[#allocation11 + $0x68] sm:$0xff] }
 0xf92   :  { %v3738_v53 = vadd.f32 1.0, %v6441_v16 }
 0xf93   :  { %6442 = vrcp.f32 %v3731_v32  ;;  %v6217_v32 = vpack.c.bf16 %v4022_v46, %v4021_v38 }
 0xf94   :  { %6444 = vrcp.f32 %v3738_v53 }
 0xf9d   :  { %v6443_v9 = vpop.eup %6442 }
 0xf9e   :  { %v3742_v44 = vmul.f32 %v6443_v9, %v3741_v19  ;;  %v6445_v54 = vpop.eup %6444 }
 0xf9f   :  { %v3745_v11 = vsub.f32 1.0, %v6445_v54  ;;  %v3747_v1 = vmul.f32 %v6445_v54, %v7686_v7  ;;  %v4016_v7 = vld [vmem:[#allocation11 + $0x38] sm:$0xff] }
 0xfa0   :  { %v3743_v5 = vadd.f32 %v3742_v44, %v2500_v43  ;;  %v6208_v57 = vpack.c.bf16 %v4016_v7, %v4015_v39 }
 0xfa2   :  { %6446 = vtanh.f32 %v3743_v5 }
 0xfac   :  { %v6447_v35 = vpop.eup %6446 }
 0xfad   :  { %v3746_v56 = vmul.f32 %v6447_v35, %v3745_v11 }
 0xfaf   :  { %v7731_v41 = vadd.f32 %v3747_v1, %v3746_v56 }
 0xfb1   :  { %3817 = vmatmul.mubr.f32.vlgmr.msra.gmra.mrb[30].mxu0 %v7731_v41  ;;  %5134 = vmatmul.mubr.f32.vlgmr.msra.gmra.mrb[46].mxu1 %v7731_v41 }
 0xfb2   :  { %5168 = vmatprep.mubr.msk.f32.mxu0 %vm6585_vm1, %v6583_v0  ;;  %5203 = vmatprep.mubr.msk.f32.mxu1 %vm6585_vm1, %v6583_v0  ;;  %v3918_v0 = vld [vmem:[%s7825_s9 + $0x18] sm:$0xff] }
 0xfb3   :  { %6176 = vmatpush3.bf16.msra.mxu0 %v6175_v17  ;;  %v6178_v15 = vpack.c.bf16 %v3918_v0, %v3917_v12  ;;  %6200 = vmatpush3.bf16.msra.mxu1 %v6199_v34 }
 0xfb4   :  { %6177 = vmatprep.subr.bf16.mxu0 %v6584_v48  ;;  %6201 = vmatprep.subr.bf16.mxu1 %v6584_v48 }
 0xfb7   :  { %6179 = vmatpush3.bf16.msra.mxu0 %v6178_v15  ;;  %6203 = vmatpush3.bf16.msra.mxu1 %v6202_v50 }
 0xfb8   :  { %6180 = vmatprep.subr.bf16.mxu0 %v6584_v48  ;;  %6204 = vmatprep.subr.bf16.mxu1 %v6584_v48 }
 0xfbb   :  { %6182 = vmatpush3.bf16.msra.mxu0 %v6181_v37  ;;  %6206 = vmatpush3.bf16.msra.mxu1 %v6205_v47  ;;  %v4023_v37 = vld [vmem:[#allocation11 + $0x70] sm:$0xff] }
 0xfbc   :  { %6183 = vmatprep.subr.bf16.mxu0 %v6584_v48  ;;  %6207 = vmatprep.subr.bf16.mxu1 %v6584_v48  ;;  %v6220_v3 = vpack.c.bf16 %v4024_v13, %v4023_v37 }
 0xfbf   :  { %6185 = vmatpush3.bf16.msra.mxu0 %v6184_v18  ;;  %6209 = vmatpush3.bf16.msra.mxu1 %v6208_v57 }
 0xfc0   :  { %6186 = vmatprep.subr.bf16.mxu0 %v6584_v48  ;;  %6210 = vmatprep.subr.bf16.mxu1 %v6584_v48 }
 0xfc3   :  { %6188 = vmatpush3.bf16.msra.mxu0 %v6187_v22  ;;  %6212 = vmatpush3.bf16.msra.mxu1 %v6211_v49 }
 0xfc4   :  { %6189 = vmatprep.subr.bf16.mxu0 %v6584_v48  ;;  %6213 = vmatprep.subr.bf16.mxu1 %v6584_v48 }
 0xfc7   :  { %6191 = vmatpush3.bf16.msra.mxu0 %v6190_v28  ;;  %6215 = vmatpush3.bf16.msra.mxu1 %v6214_v51 }
 0xfc8   :  { %6192 = vmatprep.subr.bf16.mxu0 %v6584_v48  ;;  %6216 = vmatprep.subr.bf16.mxu1 %v6584_v48 }
 0xfcb   :  { %6194 = vmatpush3.bf16.msra.mxu0 %v6193_v2  ;;  %6218 = vmatpush3.bf16.msra.mxu1 %v6217_v32 }
 0xfcc   :  { %6195 = vmatprep.subr.bf16.mxu0 %v6584_v48  ;;  %6219 = vmatprep.subr.bf16.mxu1 %v6584_v48 }
 0xfcf   :  { %6197 = vmatpush3.bf16.msra.mxu0 %v6196_v52  ;;  %6221 = vmatpush3.bf16.msra.mxu1 %v6220_v3 }
0x1084   :  { %v3818_v16 = vpop.f32.mrb[30].mxu0  ;;  %v3889_v53 = vpop.f32.mrb[46].mxu1 }
0x1085   :  { %v6252_v19 = vadd.f32 %v3818_v16, %v7441_v29  ;;  %v3820_v9 = vpop.f32.mrb[31].mxu0  ;;  %v5135_v43 = vpop.f32.mrb[47].mxu1  ;;  %v3907_v61 = vadd.f32 %v7452_v55, %v3889_v53 }
0x1086   :  { %v6253_v5 = vadd.f32 %v3820_v9, %v7445_v20 }
0x1087   :  { %v4172_v44 = vmul.f32 -1.442695, %v6252_v19 }
0x1088   :  { %v4173_v54 = vmul.f32 -1.442695, %v6253_v5 }
0x1089   :  { %6448 = vpow2.f32 %v4172_v44 }
0x108a   :  { %6450 = vpow2.f32 %v4173_v54 }
0x1093   :  { %v6449_v11 = vpop.eup %6448 }
0x1094   :  { %v3897_v35 = vadd.f32 1.0, %v6449_v11  ;;  %v6451_v56 = vpop.eup %6450 }
0x1095   :  { %v3904_v1 = vadd.f32 1.0, %v6451_v56 }
0x1096   :  { %6452 = vrcp.f32 %v3897_v35 }
0x1097   :  { %6454 = vrcp.f32 %v3904_v1 }
0x10a0   :  { %v6453_v48 = vpop.eup %6452 }
0x10a1   :  { %v3908_v29 = vmul.f32 %v6453_v48, %v3907_v61  ;;  %v6455_v12 = vpop.eup %6454 }
0x10a2   :  { %v3911_v20 = vsub.f32 1.0, %v6455_v12  ;;  %v3913_v4 = vmul.f32 %v6455_v12, %v7731_v41 }
0x10a3   :  { %v3909_v17 = vadd.f32 %v3908_v29, %v2505_v10 }
0x10a5   :  { %6456 = vtanh.f32 %v3909_v17 }
0x10af   :  { %v6457_v0 = vpop.eup %6456 }
0x10b0   :  { %v3912_v15 = vmul.f32 %v6457_v0, %v3911_v20 }
0x10b2   :  { %v3914_v36 = vadd.f32 %v3913_v4, %v3912_v15 }
0x10b4   :  { %5169 = vmatmul.mubr.f32.vlgmr.msra.gmra.mrb[32].mxu0 %v3914_v36 }
0x1187   :  { %v4004_v55 = vpop.f32.mrb[32].mxu0 }
0x1188   :  { %v4005_v8 = vadd.f32 %v4174_v23, %v4004_v55  ;;  %v5170_v18 = vpop.f32.mrb[33].mxu0 }
0x118a   :  { %v4008_v25 = vmax.f32 %v4005_v8, 0.0 }
0x118c   :  { %5204 = vmatmul.mubr.f32.vlgmr.msra.gmra.mrb[48].mxu1 %v4008_v25 }
0x125f   :  { %v4098_v41 = vpop.f32.mrb[48].mxu1 }
0x1260   :  { %v4099_v22 = vadd.f32 %v4175_v27, %v4098_v41  ;;  %v5205_v30 = vpop.f32.mrb[49].mxu1 }
0x1262   :  { %4102 = vst [vmem:[%s7829_s13] sm:$0xff] %v4099_v22 }
0x1263   :  { %4107 = vsyncpa [#allocation5], 1 }
0x1264   :  { %4108 = vsyncpa [#allocation7], 1 }
0x1265   :  { %4109 = vsyncpa [#allocation10], 1 }

</bundles_post_ra>
